<compile_context>
chip_gen: v6e
topology: v6e:2x2x1
jax: 0.10.0
libtpu: 0.0.40
codegen_flags: <defaults>
</compile_context>

<pallas_src>
import jax
import jax.numpy as jnp
from jax.experimental import pallas as pl
from jax.experimental.pallas import tpu as pltpu

H = 768            # BERT hidden size
H8 = H // 8        # 96
H4 = H // 4        # 192
EPS = 1e-5         # torch.nn.LayerNorm default eps


def _linear_ln_relu(x_bf16, w, b, g, beta):
    """bf16 Linear (f32 accum) -> f32 LayerNorm(last dim) -> ReLU (torch semantics)."""
    y = jnp.dot(x_bf16, w[...], preferred_element_type=jnp.float32) + b[...]
    mu = jnp.mean(y, axis=-1, keepdims=True)
    var = jnp.mean(y * y, axis=-1, keepdims=True) - mu * mu   # biased, one-pass
    y = (y - mu) * jax.lax.rsqrt(var + EPS)
    y = jnp.maximum(y * g[...] + beta[...], 0.0)
    return y


def classifier_kernel(*refs):
    (x3_ref, xc_ref, ext_ref,
     tw1, tb1, tg1, tbe1, tw2, tb2, tg2, tbe2, tw3, tb3, tg3, tbe3,
     cw1, cb1, cg1, cbe1, cw2, cb2, cg2, cbe2, cw3, cb3, cg3, cbe3,
     fw1a, fw1b, fw1c, fb1, fg1, fbe1,
     fw2, fb2, fg2, fbe2,
     fw3, fb3, fg3, fbe3,
     fw4, fb4, fg4, fbe4,
     fw5_row, fb5,
     out_ref) = refs

    x3 = x3_ref[...]          # (TB, 768) bf16, third-line pooled output
    xc = xc_ref[...]          # (TB, 768) bf16, context-lines pooled output
    ext = ext_ref[...]        # (TB, 1)   f32, "extensions" scalar feature

    # third_line_nn: 768 -> 96 -> 96 -> 192 (Linear+LN+ReLU each)
    t = _linear_ln_relu(x3, tw1, tb1, tg1, tbe1)
    t = _linear_ln_relu(t.astype(jnp.bfloat16), tw2, tb2, tg2, tbe2)
    t = _linear_ln_relu(t.astype(jnp.bfloat16), tw3, tb3, tg3, tbe3)

    # context_lines_nn: 768 -> 96 -> 96 -> 192
    c = _linear_ln_relu(xc, cw1, cb1, cg1, cbe1)
    c = _linear_ln_relu(c.astype(jnp.bfloat16), cw2, cb2, cg2, cbe2)
    c = _linear_ln_relu(c.astype(jnp.bfloat16), cw3, cb3, cg3, cbe3)

    # final_nn layer 1: Linear(385 -> 768) on concat([t, c, ext], dim=1),
    # expressed as a split matmul (avoids a lane-dim concat):
    #   [t | c | ext] @ Wf1 == t @ Wf1a + c @ Wf1b + ext * wf1c
    y = (jnp.dot(t.astype(jnp.bfloat16), fw1a[...],
                 preferred_element_type=jnp.float32)
         + jnp.dot(c.astype(jnp.bfloat16), fw1b[...],
                   preferred_element_type=jnp.float32)
         + ext * fw1c[...]
         + fb1[...])
    mu = jnp.mean(y, axis=-1, keepdims=True)
    var = jnp.mean(y * y, axis=-1, keepdims=True) - mu * mu
    y = (y - mu) * jax.lax.rsqrt(var + EPS)
    y = jnp.maximum(y * fg1[...] + fbe1[...], 0.0)

    # final_nn layers 2-4: 768 -> 96 -> 96 -> 96
    y = _linear_ln_relu(y.astype(jnp.bfloat16), fw2, fb2, fg2, fbe2)
    y = _linear_ln_relu(y.astype(jnp.bfloat16), fw3, fb3, fg3, fbe3)
    y = _linear_ln_relu(y.astype(jnp.bfloat16), fw4, fb4, fg4, fbe4)

    # final_nn layer 5: 96 -> 1, Sigmoid.  N=1 matmul would waste the MXU, so use
    # a VPU multiply + lane reduce instead.
    logit = jnp.sum(y * fw5_row[...], axis=-1, keepdims=True) + fb5[...]
    prob = jax.nn.sigmoid(logit)                         # (TB, 1)
    out_ref[...] = jnp.broadcast_to(prob, out_ref.shape)  # lane-dense (TB, 128) store


def _round_up(x, m):
    return ((x + m - 1) // m) * m


def classifier_forward(x3_pooled, xc_pooled, extensions, params, *, tile_b=512):
    """params: flat list of arrays in the order expected by classifier_kernel."""
    B = x3_pooled.shape[0]

    # Batch tile: multiple of 16 (bf16 sublane packing); bounded by padded batch.
    tb = min((tile_b // 16) * 16, _round_up(B, 16))
    tb = max(16, tb)
    Bp = _round_up(B, tb)
    pad = Bp - B

    x3 = x3_pooled.astype(jnp.bfloat16)
    xc = xc_pooled.astype(jnp.bfloat16)
    ext = extensions.reshape(B, 1).astype(jnp.float32)
    if pad:
        x3 = jnp.pad(x3, ((0, pad), (0, 0)))
        xc = jnp.pad(xc, ((0, pad), (0, 0)))
        ext = jnp.pad(ext, ((0, pad), (0, 0)))

    # Activations: batch-tiled, auto double-buffered.  Weights: full-shape
    # resident blocks (same block for every grid step).
    in_specs = [
        pl.BlockSpec((tb, H), lambda i: (i, 0)),
        pl.BlockSpec((tb, H), lambda i: (i, 0)),
        pl.BlockSpec((tb, 1), lambda i: (i, 0)),
    ] + [pl.BlockSpec(p.shape, lambda i: (0, 0)) for p in params]
    out_spec = pl.BlockSpec((tb, 128), lambda i: (i, 0))

    out = pl.pallas_call(
        classifier_kernel,
        out_shape=jax.ShapeDtypeStruct((Bp, 128), jnp.float32),
        grid=(Bp // tb,),
        in_specs=in_specs,
        out_specs=out_spec,
        compiler_params=pltpu.CompilerParams(
            dimension_semantics=("parallel",)),
    )(x3, xc, ext, *params)
    return out[:B, :1]


def _linear_params(key, d_in, d_out):
    w = (jax.random.normal(key, (d_in, d_out), jnp.float32) * 0.02).astype(jnp.bfloat16)
    b = jnp.zeros((1, d_out), jnp.float32)
    return w, b


def _ln_params(d):
    return jnp.ones((1, d), jnp.float32), jnp.zeros((1, d), jnp.float32)


def build_params(key):
    keys = jax.random.split(key, 16)
    params = []

    # third_line_nn / context_lines_nn: three (Linear, LN) blocks each
    def head(kbase):
        p = []
        dims = [(H, H8), (H8, H8), (H8, H4)]
        for i, (di, do) in enumerate(dims):
            w, b = _linear_params(kbase[i], di, do)
            g, be = _ln_params(do)
            p += [w, b, g, be]
        return p

    params += head(jax.random.split(keys[0], 3))   # third_line_nn
    params += head(jax.random.split(keys[1], 3))   # context_lines_nn

    # final_nn layer 1: Linear(385 -> 768) split into (192 | 192 | 1) row blocks
    fw1 = jax.random.normal(keys[2], (H4 + H4 + 1, H), jnp.float32) * 0.02
    fw1a = fw1[:H4].astype(jnp.bfloat16)
    fw1b = fw1[H4:2 * H4].astype(jnp.bfloat16)
    fw1c = fw1[2 * H4:].reshape(1, H)              # f32: VPU path (ext * row)
    fb1 = jnp.zeros((1, H), jnp.float32)
    fg1, fbe1 = _ln_params(H)
    params += [fw1a, fw1b, fw1c, fb1, fg1, fbe1]

    # final_nn layers 2-4: 768 -> 96 -> 96 -> 96, each Linear + LN
    for i, (di, do) in enumerate([(H, H8), (H8, H8), (H8, H8)]):
        w, b = _linear_params(keys[3 + i], di, do)
        g, be = _ln_params(do)
        params += [w, b, g, be]

    # final_nn layer 5: 96 -> 1, stored transposed as a (1, 96) row for the
    # VPU multiply + lane-reduce path.
    w5_row = (jax.random.normal(keys[6], (1, H8), jnp.float32) * 0.02)
    b5 = jnp.zeros((1, 1), jnp.float32)
    params += [w5_row, b5]
    return params


if __name__ == "__main__":
    key = jax.random.PRNGKey(0)
    k_p, k_x3, k_xc, k_ext = jax.random.split(key, 4)

    B = 2  # small demo batch
    params = build_params(k_p)

    # Stand-ins for the two BERT pooled outputs + the scalar "extensions" feature.
    x3_pooled = jax.random.normal(k_x3, (B, H), jnp.float32)
    xc_pooled = jax.random.normal(k_xc, (B, H), jnp.float32)
    extensions = jax.random.normal(k_ext, (B,), jnp.float32)

    out = classifier_forward(x3_pooled, xc_pooled, extensions, params)
    out = jax.block_until_ready(out)
    assert out.shape == (B, 1) and out.dtype == jnp.float32
    assert bool(jnp.all(jnp.isfinite(out)))
    print("KERNEL_OK")
</pallas_src>

<mosaic_0001>
module attributes {stable_mosaic.version = 11 : i64} {
  func.func @classifier_kernel(%arg0: i32, %arg1: memref<16x768xbf16, #tpu.memory_space<vmem>>, %arg2: memref<16x768xbf16, #tpu.memory_space<vmem>>, %arg3: memref<16x1xf32, #tpu.memory_space<vmem>>, %arg4: memref<768x96xbf16, #tpu.memory_space<vmem>>, %arg5: memref<1x96xf32, #tpu.memory_space<vmem>>, %arg6: memref<1x96xf32, #tpu.memory_space<vmem>>, %arg7: memref<1x96xf32, #tpu.memory_space<vmem>>, %arg8: memref<96x96xbf16, #tpu.memory_space<vmem>>, %arg9: memref<1x96xf32, #tpu.memory_space<vmem>>, %arg10: memref<1x96xf32, #tpu.memory_space<vmem>>, %arg11: memref<1x96xf32, #tpu.memory_space<vmem>>, %arg12: memref<96x192xbf16, #tpu.memory_space<vmem>>, %arg13: memref<1x192xf32, #tpu.memory_space<vmem>>, %arg14: memref<1x192xf32, #tpu.memory_space<vmem>>, %arg15: memref<1x192xf32, #tpu.memory_space<vmem>>, %arg16: memref<768x96xbf16, #tpu.memory_space<vmem>>, %arg17: memref<1x96xf32, #tpu.memory_space<vmem>>, %arg18: memref<1x96xf32, #tpu.memory_space<vmem>>, %arg19: memref<1x96xf32, #tpu.memory_space<vmem>>, %arg20: memref<96x96xbf16, #tpu.memory_space<vmem>>, %arg21: memref<1x96xf32, #tpu.memory_space<vmem>>, %arg22: memref<1x96xf32, #tpu.memory_space<vmem>>, %arg23: memref<1x96xf32, #tpu.memory_space<vmem>>, %arg24: memref<96x192xbf16, #tpu.memory_space<vmem>>, %arg25: memref<1x192xf32, #tpu.memory_space<vmem>>, %arg26: memref<1x192xf32, #tpu.memory_space<vmem>>, %arg27: memref<1x192xf32, #tpu.memory_space<vmem>>, %arg28: memref<192x768xbf16, #tpu.memory_space<vmem>>, %arg29: memref<192x768xbf16, #tpu.memory_space<vmem>>, %arg30: memref<1x768xf32, #tpu.memory_space<vmem>>, %arg31: memref<1x768xf32, #tpu.memory_space<vmem>>, %arg32: memref<1x768xf32, #tpu.memory_space<vmem>>, %arg33: memref<1x768xf32, #tpu.memory_space<vmem>>, %arg34: memref<768x96xbf16, #tpu.memory_space<vmem>>, %arg35: memref<1x96xf32, #tpu.memory_space<vmem>>, %arg36: memref<1x96xf32, #tpu.memory_space<vmem>>, %arg37: memref<1x96xf32, #tpu.memory_space<vmem>>, %arg38: memref<96x96xbf16, #tpu.memory_space<vmem>>, %arg39: memref<1x96xf32, #tpu.memory_space<vmem>>, %arg40: memref<1x96xf32, #tpu.memory_space<vmem>>, %arg41: memref<1x96xf32, #tpu.memory_space<vmem>>, %arg42: memref<96x96xbf16, #tpu.memory_space<vmem>>, %arg43: memref<1x96xf32, #tpu.memory_space<vmem>>, %arg44: memref<1x96xf32, #tpu.memory_space<vmem>>, %arg45: memref<1x96xf32, #tpu.memory_space<vmem>>, %arg46: memref<1x96xf32, #tpu.memory_space<vmem>>, %arg47: memref<1x1xf32, #tpu.memory_space<vmem>>, %arg48: memref<16x128xf32, #tpu.memory_space<vmem>>) attributes {dimension_semantics = [#tpu.dimension_semantics<parallel>], iteration_bounds = array<i64: 1>, scalar_prefetch = 0 : i64, scratch_operands = 0 : i64, tpu.core_type = #tpu.core_type<tc>, window_params = [{transform_indices = @transform_0, window_bounds = array<i64: 16, 768>}, {transform_indices = @transform_1, window_bounds = array<i64: 16, 768>}, {transform_indices = @transform_2, window_bounds = array<i64: 16, 1>}, {pipeline_mode = #tpu.pipeline_mode<synchronous>, transform_indices = @transform_3, window_bounds = array<i64: 768, 96>}, {pipeline_mode = #tpu.pipeline_mode<synchronous>, transform_indices = @transform_4, window_bounds = array<i64: 1, 96>}, {pipeline_mode = #tpu.pipeline_mode<synchronous>, transform_indices = @transform_5, window_bounds = array<i64: 1, 96>}, {pipeline_mode = #tpu.pipeline_mode<synchronous>, transform_indices = @transform_6, window_bounds = array<i64: 1, 96>}, {pipeline_mode = #tpu.pipeline_mode<synchronous>, transform_indices = @transform_7, window_bounds = array<i64: 96, 96>}, {pipeline_mode = #tpu.pipeline_mode<synchronous>, transform_indices = @transform_8, window_bounds = array<i64: 1, 96>}, {pipeline_mode = #tpu.pipeline_mode<synchronous>, transform_indices = @transform_9, window_bounds = array<i64: 1, 96>}, {pipeline_mode = #tpu.pipeline_mode<synchronous>, transform_indices = @transform_10, window_bounds = array<i64: 1, 96>}, {pipeline_mode = #tpu.pipeline_mode<synchronous>, transform_indices = @transform_11, window_bounds = array<i64: 96, 192>}, {pipeline_mode = #tpu.pipeline_mode<synchronous>, transform_indices = @transform_12, window_bounds = array<i64: 1, 192>}, {pipeline_mode = #tpu.pipeline_mode<synchronous>, transform_indices = @transform_13, window_bounds = array<i64: 1, 192>}, {pipeline_mode = #tpu.pipeline_mode<synchronous>, transform_indices = @transform_14, window_bounds = array<i64: 1, 192>}, {pipeline_mode = #tpu.pipeline_mode<synchronous>, transform_indices = @transform_15, window_bounds = array<i64: 768, 96>}, {pipeline_mode = #tpu.pipeline_mode<synchronous>, transform_indices = @transform_16, window_bounds = array<i64: 1, 96>}, {pipeline_mode = #tpu.pipeline_mode<synchronous>, transform_indices = @transform_17, window_bounds = array<i64: 1, 96>}, {pipeline_mode = #tpu.pipeline_mode<synchronous>, transform_indices = @transform_18, window_bounds = array<i64: 1, 96>}, {pipeline_mode = #tpu.pipeline_mode<synchronous>, transform_indices = @transform_19, window_bounds = array<i64: 96, 96>}, {pipeline_mode = #tpu.pipeline_mode<synchronous>, transform_indices = @transform_20, window_bounds = array<i64: 1, 96>}, {pipeline_mode = #tpu.pipeline_mode<synchronous>, transform_indices = @transform_21, window_bounds = array<i64: 1, 96>}, {pipeline_mode = #tpu.pipeline_mode<synchronous>, transform_indices = @transform_22, window_bounds = array<i64: 1, 96>}, {pipeline_mode = #tpu.pipeline_mode<synchronous>, transform_indices = @transform_23, window_bounds = array<i64: 96, 192>}, {pipeline_mode = #tpu.pipeline_mode<synchronous>, transform_indices = @transform_24, window_bounds = array<i64: 1, 192>}, {pipeline_mode = #tpu.pipeline_mode<synchronous>, transform_indices = @transform_25, window_bounds = array<i64: 1, 192>}, {pipeline_mode = #tpu.pipeline_mode<synchronous>, transform_indices = @transform_26, window_bounds = array<i64: 1, 192>}, {pipeline_mode = #tpu.pipeline_mode<synchronous>, transform_indices = @transform_27, window_bounds = array<i64: 192, 768>}, {pipeline_mode = #tpu.pipeline_mode<synchronous>, transform_indices = @transform_28, window_bounds = array<i64: 192, 768>}, {pipeline_mode = #tpu.pipeline_mode<synchronous>, transform_indices = @transform_29, window_bounds = array<i64: 1, 768>}, {pipeline_mode = #tpu.pipeline_mode<synchronous>, transform_indices = @transform_30, window_bounds = array<i64: 1, 768>}, {pipeline_mode = #tpu.pipeline_mode<synchronous>, transform_indices = @transform_31, window_bounds = array<i64: 1, 768>}, {pipeline_mode = #tpu.pipeline_mode<synchronous>, transform_indices = @transform_32, window_bounds = array<i64: 1, 768>}, {pipeline_mode = #tpu.pipeline_mode<synchronous>, transform_indices = @transform_33, window_bounds = array<i64: 768, 96>}, {pipeline_mode = #tpu.pipeline_mode<synchronous>, transform_indices = @transform_34, window_bounds = array<i64: 1, 96>}, {pipeline_mode = #tpu.pipeline_mode<synchronous>, transform_indices = @transform_35, window_bounds = array<i64: 1, 96>}, {pipeline_mode = #tpu.pipeline_mode<synchronous>, transform_indices = @transform_36, window_bounds = array<i64: 1, 96>}, {pipeline_mode = #tpu.pipeline_mode<synchronous>, transform_indices = @transform_37, window_bounds = array<i64: 96, 96>}, {pipeline_mode = #tpu.pipeline_mode<synchronous>, transform_indices = @transform_38, window_bounds = array<i64: 1, 96>}, {pipeline_mode = #tpu.pipeline_mode<synchronous>, transform_indices = @transform_39, window_bounds = array<i64: 1, 96>}, {pipeline_mode = #tpu.pipeline_mode<synchronous>, transform_indices = @transform_40, window_bounds = array<i64: 1, 96>}, {pipeline_mode = #tpu.pipeline_mode<synchronous>, transform_indices = @transform_41, window_bounds = array<i64: 96, 96>}, {pipeline_mode = #tpu.pipeline_mode<synchronous>, transform_indices = @transform_42, window_bounds = array<i64: 1, 96>}, {pipeline_mode = #tpu.pipeline_mode<synchronous>, transform_indices = @transform_43, window_bounds = array<i64: 1, 96>}, {pipeline_mode = #tpu.pipeline_mode<synchronous>, transform_indices = @transform_44, window_bounds = array<i64: 1, 96>}, {pipeline_mode = #tpu.pipeline_mode<synchronous>, transform_indices = @transform_45, window_bounds = array<i64: 1, 96>}, {pipeline_mode = #tpu.pipeline_mode<synchronous>, transform_indices = @transform_46, window_bounds = array<i64: 1, 1>}, {transform_indices = @transform_47, window_bounds = array<i64: 16, 128>}]} {
    %c0 = arith.constant 0 : index
    %c0_0 = arith.constant 0 : index
    %0 = vector.load %arg1[%c0, %c0_0] : memref<16x768xbf16, #tpu.memory_space<vmem>>, vector<16x768xbf16>
    %c0_1 = arith.constant 0 : index
    %c0_2 = arith.constant 0 : index
    %1 = vector.load %arg2[%c0_1, %c0_2] : memref<16x768xbf16, #tpu.memory_space<vmem>>, vector<16x768xbf16>
    %c0_3 = arith.constant 0 : index
    %c0_4 = arith.constant 0 : index
    %2 = vector.load %arg3[%c0_3, %c0_4] : memref<16x1xf32, #tpu.memory_space<vmem>>, vector<16x1xf32>
    %c0_5 = arith.constant 0 : index
    %c0_6 = arith.constant 0 : index
    %3 = vector.load %arg4[%c0_5, %c0_6] : memref<768x96xbf16, #tpu.memory_space<vmem>>, vector<768x96xbf16>
    %cst = arith.constant dense<0.000000e+00> : vector<16x96xf32>
    %4 = tpu.matmul %0, %3, %cst {dimension_numbers = #tpu.dot_dimension_numbers<[1], [0], [0], [1], [0, 0, 1, 1], [], []>} : vector<16x768xbf16>, vector<768x96xbf16>, vector<16x96xf32> -> vector<16x96xf32>
    %c0_7 = arith.constant 0 : index
    %c0_8 = arith.constant 0 : index
    %5 = vector.load %arg5[%c0_7, %c0_8] : memref<1x96xf32, #tpu.memory_space<vmem>>, vector<1x96xf32>
    %6 = vector.broadcast %5 : vector<1x96xf32> to vector<16x96xf32>
    %7 = arith.addf %4, %6 : vector<16x96xf32>
    %cst_9 = arith.constant dense<0.000000e+00> : vector<16xf32>
    %8 = vector.multi_reduction <add>, %7, %cst_9 [1] : vector<16x96xf32> to vector<16xf32>
    %9 = vector.shape_cast %8 : vector<16xf32> to vector<16x1xf32>
    %cst_10 = arith.constant 9.600000e+01 : f32
    %10 = vector.broadcast %cst_10 : f32 to vector<16x1xf32>
    %11 = arith.divf %9, %10 : vector<16x1xf32>
    %12 = arith.mulf %7, %7 : vector<16x96xf32>
    %cst_11 = arith.constant dense<0.000000e+00> : vector<16xf32>
    %13 = vector.multi_reduction <add>, %12, %cst_11 [1] : vector<16x96xf32> to vector<16xf32>
    %14 = vector.shape_cast %13 : vector<16xf32> to vector<16x1xf32>
    %cst_12 = arith.constant 9.600000e+01 : f32
    %15 = vector.broadcast %cst_12 : f32 to vector<16x1xf32>
    %16 = arith.divf %14, %15 : vector<16x1xf32>
    %17 = arith.mulf %11, %11 : vector<16x1xf32>
    %18 = arith.subf %16, %17 : vector<16x1xf32>
    %19 = vector.broadcast %11 : vector<16x1xf32> to vector<16x96xf32>
    %20 = arith.subf %7, %19 : vector<16x96xf32>
    %cst_13 = arith.constant 9.99999974E-6 : f32
    %21 = vector.broadcast %cst_13 : f32 to vector<16x1xf32>
    %22 = arith.addf %18, %21 : vector<16x1xf32>
    %23 = math.rsqrt %22 : vector<16x1xf32>
    %24 = vector.broadcast %23 : vector<16x1xf32> to vector<16x96xf32>
    %25 = arith.mulf %20, %24 : vector<16x96xf32>
    %c0_14 = arith.constant 0 : index
    %c0_15 = arith.constant 0 : index
    %26 = vector.load %arg6[%c0_14, %c0_15] : memref<1x96xf32, #tpu.memory_space<vmem>>, vector<1x96xf32>
    %27 = vector.broadcast %26 : vector<1x96xf32> to vector<16x96xf32>
    %28 = arith.mulf %25, %27 : vector<16x96xf32>
    %c0_16 = arith.constant 0 : index
    %c0_17 = arith.constant 0 : index
    %29 = vector.load %arg7[%c0_16, %c0_17] : memref<1x96xf32, #tpu.memory_space<vmem>>, vector<1x96xf32>
    %30 = vector.broadcast %29 : vector<1x96xf32> to vector<16x96xf32>
    %31 = arith.addf %28, %30 : vector<16x96xf32>
    %cst_18 = arith.constant 0.000000e+00 : f32
    %32 = vector.broadcast %cst_18 : f32 to vector<16x96xf32>
    %33 = arith.maximumf %31, %32 : vector<16x96xf32>
    %34 = arith.truncf %33 : vector<16x96xf32> to vector<16x96xbf16>
    %c0_19 = arith.constant 0 : index
    %c0_20 = arith.constant 0 : index
    %35 = vector.load %arg8[%c0_19, %c0_20] : memref<96x96xbf16, #tpu.memory_space<vmem>>, vector<96x96xbf16>
    %cst_21 = arith.constant dense<0.000000e+00> : vector<16x96xf32>
    %36 = tpu.matmul %34, %35, %cst_21 {dimension_numbers = #tpu.dot_dimension_numbers<[1], [0], [0], [1], [0, 0, 1, 1], [], []>} : vector<16x96xbf16>, vector<96x96xbf16>, vector<16x96xf32> -> vector<16x96xf32>
    %c0_22 = arith.constant 0 : index
    %c0_23 = arith.constant 0 : index
    %37 = vector.load %arg9[%c0_22, %c0_23] : memref<1x96xf32, #tpu.memory_space<vmem>>, vector<1x96xf32>
    %38 = vector.broadcast %37 : vector<1x96xf32> to vector<16x96xf32>
    %39 = arith.addf %36, %38 : vector<16x96xf32>
    %cst_24 = arith.constant dense<0.000000e+00> : vector<16xf32>
    %40 = vector.multi_reduction <add>, %39, %cst_24 [1] : vector<16x96xf32> to vector<16xf32>
    %41 = vector.shape_cast %40 : vector<16xf32> to vector<16x1xf32>
    %cst_25 = arith.constant 9.600000e+01 : f32
    %42 = vector.broadcast %cst_25 : f32 to vector<16x1xf32>
    %43 = arith.divf %41, %42 : vector<16x1xf32>
    %44 = arith.mulf %39, %39 : vector<16x96xf32>
    %cst_26 = arith.constant dense<0.000000e+00> : vector<16xf32>
    %45 = vector.multi_reduction <add>, %44, %cst_26 [1] : vector<16x96xf32> to vector<16xf32>
    %46 = vector.shape_cast %45 : vector<16xf32> to vector<16x1xf32>
    %cst_27 = arith.constant 9.600000e+01 : f32
    %47 = vector.broadcast %cst_27 : f32 to vector<16x1xf32>
    %48 = arith.divf %46, %47 : vector<16x1xf32>
    %49 = arith.mulf %43, %43 : vector<16x1xf32>
    %50 = arith.subf %48, %49 : vector<16x1xf32>
    %51 = vector.broadcast %43 : vector<16x1xf32> to vector<16x96xf32>
    %52 = arith.subf %39, %51 : vector<16x96xf32>
    %cst_28 = arith.constant 9.99999974E-6 : f32
    %53 = vector.broadcast %cst_28 : f32 to vector<16x1xf32>
    %54 = arith.addf %50, %53 : vector<16x1xf32>
    %55 = math.rsqrt %54 : vector<16x1xf32>
    %56 = vector.broadcast %55 : vector<16x1xf32> to vector<16x96xf32>
    %57 = arith.mulf %52, %56 : vector<16x96xf32>
    %c0_29 = arith.constant 0 : index
    %c0_30 = arith.constant 0 : index
    %58 = vector.load %arg10[%c0_29, %c0_30] : memref<1x96xf32, #tpu.memory_space<vmem>>, vector<1x96xf32>
    %59 = vector.broadcast %58 : vector<1x96xf32> to vector<16x96xf32>
    %60 = arith.mulf %57, %59 : vector<16x96xf32>
    %c0_31 = arith.constant 0 : index
    %c0_32 = arith.constant 0 : index
    %61 = vector.load %arg11[%c0_31, %c0_32] : memref<1x96xf32, #tpu.memory_space<vmem>>, vector<1x96xf32>
    %62 = vector.broadcast %61 : vector<1x96xf32> to vector<16x96xf32>
    %63 = arith.addf %60, %62 : vector<16x96xf32>
    %cst_33 = arith.constant 0.000000e+00 : f32
    %64 = vector.broadcast %cst_33 : f32 to vector<16x96xf32>
    %65 = arith.maximumf %63, %64 : vector<16x96xf32>
    %66 = arith.truncf %65 : vector<16x96xf32> to vector<16x96xbf16>
    %c0_34 = arith.constant 0 : index
    %c0_35 = arith.constant 0 : index
    %67 = vector.load %arg12[%c0_34, %c0_35] : memref<96x192xbf16, #tpu.memory_space<vmem>>, vector<96x192xbf16>
    %cst_36 = arith.constant dense<0.000000e+00> : vector<16x192xf32>
    %68 = tpu.matmul %66, %67, %cst_36 {dimension_numbers = #tpu.dot_dimension_numbers<[1], [0], [0], [1], [0, 0, 1, 1], [], []>} : vector<16x96xbf16>, vector<96x192xbf16>, vector<16x192xf32> -> vector<16x192xf32>
    %c0_37 = arith.constant 0 : index
    %c0_38 = arith.constant 0 : index
    %69 = vector.load %arg13[%c0_37, %c0_38] : memref<1x192xf32, #tpu.memory_space<vmem>>, vector<1x192xf32>
    %70 = vector.broadcast %69 : vector<1x192xf32> to vector<16x192xf32>
    %71 = arith.addf %68, %70 : vector<16x192xf32>
    %cst_39 = arith.constant dense<0.000000e+00> : vector<16xf32>
    %72 = vector.multi_reduction <add>, %71, %cst_39 [1] : vector<16x192xf32> to vector<16xf32>
    %73 = vector.shape_cast %72 : vector<16xf32> to vector<16x1xf32>
    %cst_40 = arith.constant 1.920000e+02 : f32
    %74 = vector.broadcast %cst_40 : f32 to vector<16x1xf32>
    %75 = arith.divf %73, %74 : vector<16x1xf32>
    %76 = arith.mulf %71, %71 : vector<16x192xf32>
    %cst_41 = arith.constant dense<0.000000e+00> : vector<16xf32>
    %77 = vector.multi_reduction <add>, %76, %cst_41 [1] : vector<16x192xf32> to vector<16xf32>
    %78 = vector.shape_cast %77 : vector<16xf32> to vector<16x1xf32>
    %cst_42 = arith.constant 1.920000e+02 : f32
    %79 = vector.broadcast %cst_42 : f32 to vector<16x1xf32>
    %80 = arith.divf %78, %79 : vector<16x1xf32>
    %81 = arith.mulf %75, %75 : vector<16x1xf32>
    %82 = arith.subf %80, %81 : vector<16x1xf32>
    %83 = vector.broadcast %75 : vector<16x1xf32> to vector<16x192xf32>
    %84 = arith.subf %71, %83 : vector<16x192xf32>
    %cst_43 = arith.constant 9.99999974E-6 : f32
    %85 = vector.broadcast %cst_43 : f32 to vector<16x1xf32>
    %86 = arith.addf %82, %85 : vector<16x1xf32>
    %87 = math.rsqrt %86 : vector<16x1xf32>
    %88 = vector.broadcast %87 : vector<16x1xf32> to vector<16x192xf32>
    %89 = arith.mulf %84, %88 : vector<16x192xf32>
    %c0_44 = arith.constant 0 : index
    %c0_45 = arith.constant 0 : index
    %90 = vector.load %arg14[%c0_44, %c0_45] : memref<1x192xf32, #tpu.memory_space<vmem>>, vector<1x192xf32>
    %91 = vector.broadcast %90 : vector<1x192xf32> to vector<16x192xf32>
    %92 = arith.mulf %89, %91 : vector<16x192xf32>
    %c0_46 = arith.constant 0 : index
    %c0_47 = arith.constant 0 : index
    %93 = vector.load %arg15[%c0_46, %c0_47] : memref<1x192xf32, #tpu.memory_space<vmem>>, vector<1x192xf32>
    %94 = vector.broadcast %93 : vector<1x192xf32> to vector<16x192xf32>
    %95 = arith.addf %92, %94 : vector<16x192xf32>
    %cst_48 = arith.constant 0.000000e+00 : f32
    %96 = vector.broadcast %cst_48 : f32 to vector<16x192xf32>
    %97 = arith.maximumf %95, %96 : vector<16x192xf32>
    %c0_49 = arith.constant 0 : index
    %c0_50 = arith.constant 0 : index
    %98 = vector.load %arg16[%c0_49, %c0_50] : memref<768x96xbf16, #tpu.memory_space<vmem>>, vector<768x96xbf16>
    %cst_51 = arith.constant dense<0.000000e+00> : vector<16x96xf32>
    %99 = tpu.matmul %1, %98, %cst_51 {dimension_numbers = #tpu.dot_dimension_numbers<[1], [0], [0], [1], [0, 0, 1, 1], [], []>} : vector<16x768xbf16>, vector<768x96xbf16>, vector<16x96xf32> -> vector<16x96xf32>
    %c0_52 = arith.constant 0 : index
    %c0_53 = arith.constant 0 : index
    %100 = vector.load %arg17[%c0_52, %c0_53] : memref<1x96xf32, #tpu.memory_space<vmem>>, vector<1x96xf32>
    %101 = vector.broadcast %100 : vector<1x96xf32> to vector<16x96xf32>
    %102 = arith.addf %99, %101 : vector<16x96xf32>
    %cst_54 = arith.constant dense<0.000000e+00> : vector<16xf32>
    %103 = vector.multi_reduction <add>, %102, %cst_54 [1] : vector<16x96xf32> to vector<16xf32>
    %104 = vector.shape_cast %103 : vector<16xf32> to vector<16x1xf32>
    %cst_55 = arith.constant 9.600000e+01 : f32
    %105 = vector.broadcast %cst_55 : f32 to vector<16x1xf32>
    %106 = arith.divf %104, %105 : vector<16x1xf32>
    %107 = arith.mulf %102, %102 : vector<16x96xf32>
    %cst_56 = arith.constant dense<0.000000e+00> : vector<16xf32>
    %108 = vector.multi_reduction <add>, %107, %cst_56 [1] : vector<16x96xf32> to vector<16xf32>
    %109 = vector.shape_cast %108 : vector<16xf32> to vector<16x1xf32>
    %cst_57 = arith.constant 9.600000e+01 : f32
    %110 = vector.broadcast %cst_57 : f32 to vector<16x1xf32>
    %111 = arith.divf %109, %110 : vector<16x1xf32>
    %112 = arith.mulf %106, %106 : vector<16x1xf32>
    %113 = arith.subf %111, %112 : vector<16x1xf32>
    %114 = vector.broadcast %106 : vector<16x1xf32> to vector<16x96xf32>
    %115 = arith.subf %102, %114 : vector<16x96xf32>
    %cst_58 = arith.constant 9.99999974E-6 : f32
    %116 = vector.broadcast %cst_58 : f32 to vector<16x1xf32>
    %117 = arith.addf %113, %116 : vector<16x1xf32>
    %118 = math.rsqrt %117 : vector<16x1xf32>
    %119 = vector.broadcast %118 : vector<16x1xf32> to vector<16x96xf32>
    %120 = arith.mulf %115, %119 : vector<16x96xf32>
    %c0_59 = arith.constant 0 : index
    %c0_60 = arith.constant 0 : index
    %121 = vector.load %arg18[%c0_59, %c0_60] : memref<1x96xf32, #tpu.memory_space<vmem>>, vector<1x96xf32>
    %122 = vector.broadcast %121 : vector<1x96xf32> to vector<16x96xf32>
    %123 = arith.mulf %120, %122 : vector<16x96xf32>
    %c0_61 = arith.constant 0 : index
    %c0_62 = arith.constant 0 : index
    %124 = vector.load %arg19[%c0_61, %c0_62] : memref<1x96xf32, #tpu.memory_space<vmem>>, vector<1x96xf32>
    %125 = vector.broadcast %124 : vector<1x96xf32> to vector<16x96xf32>
    %126 = arith.addf %123, %125 : vector<16x96xf32>
    %cst_63 = arith.constant 0.000000e+00 : f32
    %127 = vector.broadcast %cst_63 : f32 to vector<16x96xf32>
    %128 = arith.maximumf %126, %127 : vector<16x96xf32>
    %129 = arith.truncf %128 : vector<16x96xf32> to vector<16x96xbf16>
    %c0_64 = arith.constant 0 : index
    %c0_65 = arith.constant 0 : index
    %130 = vector.load %arg20[%c0_64, %c0_65] : memref<96x96xbf16, #tpu.memory_space<vmem>>, vector<96x96xbf16>
    %cst_66 = arith.constant dense<0.000000e+00> : vector<16x96xf32>
    %131 = tpu.matmul %129, %130, %cst_66 {dimension_numbers = #tpu.dot_dimension_numbers<[1], [0], [0], [1], [0, 0, 1, 1], [], []>} : vector<16x96xbf16>, vector<96x96xbf16>, vector<16x96xf32> -> vector<16x96xf32>
    %c0_67 = arith.constant 0 : index
    %c0_68 = arith.constant 0 : index
    %132 = vector.load %arg21[%c0_67, %c0_68] : memref<1x96xf32, #tpu.memory_space<vmem>>, vector<1x96xf32>
    %133 = vector.broadcast %132 : vector<1x96xf32> to vector<16x96xf32>
    %134 = arith.addf %131, %133 : vector<16x96xf32>
    %cst_69 = arith.constant dense<0.000000e+00> : vector<16xf32>
    %135 = vector.multi_reduction <add>, %134, %cst_69 [1] : vector<16x96xf32> to vector<16xf32>
    %136 = vector.shape_cast %135 : vector<16xf32> to vector<16x1xf32>
    %cst_70 = arith.constant 9.600000e+01 : f32
    %137 = vector.broadcast %cst_70 : f32 to vector<16x1xf32>
    %138 = arith.divf %136, %137 : vector<16x1xf32>
    %139 = arith.mulf %134, %134 : vector<16x96xf32>
    %cst_71 = arith.constant dense<0.000000e+00> : vector<16xf32>
    %140 = vector.multi_reduction <add>, %139, %cst_71 [1] : vector<16x96xf32> to vector<16xf32>
    %141 = vector.shape_cast %140 : vector<16xf32> to vector<16x1xf32>
    %cst_72 = arith.constant 9.600000e+01 : f32
    %142 = vector.broadcast %cst_72 : f32 to vector<16x1xf32>
    %143 = arith.divf %141, %142 : vector<16x1xf32>
    %144 = arith.mulf %138, %138 : vector<16x1xf32>
    %145 = arith.subf %143, %144 : vector<16x1xf32>
    %146 = vector.broadcast %138 : vector<16x1xf32> to vector<16x96xf32>
    %147 = arith.subf %134, %146 : vector<16x96xf32>
    %cst_73 = arith.constant 9.99999974E-6 : f32
    %148 = vector.broadcast %cst_73 : f32 to vector<16x1xf32>
    %149 = arith.addf %145, %148 : vector<16x1xf32>
    %150 = math.rsqrt %149 : vector<16x1xf32>
    %151 = vector.broadcast %150 : vector<16x1xf32> to vector<16x96xf32>
    %152 = arith.mulf %147, %151 : vector<16x96xf32>
    %c0_74 = arith.constant 0 : index
    %c0_75 = arith.constant 0 : index
    %153 = vector.load %arg22[%c0_74, %c0_75] : memref<1x96xf32, #tpu.memory_space<vmem>>, vector<1x96xf32>
    %154 = vector.broadcast %153 : vector<1x96xf32> to vector<16x96xf32>
    %155 = arith.mulf %152, %154 : vector<16x96xf32>
    %c0_76 = arith.constant 0 : index
    %c0_77 = arith.constant 0 : index
    %156 = vector.load %arg23[%c0_76, %c0_77] : memref<1x96xf32, #tpu.memory_space<vmem>>, vector<1x96xf32>
    %157 = vector.broadcast %156 : vector<1x96xf32> to vector<16x96xf32>
    %158 = arith.addf %155, %157 : vector<16x96xf32>
    %cst_78 = arith.constant 0.000000e+00 : f32
    %159 = vector.broadcast %cst_78 : f32 to vector<16x96xf32>
    %160 = arith.maximumf %158, %159 : vector<16x96xf32>
    %161 = arith.truncf %160 : vector<16x96xf32> to vector<16x96xbf16>
    %c0_79 = arith.constant 0 : index
    %c0_80 = arith.constant 0 : index
    %162 = vector.load %arg24[%c0_79, %c0_80] : memref<96x192xbf16, #tpu.memory_space<vmem>>, vector<96x192xbf16>
    %cst_81 = arith.constant dense<0.000000e+00> : vector<16x192xf32>
    %163 = tpu.matmul %161, %162, %cst_81 {dimension_numbers = #tpu.dot_dimension_numbers<[1], [0], [0], [1], [0, 0, 1, 1], [], []>} : vector<16x96xbf16>, vector<96x192xbf16>, vector<16x192xf32> -> vector<16x192xf32>
    %c0_82 = arith.constant 0 : index
    %c0_83 = arith.constant 0 : index
    %164 = vector.load %arg25[%c0_82, %c0_83] : memref<1x192xf32, #tpu.memory_space<vmem>>, vector<1x192xf32>
    %165 = vector.broadcast %164 : vector<1x192xf32> to vector<16x192xf32>
    %166 = arith.addf %163, %165 : vector<16x192xf32>
    %cst_84 = arith.constant dense<0.000000e+00> : vector<16xf32>
    %167 = vector.multi_reduction <add>, %166, %cst_84 [1] : vector<16x192xf32> to vector<16xf32>
    %168 = vector.shape_cast %167 : vector<16xf32> to vector<16x1xf32>
    %cst_85 = arith.constant 1.920000e+02 : f32
    %169 = vector.broadcast %cst_85 : f32 to vector<16x1xf32>
    %170 = arith.divf %168, %169 : vector<16x1xf32>
    %171 = arith.mulf %166, %166 : vector<16x192xf32>
    %cst_86 = arith.constant dense<0.000000e+00> : vector<16xf32>
    %172 = vector.multi_reduction <add>, %171, %cst_86 [1] : vector<16x192xf32> to vector<16xf32>
    %173 = vector.shape_cast %172 : vector<16xf32> to vector<16x1xf32>
    %cst_87 = arith.constant 1.920000e+02 : f32
    %174 = vector.broadcast %cst_87 : f32 to vector<16x1xf32>
    %175 = arith.divf %173, %174 : vector<16x1xf32>
    %176 = arith.mulf %170, %170 : vector<16x1xf32>
    %177 = arith.subf %175, %176 : vector<16x1xf32>
    %178 = vector.broadcast %170 : vector<16x1xf32> to vector<16x192xf32>
    %179 = arith.subf %166, %178 : vector<16x192xf32>
    %cst_88 = arith.constant 9.99999974E-6 : f32
    %180 = vector.broadcast %cst_88 : f32 to vector<16x1xf32>
    %181 = arith.addf %177, %180 : vector<16x1xf32>
    %182 = math.rsqrt %181 : vector<16x1xf32>
    %183 = vector.broadcast %182 : vector<16x1xf32> to vector<16x192xf32>
    %184 = arith.mulf %179, %183 : vector<16x192xf32>
    %c0_89 = arith.constant 0 : index
    %c0_90 = arith.constant 0 : index
    %185 = vector.load %arg26[%c0_89, %c0_90] : memref<1x192xf32, #tpu.memory_space<vmem>>, vector<1x192xf32>
    %186 = vector.broadcast %185 : vector<1x192xf32> to vector<16x192xf32>
    %187 = arith.mulf %184, %186 : vector<16x192xf32>
    %c0_91 = arith.constant 0 : index
    %c0_92 = arith.constant 0 : index
    %188 = vector.load %arg27[%c0_91, %c0_92] : memref<1x192xf32, #tpu.memory_space<vmem>>, vector<1x192xf32>
    %189 = vector.broadcast %188 : vector<1x192xf32> to vector<16x192xf32>
    %190 = arith.addf %187, %189 : vector<16x192xf32>
    %cst_93 = arith.constant 0.000000e+00 : f32
    %191 = vector.broadcast %cst_93 : f32 to vector<16x192xf32>
    %192 = arith.maximumf %190, %191 : vector<16x192xf32>
    %193 = arith.truncf %97 : vector<16x192xf32> to vector<16x192xbf16>
    %c0_94 = arith.constant 0 : index
    %c0_95 = arith.constant 0 : index
    %194 = vector.load %arg28[%c0_94, %c0_95] : memref<192x768xbf16, #tpu.memory_space<vmem>>, vector<192x768xbf16>
    %cst_96 = arith.constant dense<0.000000e+00> : vector<16x768xf32>
    %195 = tpu.matmul %193, %194, %cst_96 {dimension_numbers = #tpu.dot_dimension_numbers<[1], [0], [0], [1], [0, 0, 1, 1], [], []>} : vector<16x192xbf16>, vector<192x768xbf16>, vector<16x768xf32> -> vector<16x768xf32>
    %196 = arith.truncf %192 : vector<16x192xf32> to vector<16x192xbf16>
    %c0_97 = arith.constant 0 : index
    %c0_98 = arith.constant 0 : index
    %197 = vector.load %arg29[%c0_97, %c0_98] : memref<192x768xbf16, #tpu.memory_space<vmem>>, vector<192x768xbf16>
    %cst_99 = arith.constant dense<0.000000e+00> : vector<16x768xf32>
    %198 = tpu.matmul %196, %197, %cst_99 {dimension_numbers = #tpu.dot_dimension_numbers<[1], [0], [0], [1], [0, 0, 1, 1], [], []>} : vector<16x192xbf16>, vector<192x768xbf16>, vector<16x768xf32> -> vector<16x768xf32>
    %199 = arith.addf %195, %198 : vector<16x768xf32>
    %c0_100 = arith.constant 0 : index
    %c0_101 = arith.constant 0 : index
    %200 = vector.load %arg30[%c0_100, %c0_101] : memref<1x768xf32, #tpu.memory_space<vmem>>, vector<1x768xf32>
    %201 = vector.broadcast %2 : vector<16x1xf32> to vector<16x768xf32>
    %202 = vector.broadcast %200 : vector<1x768xf32> to vector<16x768xf32>
    %203 = arith.mulf %201, %202 : vector<16x768xf32>
    %204 = arith.addf %199, %203 : vector<16x768xf32>
    %c0_102 = arith.constant 0 : index
    %c0_103 = arith.constant 0 : index
    %205 = vector.load %arg31[%c0_102, %c0_103] : memref<1x768xf32, #tpu.memory_space<vmem>>, vector<1x768xf32>
    %206 = vector.broadcast %205 : vector<1x768xf32> to vector<16x768xf32>
    %207 = arith.addf %204, %206 : vector<16x768xf32>
    %cst_104 = arith.constant dense<0.000000e+00> : vector<16xf32>
    %208 = vector.multi_reduction <add>, %207, %cst_104 [1] : vector<16x768xf32> to vector<16xf32>
    %209 = vector.shape_cast %208 : vector<16xf32> to vector<16x1xf32>
    %cst_105 = arith.constant 7.680000e+02 : f32
    %210 = vector.broadcast %cst_105 : f32 to vector<16x1xf32>
    %211 = arith.divf %209, %210 : vector<16x1xf32>
    %212 = arith.mulf %207, %207 : vector<16x768xf32>
    %cst_106 = arith.constant dense<0.000000e+00> : vector<16xf32>
    %213 = vector.multi_reduction <add>, %212, %cst_106 [1] : vector<16x768xf32> to vector<16xf32>
    %214 = vector.shape_cast %213 : vector<16xf32> to vector<16x1xf32>
    %cst_107 = arith.constant 7.680000e+02 : f32
    %215 = vector.broadcast %cst_107 : f32 to vector<16x1xf32>
    %216 = arith.divf %214, %215 : vector<16x1xf32>
    %217 = arith.mulf %211, %211 : vector<16x1xf32>
    %218 = arith.subf %216, %217 : vector<16x1xf32>
    %219 = vector.broadcast %211 : vector<16x1xf32> to vector<16x768xf32>
    %220 = arith.subf %207, %219 : vector<16x768xf32>
    %cst_108 = arith.constant 9.99999974E-6 : f32
    %221 = vector.broadcast %cst_108 : f32 to vector<16x1xf32>
    %222 = arith.addf %218, %221 : vector<16x1xf32>
    %223 = math.rsqrt %222 : vector<16x1xf32>
    %224 = vector.broadcast %223 : vector<16x1xf32> to vector<16x768xf32>
    %225 = arith.mulf %220, %224 : vector<16x768xf32>
    %c0_109 = arith.constant 0 : index
    %c0_110 = arith.constant 0 : index
    %226 = vector.load %arg32[%c0_109, %c0_110] : memref<1x768xf32, #tpu.memory_space<vmem>>, vector<1x768xf32>
    %227 = vector.broadcast %226 : vector<1x768xf32> to vector<16x768xf32>
    %228 = arith.mulf %225, %227 : vector<16x768xf32>
    %c0_111 = arith.constant 0 : index
    %c0_112 = arith.constant 0 : index
    %229 = vector.load %arg33[%c0_111, %c0_112] : memref<1x768xf32, #tpu.memory_space<vmem>>, vector<1x768xf32>
    %230 = vector.broadcast %229 : vector<1x768xf32> to vector<16x768xf32>
    %231 = arith.addf %228, %230 : vector<16x768xf32>
    %cst_113 = arith.constant 0.000000e+00 : f32
    %232 = vector.broadcast %cst_113 : f32 to vector<16x768xf32>
    %233 = arith.maximumf %231, %232 : vector<16x768xf32>
    %234 = arith.truncf %233 : vector<16x768xf32> to vector<16x768xbf16>
    %c0_114 = arith.constant 0 : index
    %c0_115 = arith.constant 0 : index
    %235 = vector.load %arg34[%c0_114, %c0_115] : memref<768x96xbf16, #tpu.memory_space<vmem>>, vector<768x96xbf16>
    %cst_116 = arith.constant dense<0.000000e+00> : vector<16x96xf32>
    %236 = tpu.matmul %234, %235, %cst_116 {dimension_numbers = #tpu.dot_dimension_numbers<[1], [0], [0], [1], [0, 0, 1, 1], [], []>} : vector<16x768xbf16>, vector<768x96xbf16>, vector<16x96xf32> -> vector<16x96xf32>
    %c0_117 = arith.constant 0 : index
    %c0_118 = arith.constant 0 : index
    %237 = vector.load %arg35[%c0_117, %c0_118] : memref<1x96xf32, #tpu.memory_space<vmem>>, vector<1x96xf32>
    %238 = vector.broadcast %237 : vector<1x96xf32> to vector<16x96xf32>
    %239 = arith.addf %236, %238 : vector<16x96xf32>
    %cst_119 = arith.constant dense<0.000000e+00> : vector<16xf32>
    %240 = vector.multi_reduction <add>, %239, %cst_119 [1] : vector<16x96xf32> to vector<16xf32>
    %241 = vector.shape_cast %240 : vector<16xf32> to vector<16x1xf32>
    %cst_120 = arith.constant 9.600000e+01 : f32
    %242 = vector.broadcast %cst_120 : f32 to vector<16x1xf32>
    %243 = arith.divf %241, %242 : vector<16x1xf32>
    %244 = arith.mulf %239, %239 : vector<16x96xf32>
    %cst_121 = arith.constant dense<0.000000e+00> : vector<16xf32>
    %245 = vector.multi_reduction <add>, %244, %cst_121 [1] : vector<16x96xf32> to vector<16xf32>
    %246 = vector.shape_cast %245 : vector<16xf32> to vector<16x1xf32>
    %cst_122 = arith.constant 9.600000e+01 : f32
    %247 = vector.broadcast %cst_122 : f32 to vector<16x1xf32>
    %248 = arith.divf %246, %247 : vector<16x1xf32>
    %249 = arith.mulf %243, %243 : vector<16x1xf32>
    %250 = arith.subf %248, %249 : vector<16x1xf32>
    %251 = vector.broadcast %243 : vector<16x1xf32> to vector<16x96xf32>
    %252 = arith.subf %239, %251 : vector<16x96xf32>
    %cst_123 = arith.constant 9.99999974E-6 : f32
    %253 = vector.broadcast %cst_123 : f32 to vector<16x1xf32>
    %254 = arith.addf %250, %253 : vector<16x1xf32>
    %255 = math.rsqrt %254 : vector<16x1xf32>
    %256 = vector.broadcast %255 : vector<16x1xf32> to vector<16x96xf32>
    %257 = arith.mulf %252, %256 : vector<16x96xf32>
    %c0_124 = arith.constant 0 : index
    %c0_125 = arith.constant 0 : index
    %258 = vector.load %arg36[%c0_124, %c0_125] : memref<1x96xf32, #tpu.memory_space<vmem>>, vector<1x96xf32>
    %259 = vector.broadcast %258 : vector<1x96xf32> to vector<16x96xf32>
    %260 = arith.mulf %257, %259 : vector<16x96xf32>
    %c0_126 = arith.constant 0 : index
    %c0_127 = arith.constant 0 : index
    %261 = vector.load %arg37[%c0_126, %c0_127] : memref<1x96xf32, #tpu.memory_space<vmem>>, vector<1x96xf32>
    %262 = vector.broadcast %261 : vector<1x96xf32> to vector<16x96xf32>
    %263 = arith.addf %260, %262 : vector<16x96xf32>
    %cst_128 = arith.constant 0.000000e+00 : f32
    %264 = vector.broadcast %cst_128 : f32 to vector<16x96xf32>
    %265 = arith.maximumf %263, %264 : vector<16x96xf32>
    %266 = arith.truncf %265 : vector<16x96xf32> to vector<16x96xbf16>
    %c0_129 = arith.constant 0 : index
    %c0_130 = arith.constant 0 : index
    %267 = vector.load %arg38[%c0_129, %c0_130] : memref<96x96xbf16, #tpu.memory_space<vmem>>, vector<96x96xbf16>
    %cst_131 = arith.constant dense<0.000000e+00> : vector<16x96xf32>
    %268 = tpu.matmul %266, %267, %cst_131 {dimension_numbers = #tpu.dot_dimension_numbers<[1], [0], [0], [1], [0, 0, 1, 1], [], []>} : vector<16x96xbf16>, vector<96x96xbf16>, vector<16x96xf32> -> vector<16x96xf32>
    %c0_132 = arith.constant 0 : index
    %c0_133 = arith.constant 0 : index
    %269 = vector.load %arg39[%c0_132, %c0_133] : memref<1x96xf32, #tpu.memory_space<vmem>>, vector<1x96xf32>
    %270 = vector.broadcast %269 : vector<1x96xf32> to vector<16x96xf32>
    %271 = arith.addf %268, %270 : vector<16x96xf32>
    %cst_134 = arith.constant dense<0.000000e+00> : vector<16xf32>
    %272 = vector.multi_reduction <add>, %271, %cst_134 [1] : vector<16x96xf32> to vector<16xf32>
    %273 = vector.shape_cast %272 : vector<16xf32> to vector<16x1xf32>
    %cst_135 = arith.constant 9.600000e+01 : f32
    %274 = vector.broadcast %cst_135 : f32 to vector<16x1xf32>
    %275 = arith.divf %273, %274 : vector<16x1xf32>
    %276 = arith.mulf %271, %271 : vector<16x96xf32>
    %cst_136 = arith.constant dense<0.000000e+00> : vector<16xf32>
    %277 = vector.multi_reduction <add>, %276, %cst_136 [1] : vector<16x96xf32> to vector<16xf32>
    %278 = vector.shape_cast %277 : vector<16xf32> to vector<16x1xf32>
    %cst_137 = arith.constant 9.600000e+01 : f32
    %279 = vector.broadcast %cst_137 : f32 to vector<16x1xf32>
    %280 = arith.divf %278, %279 : vector<16x1xf32>
    %281 = arith.mulf %275, %275 : vector<16x1xf32>
    %282 = arith.subf %280, %281 : vector<16x1xf32>
    %283 = vector.broadcast %275 : vector<16x1xf32> to vector<16x96xf32>
    %284 = arith.subf %271, %283 : vector<16x96xf32>
    %cst_138 = arith.constant 9.99999974E-6 : f32
    %285 = vector.broadcast %cst_138 : f32 to vector<16x1xf32>
    %286 = arith.addf %282, %285 : vector<16x1xf32>
    %287 = math.rsqrt %286 : vector<16x1xf32>
    %288 = vector.broadcast %287 : vector<16x1xf32> to vector<16x96xf32>
    %289 = arith.mulf %284, %288 : vector<16x96xf32>
    %c0_139 = arith.constant 0 : index
    %c0_140 = arith.constant 0 : index
    %290 = vector.load %arg40[%c0_139, %c0_140] : memref<1x96xf32, #tpu.memory_space<vmem>>, vector<1x96xf32>
    %291 = vector.broadcast %290 : vector<1x96xf32> to vector<16x96xf32>
    %292 = arith.mulf %289, %291 : vector<16x96xf32>
    %c0_141 = arith.constant 0 : index
    %c0_142 = arith.constant 0 : index
    %293 = vector.load %arg41[%c0_141, %c0_142] : memref<1x96xf32, #tpu.memory_space<vmem>>, vector<1x96xf32>
    %294 = vector.broadcast %293 : vector<1x96xf32> to vector<16x96xf32>
    %295 = arith.addf %292, %294 : vector<16x96xf32>
    %cst_143 = arith.constant 0.000000e+00 : f32
    %296 = vector.broadcast %cst_143 : f32 to vector<16x96xf32>
    %297 = arith.maximumf %295, %296 : vector<16x96xf32>
    %298 = arith.truncf %297 : vector<16x96xf32> to vector<16x96xbf16>
    %c0_144 = arith.constant 0 : index
    %c0_145 = arith.constant 0 : index
    %299 = vector.load %arg42[%c0_144, %c0_145] : memref<96x96xbf16, #tpu.memory_space<vmem>>, vector<96x96xbf16>
    %cst_146 = arith.constant dense<0.000000e+00> : vector<16x96xf32>
    %300 = tpu.matmul %298, %299, %cst_146 {dimension_numbers = #tpu.dot_dimension_numbers<[1], [0], [0], [1], [0, 0, 1, 1], [], []>} : vector<16x96xbf16>, vector<96x96xbf16>, vector<16x96xf32> -> vector<16x96xf32>
    %c0_147 = arith.constant 0 : index
    %c0_148 = arith.constant 0 : index
    %301 = vector.load %arg43[%c0_147, %c0_148] : memref<1x96xf32, #tpu.memory_space<vmem>>, vector<1x96xf32>
    %302 = vector.broadcast %301 : vector<1x96xf32> to vector<16x96xf32>
    %303 = arith.addf %300, %302 : vector<16x96xf32>
    %cst_149 = arith.constant dense<0.000000e+00> : vector<16xf32>
    %304 = vector.multi_reduction <add>, %303, %cst_149 [1] : vector<16x96xf32> to vector<16xf32>
    %305 = vector.shape_cast %304 : vector<16xf32> to vector<16x1xf32>
    %cst_150 = arith.constant 9.600000e+01 : f32
    %306 = vector.broadcast %cst_150 : f32 to vector<16x1xf32>
    %307 = arith.divf %305, %306 : vector<16x1xf32>
    %308 = arith.mulf %303, %303 : vector<16x96xf32>
    %cst_151 = arith.constant dense<0.000000e+00> : vector<16xf32>
    %309 = vector.multi_reduction <add>, %308, %cst_151 [1] : vector<16x96xf32> to vector<16xf32>
    %310 = vector.shape_cast %309 : vector<16xf32> to vector<16x1xf32>
    %cst_152 = arith.constant 9.600000e+01 : f32
    %311 = vector.broadcast %cst_152 : f32 to vector<16x1xf32>
    %312 = arith.divf %310, %311 : vector<16x1xf32>
    %313 = arith.mulf %307, %307 : vector<16x1xf32>
    %314 = arith.subf %312, %313 : vector<16x1xf32>
    %315 = vector.broadcast %307 : vector<16x1xf32> to vector<16x96xf32>
    %316 = arith.subf %303, %315 : vector<16x96xf32>
    %cst_153 = arith.constant 9.99999974E-6 : f32
    %317 = vector.broadcast %cst_153 : f32 to vector<16x1xf32>
    %318 = arith.addf %314, %317 : vector<16x1xf32>
    %319 = math.rsqrt %318 : vector<16x1xf32>
    %320 = vector.broadcast %319 : vector<16x1xf32> to vector<16x96xf32>
    %321 = arith.mulf %316, %320 : vector<16x96xf32>
    %c0_154 = arith.constant 0 : index
    %c0_155 = arith.constant 0 : index
    %322 = vector.load %arg44[%c0_154, %c0_155] : memref<1x96xf32, #tpu.memory_space<vmem>>, vector<1x96xf32>
    %323 = vector.broadcast %322 : vector<1x96xf32> to vector<16x96xf32>
    %324 = arith.mulf %321, %323 : vector<16x96xf32>
    %c0_156 = arith.constant 0 : index
    %c0_157 = arith.constant 0 : index
    %325 = vector.load %arg45[%c0_156, %c0_157] : memref<1x96xf32, #tpu.memory_space<vmem>>, vector<1x96xf32>
    %326 = vector.broadcast %325 : vector<1x96xf32> to vector<16x96xf32>
    %327 = arith.addf %324, %326 : vector<16x96xf32>
    %cst_158 = arith.constant 0.000000e+00 : f32
    %328 = vector.broadcast %cst_158 : f32 to vector<16x96xf32>
    %329 = arith.maximumf %327, %328 : vector<16x96xf32>
    %c0_159 = arith.constant 0 : index
    %c0_160 = arith.constant 0 : index
    %330 = vector.load %arg46[%c0_159, %c0_160] : memref<1x96xf32, #tpu.memory_space<vmem>>, vector<1x96xf32>
    %331 = vector.broadcast %330 : vector<1x96xf32> to vector<16x96xf32>
    %332 = arith.mulf %329, %331 : vector<16x96xf32>
    %cst_161 = arith.constant dense<0.000000e+00> : vector<16xf32>
    %333 = vector.multi_reduction <add>, %332, %cst_161 [1] : vector<16x96xf32> to vector<16xf32>
    %334 = vector.shape_cast %333 : vector<16xf32> to vector<16x1xf32>
    %c0_162 = arith.constant 0 : index
    %c0_163 = arith.constant 0 : index
    %335 = vector.load %arg47[%c0_162, %c0_163] : memref<1x1xf32, #tpu.memory_space<vmem>>, vector<1x1xf32>
    %336 = vector.broadcast %335 : vector<1x1xf32> to vector<16x1xf32>
    %337 = arith.addf %334, %336 : vector<16x1xf32>
    %338 = arith.negf %337 : vector<16x1xf32>
    %339 = math.exp %338 : vector<16x1xf32>
    %cst_164 = arith.constant 1.000000e+00 : f32
    %340 = vector.broadcast %cst_164 : f32 to vector<16x1xf32>
    %341 = arith.addf %340, %339 : vector<16x1xf32>
    %342 = arith.divf %340, %341 : vector<16x1xf32>
    %343 = vector.shape_cast %342 : vector<16x1xf32> to vector<16x1xf32>
    %344 = vector.broadcast %343 : vector<16x1xf32> to vector<16x128xf32>
    %c0_165 = arith.constant 0 : index
    %c0_166 = arith.constant 0 : index
    %345 = vector.load %arg48[%c0_165, %c0_166] : memref<16x128xf32, #tpu.memory_space<vmem>>, vector<16x128xf32>
    tpu.vector_store %arg48[%c0_165, %c0_166], %344 {strides = array<i32>} : memref<16x128xf32, #tpu.memory_space<vmem>>, vector<16x128xf32>,
    return
  }
  func.func @transform_0(%arg0: i32) -> (i32, i32) {
    %c0_i32 = arith.constant 0 : i32
    %c0_i32_0 = arith.constant 0 : i32
    return %arg0, %c0_i32 : i32, i32
  }
  func.func @transform_1(%arg0: i32) -> (i32, i32) {
    %c0_i32 = arith.constant 0 : i32
    %c0_i32_0 = arith.constant 0 : i32
    return %arg0, %c0_i32 : i32, i32
  }
  func.func @transform_2(%arg0: i32) -> (i32, i32) {
    %c0_i32 = arith.constant 0 : i32
    %c0_i32_0 = arith.constant 0 : i32
    return %arg0, %c0_i32 : i32, i32
  }
  func.func @transform_3(%arg0: i32) -> (i32, i32) {
    %c0_i32 = arith.constant 0 : i32
    %c0_i32_0 = arith.constant 0 : i32
    %c0_i32_1 = arith.constant 0 : i32
    return %c0_i32, %c0_i32_0 : i32, i32
  }
  func.func @transform_4(%arg0: i32) -> (i32, i32) {
    %c0_i32 = arith.constant 0 : i32
    %c0_i32_0 = arith.constant 0 : i32
    %c0_i32_1 = arith.constant 0 : i32
    return %c0_i32, %c0_i32_0 : i32, i32
  }
  func.func @transform_5(%arg0: i32) -> (i32, i32) {
    %c0_i32 = arith.constant 0 : i32
    %c0_i32_0 = arith.constant 0 : i32
    %c0_i32_1 = arith.constant 0 : i32
    return %c0_i32, %c0_i32_0 : i32, i32
  }
  func.func @transform_6(%arg0: i32) -> (i32, i32) {
    %c0_i32 = arith.constant 0 : i32
    %c0_i32_0 = arith.constant 0 : i32
    %c0_i32_1 = arith.constant 0 : i32
    return %c0_i32, %c0_i32_0 : i32, i32
  }
  func.func @transform_7(%arg0: i32) -> (i32, i32) {
    %c0_i32 = arith.constant 0 : i32
    %c0_i32_0 = arith.constant 0 : i32
    %c0_i32_1 = arith.constant 0 : i32
    return %c0_i32, %c0_i32_0 : i32, i32
  }
  func.func @transform_8(%arg0: i32) -> (i32, i32) {
    %c0_i32 = arith.constant 0 : i32
    %c0_i32_0 = arith.constant 0 : i32
    %c0_i32_1 = arith.constant 0 : i32
    return %c0_i32, %c0_i32_0 : i32, i32
  }
  func.func @transform_9(%arg0: i32) -> (i32, i32) {
    %c0_i32 = arith.constant 0 : i32
    %c0_i32_0 = arith.constant 0 : i32
    %c0_i32_1 = arith.constant 0 : i32
    return %c0_i32, %c0_i32_0 : i32, i32
  }
  func.func @transform_10(%arg0: i32) -> (i32, i32) {
    %c0_i32 = arith.constant 0 : i32
    %c0_i32_0 = arith.constant 0 : i32
    %c0_i32_1 = arith.constant 0 : i32
    return %c0_i32, %c0_i32_0 : i32, i32
  }
  func.func @transform_11(%arg0: i32) -> (i32, i32) {
    %c0_i32 = arith.constant 0 : i32
    %c0_i32_0 = arith.constant 0 : i32
    %c0_i32_1 = arith.constant 0 : i32
    return %c0_i32, %c0_i32_0 : i32, i32
  }
  func.func @transform_12(%arg0: i32) -> (i32, i32) {
    %c0_i32 = arith.constant 0 : i32
    %c0_i32_0 = arith.constant 0 : i32
    %c0_i32_1 = arith.constant 0 : i32
    return %c0_i32, %c0_i32_0 : i32, i32
  }
  func.func @transform_13(%arg0: i32) -> (i32, i32) {
    %c0_i32 = arith.constant 0 : i32
    %c0_i32_0 = arith.constant 0 : i32
    %c0_i32_1 = arith.constant 0 : i32
    return %c0_i32, %c0_i32_0 : i32, i32
  }
  func.func @transform_14(%arg0: i32) -> (i32, i32) {
    %c0_i32 = arith.constant 0 : i32
    %c0_i32_0 = arith.constant 0 : i32
    %c0_i32_1 = arith.constant 0 : i32
    return %c0_i32, %c0_i32_0 : i32, i32
  }
  func.func @transform_15(%arg0: i32) -> (i32, i32) {
    %c0_i32 = arith.constant 0 : i32
    %c0_i32_0 = arith.constant 0 : i32
    %c0_i32_1 = arith.constant 0 : i32
    return %c0_i32, %c0_i32_0 : i32, i32
  }
  func.func @transform_16(%arg0: i32) -> (i32, i32) {
    %c0_i32 = arith.constant 0 : i32
    %c0_i32_0 = arith.constant 0 : i32
    %c0_i32_1 = arith.constant 0 : i32
    return %c0_i32, %c0_i32_0 : i32, i32
  }
  func.func @transform_17(%arg0: i32) -> (i32, i32) {
    %c0_i32 = arith.constant 0 : i32
    %c0_i32_0 = arith.constant 0 : i32
    %c0_i32_1 = arith.constant 0 : i32
    return %c0_i32, %c0_i32_0 : i32, i32
  }
  func.func @transform_18(%arg0: i32) -> (i32, i32) {
    %c0_i32 = arith.constant 0 : i32
    %c0_i32_0 = arith.constant 0 : i32
    %c0_i32_1 = arith.constant 0 : i32
    return %c0_i32, %c0_i32_0 : i32, i32
  }
  func.func @transform_19(%arg0: i32) -> (i32, i32) {
    %c0_i32 = arith.constant 0 : i32
    %c0_i32_0 = arith.constant 0 : i32
    %c0_i32_1 = arith.constant 0 : i32
    return %c0_i32, %c0_i32_0 : i32, i32
  }
  func.func @transform_20(%arg0: i32) -> (i32, i32) {
    %c0_i32 = arith.constant 0 : i32
    %c0_i32_0 = arith.constant 0 : i32
    %c0_i32_1 = arith.constant 0 : i32
    return %c0_i32, %c0_i32_0 : i32, i32
  }
  func.func @transform_21(%arg0: i32) -> (i32, i32) {
    %c0_i32 = arith.constant 0 : i32
    %c0_i32_0 = arith.constant 0 : i32
    %c0_i32_1 = arith.constant 0 : i32
    return %c0_i32, %c0_i32_0 : i32, i32
  }
  func.func @transform_22(%arg0: i32) -> (i32, i32) {
    %c0_i32 = arith.constant 0 : i32
    %c0_i32_0 = arith.constant 0 : i32
    %c0_i32_1 = arith.constant 0 : i32
    return %c0_i32, %c0_i32_0 : i32, i32
  }
  func.func @transform_23(%arg0: i32) -> (i32, i32) {
    %c0_i32 = arith.constant 0 : i32
    %c0_i32_0 = arith.constant 0 : i32
    %c0_i32_1 = arith.constant 0 : i32
    return %c0_i32, %c0_i32_0 : i32, i32
  }
  func.func @transform_24(%arg0: i32) -> (i32, i32) {
    %c0_i32 = arith.constant 0 : i32
    %c0_i32_0 = arith.constant 0 : i32
    %c0_i32_1 = arith.constant 0 : i32
    return %c0_i32, %c0_i32_0 : i32, i32
  }
  func.func @transform_25(%arg0: i32) -> (i32, i32) {
    %c0_i32 = arith.constant 0 : i32
    %c0_i32_0 = arith.constant 0 : i32
    %c0_i32_1 = arith.constant 0 : i32
    return %c0_i32, %c0_i32_0 : i32, i32
  }
  func.func @transform_26(%arg0: i32) -> (i32, i32) {
    %c0_i32 = arith.constant 0 : i32
    %c0_i32_0 = arith.constant 0 : i32
    %c0_i32_1 = arith.constant 0 : i32
    return %c0_i32, %c0_i32_0 : i32, i32
  }
  func.func @transform_27(%arg0: i32) -> (i32, i32) {
    %c0_i32 = arith.constant 0 : i32
    %c0_i32_0 = arith.constant 0 : i32
    %c0_i32_1 = arith.constant 0 : i32
    return %c0_i32, %c0_i32_0 : i32, i32
  }
  func.func @transform_28(%arg0: i32) -> (i32, i32) {
    %c0_i32 = arith.constant 0 : i32
    %c0_i32_0 = arith.constant 0 : i32
    %c0_i32_1 = arith.constant 0 : i32
    return %c0_i32, %c0_i32_0 : i32, i32
  }
  func.func @transform_29(%arg0: i32) -> (i32, i32) {
    %c0_i32 = arith.constant 0 : i32
    %c0_i32_0 = arith.constant 0 : i32
    %c0_i32_1 = arith.constant 0 : i32
    return %c0_i32, %c0_i32_0 : i32, i32
  }
  func.func @transform_30(%arg0: i32) -> (i32, i32) {
    %c0_i32 = arith.constant 0 : i32
    %c0_i32_0 = arith.constant 0 : i32
    %c0_i32_1 = arith.constant 0 : i32
    return %c0_i32, %c0_i32_0 : i32, i32
  }
  func.func @transform_31(%arg0: i32) -> (i32, i32) {
    %c0_i32 = arith.constant 0 : i32
    %c0_i32_0 = arith.constant 0 : i32
    %c0_i32_1 = arith.constant 0 : i32
    return %c0_i32, %c0_i32_0 : i32, i32
  }
  func.func @transform_32(%arg0: i32) -> (i32, i32) {
    %c0_i32 = arith.constant 0 : i32
    %c0_i32_0 = arith.constant 0 : i32
    %c0_i32_1 = arith.constant 0 : i32
    return %c0_i32, %c0_i32_0 : i32, i32
  }
  func.func @transform_33(%arg0: i32) -> (i32, i32) {
    %c0_i32 = arith.constant 0 : i32
    %c0_i32_0 = arith.constant 0 : i32
    %c0_i32_1 = arith.constant 0 : i32
    return %c0_i32, %c0_i32_0 : i32, i32
  }
  func.func @transform_34(%arg0: i32) -> (i32, i32) {
    %c0_i32 = arith.constant 0 : i32
    %c0_i32_0 = arith.constant 0 : i32
    %c0_i32_1 = arith.constant 0 : i32
    return %c0_i32, %c0_i32_0 : i32, i32
  }
  func.func @transform_35(%arg0: i32) -> (i32, i32) {
    %c0_i32 = arith.constant 0 : i32
    %c0_i32_0 = arith.constant 0 : i32
    %c0_i32_1 = arith.constant 0 : i32
    return %c0_i32, %c0_i32_0 : i32, i32
  }
  func.func @transform_36(%arg0: i32) -> (i32, i32) {
    %c0_i32 = arith.constant 0 : i32
    %c0_i32_0 = arith.constant 0 : i32
    %c0_i32_1 = arith.constant 0 : i32
    return %c0_i32, %c0_i32_0 : i32, i32
  }
  func.func @transform_37(%arg0: i32) -> (i32, i32) {
    %c0_i32 = arith.constant 0 : i32
    %c0_i32_0 = arith.constant 0 : i32
    %c0_i32_1 = arith.constant 0 : i32
    return %c0_i32, %c0_i32_0 : i32, i32
  }
  func.func @transform_38(%arg0: i32) -> (i32, i32) {
    %c0_i32 = arith.constant 0 : i32
    %c0_i32_0 = arith.constant 0 : i32
    %c0_i32_1 = arith.constant 0 : i32
    return %c0_i32, %c0_i32_0 : i32, i32
  }
  func.func @transform_39(%arg0: i32) -> (i32, i32) {
    %c0_i32 = arith.constant 0 : i32
    %c0_i32_0 = arith.constant 0 : i32
    %c0_i32_1 = arith.constant 0 : i32
    return %c0_i32, %c0_i32_0 : i32, i32
  }
  func.func @transform_40(%arg0: i32) -> (i32, i32) {
    %c0_i32 = arith.constant 0 : i32
    %c0_i32_0 = arith.constant 0 : i32
    %c0_i32_1 = arith.constant 0 : i32
    return %c0_i32, %c0_i32_0 : i32, i32
  }
  func.func @transform_41(%arg0: i32) -> (i32, i32) {
    %c0_i32 = arith.constant 0 : i32
    %c0_i32_0 = arith.constant 0 : i32
    %c0_i32_1 = arith.constant 0 : i32
    return %c0_i32, %c0_i32_0 : i32, i32
  }
  func.func @transform_42(%arg0: i32) -> (i32, i32) {
    %c0_i32 = arith.constant 0 : i32
    %c0_i32_0 = arith.constant 0 : i32
    %c0_i32_1 = arith.constant 0 : i32
    return %c0_i32, %c0_i32_0 : i32, i32
  }
  func.func @transform_43(%arg0: i32) -> (i32, i32) {
    %c0_i32 = arith.constant 0 : i32
    %c0_i32_0 = arith.constant 0 : i32
    %c0_i32_1 = arith.constant 0 : i32
    return %c0_i32, %c0_i32_0 : i32, i32
  }
  func.func @transform_44(%arg0: i32) -> (i32, i32) {
    %c0_i32 = arith.constant 0 : i32
    %c0_i32_0 = arith.constant 0 : i32
    %c0_i32_1 = arith.constant 0 : i32
    return %c0_i32, %c0_i32_0 : i32, i32
  }
  func.func @transform_45(%arg0: i32) -> (i32, i32) {
    %c0_i32 = arith.constant 0 : i32
    %c0_i32_0 = arith.constant 0 : i32
    %c0_i32_1 = arith.constant 0 : i32
    return %c0_i32, %c0_i32_0 : i32, i32
  }
  func.func @transform_46(%arg0: i32) -> (i32, i32) {
    %c0_i32 = arith.constant 0 : i32
    %c0_i32_0 = arith.constant 0 : i32
    %c0_i32_1 = arith.constant 0 : i32
    return %c0_i32, %c0_i32_0 : i32, i32
  }
  func.func @transform_47(%arg0: i32) -> (i32, i32) {
    %c0_i32 = arith.constant 0 : i32
    %c0_i32_0 = arith.constant 0 : i32
    return %arg0, %c0_i32 : i32, i32
  }
}

</mosaic_0001>

<bundles_post_ra>
// kernel: tpu_custom_call.1
= control target key start
LH: loop header
LB: loop body
LE: loop exit
PB: predicated region body
PF: predicated region fallthrough
CT: control target
= control target key end

     0   :  { %s6616_s6 = smov 1   ;;  %s6617_s10 = smov 2   ;;  %s7702_s0 = inlined_call_operand.smem [shape: u32[48], index: -1, kind: input, shape index: {}] }
   0x1   :  { %s6704_s5 = sld [smem:[%s7702_s0]]   ;;  %s6618_s14 = smov 3  }
   0x2   :  { %s6709_s9 = sld [smem:[%s7702_s0 + %s6616_s6]]   ;;  %s6619_s18 = smov 4  }
   0x3   :  { %s6714_s13 = sld [smem:[%s7702_s0 + %s6617_s10]]   ;;  %s6620_s22 = smov 5  }
   0x4   :  { %s6719_s17 = sld [smem:[%s7702_s0 + %s6618_s14]]   ;;  %s6621_s26 = smov 6  }
   0x5   :  { %s6724_s21 = sld [smem:[%s7702_s0 + %s6619_s18]]   ;;  %s6622_s30 = smov 7  }
   0x6   :  { %s6729_s25 = sld [smem:[%s7702_s0 + %s6620_s22]]   ;;  %s6623_s4 = smov 8  }
   0x7   :  { %7714 = sst [smem:[#allocation57_spill]] %s6704_s5  ;;  %s6624_s10 = smov 9  }
   0x8   :  { %7715 = sst [smem:[#allocation58_spill]] %s6709_s9  ;;  %s6625_s15 = smov 10  }
   0x9   :  { %7716 = sst [smem:[#allocation59_spill]] %s6714_s13  ;;  %s6626_s20 = smov 11  }
   0xa   :  { %7717 = sst [smem:[#allocation60_spill]] %s6719_s17  ;;  %s6628_s1 = smov 13  }
   0xb   :  { %s6734_s29 = sld [smem:[%s7702_s0 + %s6621_s26]]   ;;  %s6627_s26 = smov 12  }
   0xc   :  { %s6739_s3 = sld [smem:[%s7702_s0 + %s6622_s30]]   ;;  %s6629_s7 = smov 14  }
   0xd   :  { %s6744_s8 = sld [smem:[%s7702_s0 + %s6623_s4]]   ;;  %s6631_s22 = smov 16  }
   0xe   :  { %s6749_s14 = sld [smem:[%s7702_s0 + %s6624_s10]]   ;;  %s6632_s28 = smov 17  }
   0xf   :  { %s6754_s19 = sld [smem:[%s7702_s0 + %s6625_s15]]   ;;  %s6630_s15 = smov 15  }
  0x10   :  { %s6759_s24 = sld [smem:[%s7702_s0 + %s6626_s20]]   ;;  %s6662_s16 = smov 47  }
  0x11   :  { %s6764_s30 = sld [smem:[%s7702_s0 + %s6627_s26]]  }
  0x12   :  { %s6769_s6 = sld [smem:[%s7702_s0 + %s6628_s1]]  }
  0x13   :  { %7718 = sst [smem:[#allocation61_spill]] %s6744_s8 }
  0x14   :  { %s6774_s12 = sld [smem:[%s7702_s0 + %s6629_s7]]   ;;  %s6633_s7 = smov 18  }
  0x15   :  { %7719 = sst [smem:[#allocation62_spill]] %s6754_s19 }
  0x16   :  { %7720 = sst [smem:[#allocation63_spill]] %s6759_s24 }
  0x17   :  { %s6779_s20 = sld [smem:[%s7702_s0 + %s6630_s15]]   ;;  %s6634_s15 = smov 19  }
  0x18   :  { %7721 = sst [smem:[#allocation64_spill]] %s6769_s6 }
  0x19   :  { %s6784_s27 = sld [smem:[%s7702_s0 + %s6631_s22]]   ;;  %s6635_s22 = smov 20  }
  0x1a   :  { %s6789_s4 = sld [smem:[%s7702_s0 + %s6632_s28]]   ;;  %s6636_s28 = smov 21  }
  0x1b   :  { %s6794_s13 = sld [smem:[%s7702_s0 + %s6633_s7]]   ;;  %s6637_s7 = smov 22  }
  0x1c   :  { %s6799_s9 = sld [smem:[%s7702_s0 + %s6634_s15]]   ;;  %s6638_s15 = smov 23  }
  0x1d   :  { %7722 = sst [smem:[#allocation65_spill]] %s6779_s20 }
  0x1e   :  { %s6804_s24 = sld [smem:[%s7702_s0 + %s6635_s22]]   ;;  %s6639_s22 = smov 24  }
  0x1f   :  { %7723 = sst [smem:[#allocation66_spill]] %s6784_s27 }
  0x20   :  { %s6809_s20 = sld [smem:[%s7702_s0 + %s6636_s28]]   ;;  %s6640_s28 = smov 25  }
  0x21   :  { %7724 = sst [smem:[#allocation67_spill]] %s6794_s13 }
  0x22   :  { %s6814_s5 = sld [smem:[%s7702_s0 + %s6637_s7]]   ;;  %s6641_s7 = smov 26  }
  0x23   :  { %s6819_s17 = sld [smem:[%s7702_s0 + %s6638_s15]]   ;;  %s6642_s15 = smov 27  }
  0x24   :  { %7725 = sst [smem:[#allocation68_spill]] %s6804_s24 }
  0x25   :  { %s6824_s24 = sld [smem:[%s7702_s0 + %s6639_s22]]   ;;  %s6643_s22 = smov 28  }
  0x26   :  { %s6829_s13 = sld [smem:[%s7702_s0 + %s6640_s28]]   ;;  %s6644_s28 = smov 29  }
  0x27   :  { %s6844_s27 = sld [smem:[%s7702_s0 + %s6643_s22]]   ;;  %s6647_s22 = smov 32  }
  0x28   :  { %7726 = sst [smem:[#allocation69_spill]] %s6814_s5 }
  0x29   :  { %7727 = sst [smem:[#allocation70_spill]] %s6819_s17 }
  0x2a   :  { %s6834_s5 = sld [smem:[%s7702_s0 + %s6641_s7]]   ;;  %s6645_s7 = smov 30  }
  0x2b   :  { %s6839_s17 = sld [smem:[%s7702_s0 + %s6642_s15]]   ;;  %s6646_s15 = smov 31  }
  0x2c   :  { %7728 = sst [smem:[#allocation71_spill]] %s6829_s13 }
  0x2d   :  { %7730 = sst [smem:[#allocation73_spill]] %s6844_s27 }
  0x2e   :  { %s6849_s13 = sld [smem:[%s7702_s0 + %s6644_s28]]   ;;  %s6648_s28 = smov 33  }
  0x2f   :  { %s6854_s6 = sld [smem:[%s7702_s0 + %s6645_s7]]   ;;  %s6649_s7 = smov 34  }
  0x30   :  { %s6864_s27 = sld [smem:[%s7702_s0 + %s6647_s22]]   ;;  %s6651_s22 = smov 36  }
  0x31   :  { %7729 = sst [smem:[#allocation72_spill]] %s6839_s17 }
  0x32   :  { %s6859_s17 = sld [smem:[%s7702_s0 + %s6646_s15]]   ;;  %s6650_s15 = smov 35  }
  0x34   :  { %7731 = sst [smem:[#allocation74_spill]] %s6849_s13 }
  0x35   :  { %7732 = sst [smem:[#allocation75_spill]] %s6854_s6 }
  0x36   :  { %7734 = sst [smem:[#allocation77_spill]] %s6864_s27 }
  0x37   :  { %s6869_s13 = sld [smem:[%s7702_s0 + %s6648_s28]]   ;;  %s6652_s28 = smov 37  }
  0x38   :  { %7733 = sst [smem:[#allocation76_spill]] %s6859_s17 }
  0x39   :  { %s6874_s6 = sld [smem:[%s7702_s0 + %s6649_s7]]   ;;  %s6653_s7 = smov 38  }
  0x3a   :  { %s6879_s17 = sld [smem:[%s7702_s0 + %s6650_s15]]   ;;  %s6654_s15 = smov 39  }
  0x3b   :  { %s6884_s27 = sld [smem:[%s7702_s0 + %s6651_s22]]   ;;  %s6655_s22 = smov 40  }
  0x3c   :  { %s6894_s19 = sld [smem:[%s7702_s0 + %s6653_s7]]   ;;  %s6657_s7 = smov 42  }
  0x3d   :  { %7735 = sst [smem:[#allocation78_spill]] %s6869_s13 }
  0x3e   :  { %s6889_s13 = sld [smem:[%s7702_s0 + %s6652_s28]]   ;;  %s6656_s28 = smov 41  }
  0x3f   :  { %s6904_s8 = sld [smem:[%s7702_s0 + %s6655_s22]]   ;;  %s6659_s22 = smov 44  }
  0x40   :  { %7736 = sst [smem:[#allocation79_spill]] %s6879_s17 }
  0x41   :  { %s6899_s17 = sld [smem:[%s7702_s0 + %s6654_s15]]   ;;  %s6658_s15 = smov 43  }
  0x42   :  { %7738 = sst [smem:[#allocation81_spill]] %s6894_s19 }
  0x43   :  { %s6914_s19 = sld [smem:[%s7702_s0 + %s6657_s7]]   ;;  %s6661_s7 = smov 46  }
  0x44   :  { %7737 = sst [smem:[#allocation80_spill]] %s6889_s13 }
  0x45   :  { %7740 = sst [smem:[#allocation83_spill]] %s6904_s8 }
  0x46   :  { %s6909_s13 = sld [smem:[%s7702_s0 + %s6656_s28]]   ;;  %s6660_s28 = smov 45  }
  0x47   :  { %7739 = sst [smem:[#allocation82_spill]] %s6899_s17 }
  0x48   :  { %s6919_s17 = sld [smem:[%s7702_s0 + %s6658_s15]]  }
  0x49   :  { %7742 = sst [smem:[#allocation85_spill]] %s6914_s19 }
  0x4a   :  { %s6924_s8 = sld [smem:[%s7702_s0 + %s6659_s22]]  }
  0x4b   :  { %s4823_s19 = sld [smem:[%s7702_s0 + %s6661_s7]]  }
  0x4c   :  { %7741 = sst [smem:[#allocation84_spill]] %s6909_s13 }
  0x4d   :  { %s6929_s13 = sld [smem:[%s7702_s0 + %s6660_s28]]  }
  0x4e   :  { %7743 = sst [smem:[#allocation86_spill]] %s6919_s17 }
  0x4f   :  { %s6937_s17 = sld [smem:[%s7702_s0 + %s6662_s16]]  }
  0x51   :  { %v100_v0 = vstv %s4823_s19 }
  0x52   :  { %101 = vst [vmem:[#allocation2] sm:$0x1] %v100_v0 }
  0x53   :  { %102 = vsyncpa [#allocation4], 0 }
  0x54   :  { %103 = vsyncpa [#allocation7], 0 }
  0x55   :  { %104 = vsyncpa [#allocation10], 0 }
  0x56   :  { %105 = vsyncpa [#allocation13], 0 }
  0x57   :  { %106 = vsyncpa [#allocation16], 0 }
  0x58   :  { %107 = vsyncpa [#allocation19], 0 }
  0x59   :  { %108 = vsyncpa [#allocation22], 0 }
  0x5a   :  { %109 = vsyncpa [#allocation25], 0 }
  0x5b   :  { %110 = vsyncpa [#allocation28], 0 }
  0x5c   :  { %111 = vsyncpa [#allocation31], 0 }
  0x5d   :  { %112 = vsyncpa [#allocation34], 0 }
  0x5e   :  { %113 = vsyncpa [#allocation37], 0 }
  0x5f   :  { %114 = vsyncpa [#allocation40], 0 }
  0x60   :  { %115 = vsyncpa [#allocation5], 0  ;;  %s6663_s22 = smov [#allocation6]   ;;  %s6664_s0 = smov [#allocation9]  }
  0x61   :  { %s140_s23 = sshll.u32 %s6663_s22, 4  ;;  %s159_s26 = sshll.u32 %s6664_s0, 4  ;;  %s141_s23 = int_to_ptr.vmem [resolvable:$true] %s140_s23  ;;  %s160_s26 = int_to_ptr.vmem [resolvable:$true] %s159_s26 }
  0x62   :  { %s6076_s19 = scalar_lea.vmem %s141_s23, 16  ;;  %s6080_s28 = scalar_lea.vmem %s141_s23, 32 }
  0x63   :  { %p6077_p0 = scmp.ne.s32.totalorder %s141_s23, %s6076_s19  ;;  %p6081_p1 = scmp.lt.s32.totalorder %s141_s23, %s141_s23 }
  0x64   :  { %p6082_p2 = scmp.lt.s32.totalorder %s6080_s28, %s6076_s19 }
  0x66   :  { %p6083_p3 = por %p6082_p2, %p6081_p1 }
  0x68   :  { %p6084_p4 = pnand %p6083_p3, %p6077_p0 }
  0x6a   :  { %6087 = shalt.err (!%p6084_p4)
}
  0x6b   :  { %143 = dma.hbm_to_vmem [thread:$0]  %s6729_s25, 16, %s141_s23, [#allocation7]  }
  0x6c   :  { %s6096_s1 = scalar_lea.vmem %s160_s26, 768  ;;  %p6101_p6 = scmp.lt.s32.totalorder %s160_s26, %s160_s26 }
  0x6d   :  { %p6097_p5 = scmp.ne.s32.totalorder %s160_s26, %s6096_s1  ;;  %p6102_p7 = scmp.lt.s32.totalorder %s6096_s1, %s6096_s1 }
  0x6f   :  { %p6103_p8 = por %p6102_p7, %p6101_p6 }
  0x71   :  { %p6104_p9 = pnand %p6103_p8, %p6097_p5 }
  0x73   :  { %6107 = shalt.err (!%p6104_p9)
}
  0x74   :  { %s6665_s2 = smov 64   ;;  %s6666_s7 = smov 4  }
  0x75   :  { %165 = dma.hbm_to_vmem [thread:$0]  %s6739_s3, 768, %s160_s26, [#allocation10], %s6665_s2, %s6665_s2, %s6666_s7  }
  0x76   :  { %s6667_s10 = smov [#allocation12]   ;;  %s6668_s16 = smov [#allocation15]  }
  0x77   :  { %s182_s11 = sshll.u32 %s6667_s10, 4  ;;  %s204_s15 = sshll.u32 %s6668_s16, 4  ;;  %s183_s11 = int_to_ptr.vmem [resolvable:$true] %s182_s11  ;;  %s205_s15 = int_to_ptr.vmem [resolvable:$true] %s204_s15 }
  0x78   :  { %s6116_s25 = scalar_lea.vmem %s183_s11, 16  ;;  %s6120_s18 = scalar_lea.vmem %s183_s11, 32 }
  0x79   :  { %p6117_p10 = scmp.ne.s32.totalorder %s183_s11, %s6116_s25  ;;  %p6121_p11 = scmp.lt.s32.totalorder %s183_s11, %s183_s11 }
  0x7a   :  { %p6122_p12 = scmp.lt.s32.totalorder %s6120_s18, %s6116_s25 }
  0x7c   :  { %p6123_p13 = por %p6122_p12, %p6121_p11 }
  0x7e   :  { %p6124_p0 = pnand %p6123_p13, %p6117_p10 }
  0x80   :  { %6127 = shalt.err (!%p6124_p0)
}
  0x81   :  { %185 = dma.hbm_to_vmem [thread:$0]  %s6749_s14, 16, %s183_s11, [#allocation13]  }
  0x82   :  { %s6136_s22 = scalar_lea.vmem %s205_s15, 32  ;;  %p6141_p2 = scmp.lt.s32.totalorder %s205_s15, %s205_s15 }
  0x83   :  { %p6137_p1 = scmp.ne.s32.totalorder %s205_s15, %s6136_s22  ;;  %p6142_p3 = scmp.lt.s32.totalorder %s6136_s22, %s6136_s22 }
  0x85   :  { %p6143_p4 = por %p6142_p3, %p6141_p2 }
  0x87   :  { %p6144_p5 = pnand %p6143_p4, %p6137_p1 }
  0x89   :  { %6147 = shalt.err (!%p6144_p5)
}
  0x8a   :  { %207 = dma.hbm_to_vmem [thread:$0]  %s6764_s30, 32, %s205_s15, [#allocation16]  }
  0x8b   :  { %s6669_s3 = smov [#allocation18]   ;;  %s6670_s0 = smov [#allocation21]  }
  0x8c   :  { %s224_s23 = sshll.u32 %s6669_s3, 4  ;;  %s246_s26 = sshll.u32 %s6670_s0, 4  ;;  %s225_s23 = int_to_ptr.vmem [resolvable:$true] %s224_s23  ;;  %s247_s26 = int_to_ptr.vmem [resolvable:$true] %s246_s26 }
  0x8d   :  { %s6156_s19 = scalar_lea.vmem %s225_s23, 32  ;;  %p6161_p7 = scmp.lt.s32.totalorder %s225_s23, %s225_s23 }
  0x8e   :  { %p6157_p6 = scmp.ne.s32.totalorder %s225_s23, %s6156_s19  ;;  %p6162_p8 = scmp.lt.s32.totalorder %s6156_s19, %s6156_s19 }
  0x90   :  { %p6163_p9 = por %p6162_p8, %p6161_p7 }
  0x92   :  { %p6164_p10 = pnand %p6163_p9, %p6157_p6 }
  0x94   :  { %6167 = shalt.err (!%p6164_p10)
}
  0x95   :  { %227 = dma.hbm_to_vmem [thread:$0]  %s6774_s12, 32, %s225_s23, [#allocation19]  }
  0x96   :  { %s6176_s14 = scalar_lea.vmem %s247_s26, 16  ;;  %s6180_s28 = scalar_lea.vmem %s247_s26, 32 }
  0x97   :  { %p6177_p11 = scmp.ne.s32.totalorder %s247_s26, %s6176_s14  ;;  %p6181_p12 = scmp.lt.s32.totalorder %s247_s26, %s247_s26 }
  0x98   :  { %p6182_p13 = scmp.lt.s32.totalorder %s6180_s28, %s6176_s14 }
  0x9a   :  { %p6183_p0 = por %p6182_p13, %p6181_p12 }
  0x9c   :  { %p6184_p1 = pnand %p6183_p0, %p6177_p11 }
  0x9e   :  { %6187 = shalt.err (!%p6184_p1)
}
  0x9f   :  { %249 = dma.hbm_to_vmem [thread:$0]  %s6789_s4, 16, %s247_s26, [#allocation22]  }
  0xa0   :  { %s6671_s30 = smov [#allocation24]   ;;  %s6672_s10 = smov [#allocation27]  }
  0xa1   :  { %s265_s1 = sshll.u32 %s6671_s30, 4  ;;  %s288_s11 = sshll.u32 %s6672_s10, 4  ;;  %s266_s1 = int_to_ptr.vmem [resolvable:$true] %s265_s1  ;;  %s289_s11 = int_to_ptr.vmem [resolvable:$true] %s288_s11 }
  0xa2   :  { %s6196_s16 = scalar_lea.vmem %s266_s1, 768  ;;  %p6201_p3 = scmp.lt.s32.totalorder %s266_s1, %s266_s1 }
  0xa3   :  { %p6197_p2 = scmp.ne.s32.totalorder %s266_s1, %s6196_s16  ;;  %p6202_p4 = scmp.lt.s32.totalorder %s6196_s16, %s6196_s16 }
  0xa5   :  { %p6203_p5 = por %p6202_p4, %p6201_p3 }
  0xa7   :  { %p6204_p6 = pnand %p6203_p5, %p6197_p2 }
  0xa9   :  { %6207 = shalt.err (!%p6204_p6)
}
  0xaa   :  { %271 = dma.hbm_to_vmem [thread:$0]  %s6799_s9, 768, %s266_s1, [#allocation25], %s6665_s2, %s6665_s2, %s6666_s7  }
  0xab   :  { %s6216_s12 = scalar_lea.vmem %s289_s11, 16  ;;  %s6220_s4 = scalar_lea.vmem %s289_s11, 32 }
  0xac   :  { %p6217_p7 = scmp.ne.s32.totalorder %s289_s11, %s6216_s12  ;;  %p6221_p8 = scmp.lt.s32.totalorder %s289_s11, %s289_s11 }
  0xad   :  { %p6222_p9 = scmp.lt.s32.totalorder %s6220_s4, %s6216_s12 }
  0xaf   :  { %p6223_p10 = por %p6222_p9, %p6221_p8 }
  0xb1   :  { %p6224_p11 = pnand %p6223_p10, %p6217_p7 }
  0xb3   :  { %6227 = shalt.err (!%p6224_p11)
}
  0xb4   :  { %291 = dma.hbm_to_vmem [thread:$0]  %s6809_s20, 16, %s289_s11, [#allocation28]  }
  0xb5   :  { %s6673_s15 = smov [#allocation30]   ;;  %s6674_s18 = smov [#allocation33]  }
  0xb6   :  { %s310_s25 = sshll.u32 %s6673_s15, 4  ;;  %s330_s22 = sshll.u32 %s6674_s18, 4  ;;  %s311_s25 = int_to_ptr.vmem [resolvable:$true] %s310_s25  ;;  %s331_s22 = int_to_ptr.vmem [resolvable:$true] %s330_s22 }
  0xb7   :  { %s6236_s3 = scalar_lea.vmem %s311_s25, 32  ;;  %p6241_p13 = scmp.lt.s32.totalorder %s311_s25, %s311_s25 }
  0xb8   :  { %p6237_p12 = scmp.ne.s32.totalorder %s311_s25, %s6236_s3  ;;  %p6242_p0 = scmp.lt.s32.totalorder %s6236_s3, %s6236_s3 }
  0xba   :  { %p6243_p1 = por %p6242_p0, %p6241_p13 }
  0xbc   :  { %p6244_p2 = pnand %p6243_p1, %p6237_p12 }
  0xbe   :  { %6247 = shalt.err (!%p6244_p2)
}
  0xbf   :  { %313 = dma.hbm_to_vmem [thread:$0]  %s6824_s24, 32, %s311_s25, [#allocation31]  }
  0xc0   :  { %s6256_s9 = scalar_lea.vmem %s331_s22, 32  ;;  %p6261_p4 = scmp.lt.s32.totalorder %s331_s22, %s331_s22 }
  0xc1   :  { %p6257_p3 = scmp.ne.s32.totalorder %s331_s22, %s6256_s9  ;;  %p6262_p5 = scmp.lt.s32.totalorder %s6256_s9, %s6256_s9 }
  0xc3   :  { %p6263_p6 = por %p6262_p5, %p6261_p4 }
  0xc5   :  { %p6264_p7 = pnand %p6263_p6, %p6257_p3 }
  0xc7   :  { %6267 = shalt.err (!%p6264_p7)
}
  0xc8   :  { %333 = dma.hbm_to_vmem [thread:$0]  %s6834_s5, 32, %s331_s22, [#allocation34]  }
  0xc9   :  { %s6675_s20 = smov [#allocation36]   ;;  %s6676_s0 = smov [#allocation39]  }
  0xca   :  { %s362_s23 = sshll.u32 %s6675_s20, 4  ;;  %s382_s26 = sshll.u32 %s6676_s0, 4  ;;  %s363_s23 = int_to_ptr.vmem [resolvable:$true] %s362_s23  ;;  %s383_s26 = int_to_ptr.vmem [resolvable:$true] %s382_s26 }
  0xcb   :  { %s6276_s19 = scalar_lea.vmem %s363_s23, 16  ;;  %s6280_s14 = scalar_lea.vmem %s363_s23, 32 }
  0xcc   :  { %p6277_p8 = scmp.ne.s32.totalorder %s363_s23, %s6276_s19  ;;  %p6281_p9 = scmp.lt.s32.totalorder %s363_s23, %s363_s23 }
  0xcd   :  { %p6282_p10 = scmp.lt.s32.totalorder %s6280_s14, %s6276_s19 }
  0xcf   :  { %p6283_p11 = por %p6282_p10, %p6281_p9 }
  0xd1   :  { %p6284_p12 = pnand %p6283_p11, %p6277_p8 }
  0xd3   :  { %6287 = shalt.err (!%p6284_p12)
}
  0xd4   :  { %365 = dma.hbm_to_vmem [thread:$0]  %s6874_s6, 16, %s363_s23, [#allocation37]  }
  0xd5   :  { %s6296_s24 = scalar_lea.vmem %s383_s26, 16  ;;  %s6300_s28 = scalar_lea.vmem %s383_s26, 32 }
  0xd6   :  { %p6297_p13 = scmp.ne.s32.totalorder %s383_s26, %s6296_s24  ;;  %p6301_p0 = scmp.lt.s32.totalorder %s383_s26, %s383_s26 }
  0xd7   :  { %p6302_p1 = scmp.lt.s32.totalorder %s6300_s28, %s6296_s24 }
  0xd9   :  { %p6303_p2 = por %p6302_p1, %p6301_p0 }
  0xdb   :  { %p6304_p3 = pnand %p6303_p2, %p6297_p13 }
  0xdd   :  { %6307 = shalt.err (!%p6304_p3)
}
  0xde   :  { %385 = dma.hbm_to_vmem [thread:$0]  %s6884_s27, 16, %s383_s26, [#allocation40]  }
  0xdf   :  { %s6677_s5 = smov [#allocation3]   ;;  %s6678_s1 = smov [#allocation8]  }
  0xe0   :  { %s130_s30 = sshll.u32 %s6677_s5, 4  ;;  %s150_s10 = sshll.u32 %s6678_s1, 4  ;;  %s131_s30 = int_to_ptr.vmem [resolvable:$true] %s130_s30  ;;  %s151_s10 = int_to_ptr.vmem [resolvable:$true] %s150_s10 }
  0xe1   :  { %s6316_s11 = scalar_lea.vmem %s131_s30, 16  ;;  %s6320_s16 = scalar_lea.vmem %s131_s30, 32 }
  0xe2   :  { %p6317_p4 = scmp.ne.s32.totalorder %s131_s30, %s6316_s11  ;;  %p6321_p5 = scmp.lt.s32.totalorder %s131_s30, %s131_s30 }
  0xe3   :  { %p6322_p6 = scmp.lt.s32.totalorder %s6320_s16, %s6316_s11 }
  0xe5   :  { %p6323_p7 = por %p6322_p6, %p6321_p5 }
  0xe7   :  { %p6324_p8 = pnand %p6323_p7, %p6317_p4 }
  0xe9   :  { %6327 = shalt.err (!%p6324_p8)
}
  0xea   :  { %133 = dma.hbm_to_vmem [thread:$0]  %s6724_s21, 16, %s131_s30, [#allocation4]  }
  0xeb   :  { %s6336_s6 = scalar_lea.vmem %s151_s10, 16  ;;  %s6340_s12 = scalar_lea.vmem %s151_s10, 32 }
  0xec   :  { %p6337_p9 = scmp.ne.s32.totalorder %s151_s10, %s6336_s6  ;;  %p6341_p10 = scmp.lt.s32.totalorder %s151_s10, %s151_s10 }
  0xed   :  { %p6342_p11 = scmp.lt.s32.totalorder %s6340_s12, %s6336_s6 }
  0xef   :  { %p6343_p12 = por %p6342_p11, %p6341_p10 }
  0xf1   :  { %p6344_p13 = pnand %p6343_p12, %p6337_p9 }
  0xf3   :  { %6347 = shalt.err (!%p6344_p13)
}
  0xf4   :  { %153 = dma.hbm_to_vmem [thread:$0]  %s6734_s29, 16, %s151_s10, [#allocation7]  }
  0xf5   :  { %s6679_s27 = smov [#allocation11]   ;;  %s6680_s15 = smov [#allocation14]  }
  0xf6   :  { %s172_s4 = sshll.u32 %s6679_s27, 4  ;;  %s192_s25 = sshll.u32 %s6680_s15, 4  ;;  %s173_s4 = int_to_ptr.vmem [resolvable:$true] %s172_s4  ;;  %s193_s25 = int_to_ptr.vmem [resolvable:$true] %s192_s25 }
  0xf7   :  { %s6356_s18 = scalar_lea.vmem %s173_s4, 16  ;;  %s6360_s22 = scalar_lea.vmem %s173_s4, 32 }
  0xf8   :  { %p6357_p0 = scmp.ne.s32.totalorder %s173_s4, %s6356_s18  ;;  %p6361_p1 = scmp.lt.s32.totalorder %s173_s4, %s173_s4 }
  0xf9   :  { %p6362_p2 = scmp.lt.s32.totalorder %s6360_s22, %s6356_s18 }
  0xfb   :  { %p6363_p3 = por %p6362_p2, %p6361_p1 }
  0xfd   :  { %p6364_p4 = pnand %p6363_p3, %p6357_p0 }
  0xff   :  { %6367 = shalt.err (!%p6364_p4)
}
 0x100   :  { %s7744_s21 = sld [smem:[#allocation61_spill]]  ;;  %s6376_s3 = scalar_lea.vmem %s193_s25, 16 }
 0x101   :  { %p6377_p5 = scmp.ne.s32.totalorder %s193_s25, %s6376_s3  ;;  %s6380_s9 = scalar_lea.vmem %s193_s25, 32 }
 0x102   :  { %p6381_p6 = scmp.lt.s32.totalorder %s193_s25, %s193_s25  ;;  %p6382_p7 = scmp.lt.s32.totalorder %s6380_s9, %s6376_s3 }
 0x104   :  { %p6383_p8 = por %p6382_p7, %p6381_p6 }
 0x106   :  { %175 = dma.hbm_to_vmem [thread:$0]  %s7744_s21, 16, %s173_s4, [#allocation10]  }
 0x107   :  { %p6384_p9 = pnand %p6383_p8, %p6377_p5 }
 0x109   :  { %6387 = shalt.err (!%p6384_p9)
}
 0x10a   :  { %s7745_s29 = sld [smem:[#allocation62_spill]]  ;;  %s6681_s20 = smov [#allocation17]  }
 0x10b   :  { %s214_s23 = sshll.u32 %s6681_s20, 4  ;;  %s6682_s0 = smov [#allocation20]   ;;  %s215_s23 = int_to_ptr.vmem [resolvable:$true] %s214_s23 }
 0x10c   :  { %s236_s26 = sshll.u32 %s6682_s0, 4  ;;  %s6396_s19 = scalar_lea.vmem %s215_s23, 32  ;;  %s237_s26 = int_to_ptr.vmem [resolvable:$true] %s236_s26 }
 0x10d   :  { %p6397_p10 = scmp.ne.s32.totalorder %s215_s23, %s6396_s19  ;;  %p6401_p11 = scmp.lt.s32.totalorder %s215_s23, %s215_s23 }
 0x10e   :  { %p6402_p12 = scmp.lt.s32.totalorder %s6396_s19, %s6396_s19 }
 0x110   :  { %195 = dma.hbm_to_vmem [thread:$0]  %s7745_s29, 16, %s193_s25, [#allocation13]  }
 0x111   :  { %p6403_p13 = por %p6402_p12, %p6401_p11 }
 0x113   :  { %p6404_p0 = pnand %p6403_p13, %p6397_p10 }
 0x115   :  { %6407 = shalt.err (!%p6404_p0)
}
 0x116   :  { %s7746_s14 = sld [smem:[#allocation64_spill]]  ;;  %s6416_s24 = scalar_lea.vmem %s237_s26, 16 }
 0x117   :  { %p6417_p1 = scmp.ne.s32.totalorder %s237_s26, %s6416_s24  ;;  %s6420_s28 = scalar_lea.vmem %s237_s26, 32 }
 0x118   :  { %p6421_p2 = scmp.lt.s32.totalorder %s237_s26, %s237_s26  ;;  %p6422_p3 = scmp.lt.s32.totalorder %s6420_s28, %s6416_s24 }
 0x11a   :  { %p6423_p4 = por %p6422_p3, %p6421_p2 }
 0x11c   :  { %217 = dma.hbm_to_vmem [thread:$0]  %s7746_s14, 32, %s215_s23, [#allocation16]  }
 0x11d   :  { %p6424_p5 = pnand %p6423_p4, %p6417_p1 }
 0x11f   :  { %6427 = shalt.err (!%p6424_p5)
}
 0x120   :  { %s7747_s5 = sld [smem:[#allocation66_spill]]  ;;  %s6683_s30 = smov [#allocation23]  }
 0x121   :  { %s256_s1 = sshll.u32 %s6683_s30, 4  ;;  %s6684_s10 = smov [#allocation26]   ;;  %s257_s1 = int_to_ptr.vmem [resolvable:$true] %s256_s1 }
 0x122   :  { %s278_s11 = sshll.u32 %s6684_s10, 4  ;;  %s6436_s16 = scalar_lea.vmem %s257_s1, 16  ;;  %s279_s11 = int_to_ptr.vmem [resolvable:$true] %s278_s11 }
 0x123   :  { %p6437_p6 = scmp.ne.s32.totalorder %s257_s1, %s6436_s16  ;;  %s6440_s6 = scalar_lea.vmem %s257_s1, 32 }
 0x124   :  { %p6441_p7 = scmp.lt.s32.totalorder %s257_s1, %s257_s1  ;;  %p6442_p8 = scmp.lt.s32.totalorder %s6440_s6, %s6436_s16 }
 0x126   :  { %239 = dma.hbm_to_vmem [thread:$0]  %s7747_s5, 16, %s237_s26, [#allocation19]  }
 0x127   :  { %p6443_p9 = por %p6442_p8, %p6441_p7 }
 0x129   :  { %p6444_p10 = pnand %p6443_p9, %p6437_p6 }
 0x12b   :  { %6447 = shalt.err (!%p6444_p10)
}
 0x12c   :  { %s7748_s12 = sld [smem:[#allocation67_spill]]  ;;  %s6456_s27 = scalar_lea.vmem %s279_s11, 16 }
 0x12d   :  { %p6457_p11 = scmp.ne.s32.totalorder %s279_s11, %s6456_s27  ;;  %s6460_s4 = scalar_lea.vmem %s279_s11, 32 }
 0x12e   :  { %p6461_p12 = scmp.lt.s32.totalorder %s279_s11, %s279_s11  ;;  %p6462_p13 = scmp.lt.s32.totalorder %s6460_s4, %s6456_s27 }
 0x130   :  { %p6463_p0 = por %p6462_p13, %p6461_p12 }
 0x132   :  { %259 = dma.hbm_to_vmem [thread:$0]  %s7748_s12, 16, %s257_s1, [#allocation22]  }
 0x133   :  { %p6464_p1 = pnand %p6463_p0, %p6457_p11 }
 0x135   :  { %6467 = shalt.err (!%p6464_p1)
}
 0x136   :  { %s7749_s15 = sld [smem:[#allocation68_spill]]  ;;  %s6685_s25 = smov [#allocation29]  }
 0x137   :  { %s298_s18 = sshll.u32 %s6685_s25, 4  ;;  %s6686_s22 = smov [#allocation32]   ;;  %s299_s18 = int_to_ptr.vmem [resolvable:$true] %s298_s18 }
 0x138   :  { %s320_s21 = sshll.u32 %s6686_s22, 4  ;;  %s6476_s3 = scalar_lea.vmem %s299_s18, 16  ;;  %s321_s21 = int_to_ptr.vmem [resolvable:$true] %s320_s21 }
 0x139   :  { %p6477_p2 = scmp.ne.s32.totalorder %s299_s18, %s6476_s3  ;;  %s6480_s9 = scalar_lea.vmem %s299_s18, 32 }
 0x13a   :  { %p6481_p3 = scmp.lt.s32.totalorder %s299_s18, %s299_s18  ;;  %p6482_p4 = scmp.lt.s32.totalorder %s6480_s9, %s6476_s3 }
 0x13c   :  { %281 = dma.hbm_to_vmem [thread:$0]  %s7749_s15, 16, %s279_s11, [#allocation25]  }
 0x13d   :  { %p6483_p5 = por %p6482_p4, %p6481_p3 }
 0x13f   :  { %p6484_p6 = pnand %p6483_p5, %p6477_p2 }
 0x141   :  { %6487 = shalt.err (!%p6484_p6)
}
 0x142   :  { %s7750_s29 = sld [smem:[#allocation69_spill]]  ;;  %s6496_s20 = scalar_lea.vmem %s321_s21, 32 }
 0x143   :  { %p6497_p7 = scmp.ne.s32.totalorder %s321_s21, %s6496_s20  ;;  %p6501_p8 = scmp.lt.s32.totalorder %s321_s21, %s321_s21 }
 0x144   :  { %p6502_p9 = scmp.lt.s32.totalorder %s6496_s20, %s6496_s20 }
 0x146   :  { %p6503_p10 = por %p6502_p9, %p6501_p8 }
 0x148   :  { %301 = dma.hbm_to_vmem [thread:$0]  %s7750_s29, 16, %s299_s18, [#allocation28]  }
 0x149   :  { %p6504_p11 = pnand %p6503_p10, %p6497_p7 }
 0x14b   :  { %6507 = shalt.err (!%p6504_p11)
}
 0x14c   :  { %s7751_s23 = sld [smem:[#allocation71_spill]]  ;;  %s6687_s0 = smov [#allocation35]  }
 0x14d   :  { %s350_s26 = sshll.u32 %s6687_s0, 4  ;;  %s6688_s19 = smov [#allocation38]   ;;  %s351_s26 = int_to_ptr.vmem [resolvable:$true] %s350_s26 }
 0x14e   :  { %s372_s14 = sshll.u32 %s6688_s19, 4  ;;  %s6516_s24 = scalar_lea.vmem %s351_s26, 96  ;;  %s373_s14 = int_to_ptr.vmem [resolvable:$true] %s372_s14 }
 0x14f   :  { %p6517_p12 = scmp.ne.s32.totalorder %s351_s26, %s6516_s24  ;;  %p6521_p13 = scmp.lt.s32.totalorder %s351_s26, %s351_s26 }
 0x150   :  { %p6522_p0 = scmp.lt.s32.totalorder %s6516_s24, %s6516_s24 }
 0x152   :  { %323 = dma.hbm_to_vmem [thread:$0]  %s7751_s23, 32, %s321_s21, [#allocation31]  }
 0x153   :  { %p6523_p1 = por %p6522_p0, %p6521_p13 }
 0x155   :  { %p6524_p2 = pnand %p6523_p1, %p6517_p12 }
 0x157   :  { %6527 = shalt.err (!%p6524_p2)
}
 0x158   :  { %s7752_s28 = sld [smem:[#allocation77_spill]]  ;;  %s6536_s5 = scalar_lea.vmem %s373_s14, 16 }
 0x159   :  { %p6537_p3 = scmp.ne.s32.totalorder %s373_s14, %s6536_s5  ;;  %s6540_s30 = scalar_lea.vmem %s373_s14, 32 }
 0x15a   :  { %p6541_p4 = scmp.lt.s32.totalorder %s373_s14, %s373_s14  ;;  %p6542_p5 = scmp.lt.s32.totalorder %s6540_s30, %s6536_s5 }
 0x15c   :  { %p6543_p6 = por %p6542_p5, %p6541_p4 }
 0x15e   :  { %353 = dma.hbm_to_vmem [thread:$0]  %s7752_s28, 96, %s351_s26, [#allocation34]  }
 0x15f   :  { %p6544_p7 = pnand %p6543_p6, %p6537_p3 }
 0x161   :  { %6547 = shalt.err (!%p6544_p7)
}
 0x162   :  { %s7753_s1 = sld [smem:[#allocation79_spill]]  ;;  %s6689_s10 = smov [#allocation41]  }
 0x163   :  { %s399_s11 = sshll.u32 %s6689_s10, 4  ;;  %s400_s11 = int_to_ptr.vmem [resolvable:$true] %s399_s11 }
 0x164   :  { %s6556_s16 = scalar_lea.vmem %s400_s11, 768  ;;  %p6561_p9 = scmp.lt.s32.totalorder %s400_s11, %s400_s11 }
 0x165   :  { %p6557_p8 = scmp.ne.s32.totalorder %s400_s11, %s6556_s16  ;;  %p6562_p10 = scmp.lt.s32.totalorder %s6556_s16, %s6556_s16 }
 0x167   :  { %p6563_p11 = por %p6562_p10, %p6561_p9 }
 0x168   :  { %375 = dma.hbm_to_vmem [thread:$0]  %s7753_s1, 16, %s373_s14, [#allocation37]  }
 0x169   :  { %p6564_p12 = pnand %p6563_p11, %p6557_p8 }
 0x16b   :  { %6567 = shalt.err (!%p6564_p12)
}
 0x16c   :  { %s7754_s6 = sld [smem:[#allocation84_spill]] }
 0x172   :  { %405 = dma.hbm_to_vmem [thread:$0]  %s7754_s6, 768, %s400_s11, [#allocation40], %s6665_s2, %s6665_s2, %s6666_s7  }
 0x173   :  { %6588 = dma.done.wait [#allocation4], 16  }
 0x174   :  { %6589 = vsyncadd [#allocation4], 4294967280 }
 0x175   :  { %6590 = dma.done.wait [#allocation7], 32  }
 0x176   :  { %6591 = vsyncadd [#allocation7], 4294967264 }
 0x177   :  { %6592 = dma.done.wait [#allocation10], 784  }
 0x178   :  { %6593 = vsyncadd [#allocation10], 4294966512 }
 0x179   :  { %6594 = dma.done.wait [#allocation13], 32  }
 0x17a   :  { %6595 = vsyncadd [#allocation13], 4294967264 }
 0x17b   :  { %6596 = dma.done.wait [#allocation16], 64  }
 0x17c   :  { %6597 = vsyncadd [#allocation16], 4294967232 }
 0x17d   :  { %6598 = dma.done.wait [#allocation19], 48  }
 0x17e   :  { %6599 = vsyncadd [#allocation19], 4294967248 }
 0x17f   :  { %6600 = dma.done.wait [#allocation22], 32  }
 0x180   :  { %6601 = vsyncadd [#allocation22], 4294967264 }
 0x181   :  { %6602 = dma.done.wait [#allocation25], 784  }
 0x182   :  { %6603 = vsyncadd [#allocation25], 4294966512 }
 0x183   :  { %6604 = dma.done.wait [#allocation28], 32  }
 0x184   :  { %6605 = vsyncadd [#allocation28], 4294967264 }
 0x185   :  { %6606 = dma.done.wait [#allocation31], 64  }
 0x186   :  { %6607 = vsyncadd [#allocation31], 4294967232 }
 0x187   :  { %6608 = dma.done.wait [#allocation34], 128  }
 0x188   :  { %6609 = vsyncadd [#allocation34], 4294967168 }
 0x189   :  { %6610 = dma.done.wait [#allocation37], 32  }
 0x18a   :  { %6611 = vsyncadd [#allocation37], 4294967264 }
 0x18b   :  { %6612 = dma.done.wait [#allocation40], 784  }
 0x18c   :  { %6613 = vsyncadd [#allocation40], 4294966512  ;;  %s7755_s2 = sld [smem:[#allocation60_spill]]  ;;  %v4825_v61 = vld [vmem:[#allocation3] ss:$0 sm:$0xff]  ;;  %vm1050_vm0 = vcmask 785408  }
 0x18d   :  { %s7756_s7 = sld [smem:[#allocation57_spill]]  ;;  %vm6691_vm1 = vmmov 0   ;;  %vm1383_vm2 = vcmask 523264  }
 0x18e   :  { %s7757_s12 = sld [smem:[#allocation65_spill]] }
 0x18f   :  { %s7758_s27 = sld [smem:[#allocation63_spill]] }
 0x190   :  { %s7759_s4 = sld [smem:[#allocation58_spill]] }
 0x191   :  { %s7760_s15 = sld [smem:[#allocation70_spill]] }
 0x192   :  { %v5582_v1 = vld [vmem:[%s7755_s2 + $0x78] sm:$0xff]   ;;  %v5586_v5 = vld [vmem:[%s7755_s2 + $0x70] sm:$0xff]   ;;  %v5590_v9 = vld [vmem:[%s7755_s2 + $0x68] sm:$0xff]   ;;  %s7761_s25 = sld [smem:[#allocation73_spill]] }
 0x193   :  { %v5583_v2 = vld [vmem:[%s7755_s2 + $0x38] sm:$0xff]   ;;  %5210 = vmatprep.subr.bf16.mxu0 %v5582_v1  ;;  %v5587_v6 = vld [vmem:[%s7755_s2 + $0x30] sm:$0xff]   ;;  %v5591_v10 = vld [vmem:[%s7755_s2 + $0x28] sm:$0xff]   ;;  %s7762_s18 = sld [smem:[#allocation72_spill]] }
 0x194   :  { %v5584_v3 = vld [vmem:[%s7755_s2 + $0xf8] sm:$0xff]   ;;  %5211 = vmatpush3.bf16.msra.mxu0 %v5583_v2  ;;  %v5588_v7 = vld [vmem:[%s7755_s2 + $0xf0] sm:$0xff]   ;;  %v5592_v11 = vld [vmem:[%s7755_s2 + $0xe8] sm:$0xff]   ;;  %s7763_s22 = sld [smem:[#allocation59_spill]] }
 0x195   :  { %v5585_v4 = vld [vmem:[%s7755_s2 + $0xb8] sm:$0xff]   ;;  %5232 = vmatprep.subr.bf16.mxu1 %v5584_v3  ;;  %5212 = vmatprep.subr.bf16.mxu0 %v5586_v5  ;;  %v5589_v8 = vld [vmem:[%s7755_s2 + $0xb0] sm:$0xff]   ;;  %v5593_v12 = vld [vmem:[%s7755_s2 + $0xa8] sm:$0xff]   ;;  %s7764_s21 = sld [smem:[#allocation74_spill]] }
 0x196   :  { %5233 = vmatpush3.bf16.msra.mxu1 %v5585_v4  ;;  %v5594_v13 = vld [vmem:[%s7755_s2 + $0x60] sm:$0xff]   ;;  %v5598_v17 = vld [vmem:[%s7755_s2 + $0x58] sm:$0xff]   ;;  %v5602_v21 = vld [vmem:[%s7755_s2 + $0x50] sm:$0xff]   ;;  %s7765_s3 = sld [smem:[#allocation75_spill]] }
 0x197   :  { %5234 = vmatprep.subr.bf16.mxu1 %v5588_v7  ;;  %v5595_v14 = vld [vmem:[%s7755_s2 + $0x20] sm:$0xff]   ;;  %v5599_v18 = vld [vmem:[%s7755_s2 + $0x18] sm:$0xff]   ;;  %v5603_v22 = vld [vmem:[%s7755_s2 + $0x10] sm:$0xff]   ;;  %s7766_s9 = sld [smem:[#allocation78_spill]] }
 0x198   :  { %5213 = vmatpush3.bf16.msra.mxu0 %v5587_v6  ;;  %v5596_v15 = vld [vmem:[%s7755_s2 + $0xe0] sm:$0xff]   ;;  %v5600_v19 = vld [vmem:[%s7755_s2 + $0xd8] sm:$0xff]   ;;  %v5604_v23 = vld [vmem:[%s7755_s2 + $0xd0] sm:$0xff]   ;;  %s7767_s29 = sld [smem:[#allocation76_spill]] }
 0x199   :  { %5214 = vmatprep.subr.bf16.mxu0 %v5590_v9  ;;  %v5597_v16 = vld [vmem:[%s7755_s2 + $0xa0] sm:$0xff]   ;;  %v5601_v20 = vld [vmem:[%s7755_s2 + $0x98] sm:$0xff]   ;;  %v5605_v24 = vld [vmem:[%s7755_s2 + $0x90] sm:$0xff]   ;;  %s7768_s20 = sld [smem:[#allocation80_spill]] }
 0x19a   :  { %5235 = vmatpush3.bf16.msra.mxu1 %v5589_v8  ;;  %v5606_v25 = vld [vmem:[%s7755_s2 + $0x48] sm:$0xff]   ;;  %v5610_v29 = vld [vmem:[%s7755_s2 + $0x40] sm:$0xff]   ;;  %v5617_v35 = vld [vmem:[%s7755_s2 + $0x178] sm:$0xff]   ;;  %s7769_s23 = sld [smem:[#allocation81_spill]] }
 0x19b   :  { %5236 = vmatprep.subr.bf16.mxu1 %v5592_v11  ;;  %v5607_v26 = vld [vmem:[%s7755_s2 + $0x8] sm:$0xff]   ;;  %v5611_v30 = vld [vmem:[%s7755_s2] sm:$0xff]   ;;  %v5621_v38 = vld [vmem:[%s7755_s2 + $0x138] sm:$0xff]   ;;  %s7770_s0 = sld [smem:[#allocation82_spill]] }
 0x19c   :  { %5215 = vmatpush3.bf16.msra.mxu0 %v5591_v10  ;;  %v5608_v27 = vld [vmem:[%s7755_s2 + $0xc8] sm:$0xff]   ;;  %v5612_v31 = vld [vmem:[%s7755_s2 + $0xc0] sm:$0xff]   ;;  %v5622_v39 = vld [vmem:[%s7755_s2 + $0x170] sm:$0xff]   ;;  %s7771_s26 = sld [smem:[#allocation83_spill]] }
 0x19d   :  { %5216 = vmatprep.subr.bf16.mxu0 %v5594_v13  ;;  %v5609_v28 = vld [vmem:[%s7755_s2 + $0x88] sm:$0xff]   ;;  %v5613_v32 = vld [vmem:[%s7756_s7] ss:$24 sps:$4 sm:$0xff]   ;;  %v5615_v33 = vld [vmem:[%s7756_s7 + $0x4] ss:$24 sps:$4 sm:$0xff]   ;;  %s7772_s19 = sld [smem:[#allocation85_spill]] }
 0x19e   :  { %5237 = vmatpush3.bf16.msra.mxu1 %v5593_v12  ;;  %v5616_v34 = vld [vmem:[%s7755_s2 + $0x80] sm:$0xff]   ;;  %959 = vmatprep.mubr.bf16.mxu0 %v5615_v33  ;;  %v5623_v40 = vld [vmem:[%s7755_s2 + $0x130] sm:$0xff]   ;;  %v5624_v41 = vld [vmem:[%s7755_s2 + $0x168] sm:$0xff]   ;;  %s7773_s14 = sld [smem:[#allocation86_spill]] }
 0x19f   :  { %5238 = vmatprep.subr.bf16.mxu1 %v5596_v15  ;;  %v5618_v36 = vld [vmem:[%s7756_s7 + $0x8] ss:$24 sps:$4 sm:$0xff]   ;;  %v5620_v37 = vld [vmem:[%s7756_s7 + $0xc] ss:$24 sps:$4 sm:$0xff]   ;;  %v5628_v45 = vld [vmem:[%s7755_s2 + $0x158] sm:$0xff]  }
 0x1a0   :  { %5217 = vmatpush3.bf16.msra.mxu0 %v5595_v14  ;;  %1000 = vmatprep.mubr.bf16.mxu1 %v5620_v37  ;;  %v5625_v42 = vld [vmem:[%s7755_s2 + $0x128] sm:$0xff]   ;;  %v5626_v43 = vld [vmem:[%s7755_s2 + $0x160] sm:$0xff]   ;;  %v5629_v46 = vld [vmem:[%s7755_s2 + $0x118] sm:$0xff]  }
 0x1a1   :  { %5218 = vmatprep.subr.bf16.mxu0 %v5598_v17  ;;  %v5627_v44 = vld [vmem:[%s7755_s2 + $0x120] sm:$0xff]   ;;  %v5630_v47 = vld [vmem:[%s7755_s2 + $0x150] sm:$0xff]   ;;  %v5632_v50 = vld [vmem:[%s7755_s2 + $0x148] sm:$0xff]  }
 0x1a2   :  { %5239 = vmatpush3.bf16.msra.mxu1 %v5597_v16  ;;  %v5638_v48 = vld [vmem:[%s7756_s7 + $0x14] ss:$24 sps:$4 sm:$0xff]   ;;  %v5634_v52 = vld [vmem:[%s7755_s2 + $0x140] sm:$0xff]   ;;  %v5636_v54 = vld [vmem:[%s7756_s7 + $0x10] ss:$24 sps:$4 sm:$0xff]  }
 0x1a3   :  { %5240 = vmatprep.subr.bf16.mxu1 %v5600_v19  ;;  %v5631_v49 = vld [vmem:[%s7755_s2 + $0x110] sm:$0xff]   ;;  %v5633_v51 = vld [vmem:[%s7755_s2 + $0x108] sm:$0xff]   ;;  %v5635_v53 = vld [vmem:[%s7755_s2 + $0x100] sm:$0xff]  }
 0x1a4   :  { %5219 = vmatpush3.bf16.msra.mxu0 %v5599_v18 }
 0x1a5   :  { %5220 = vmatprep.subr.bf16.mxu0 %v5602_v21 }
 0x1a6   :  { %5241 = vmatpush3.bf16.msra.mxu1 %v5601_v20 }
 0x1a7   :  { %5242 = vmatprep.subr.bf16.mxu1 %v5604_v23  ;;  %v6690_v23 = vmov 0.0  }
 0x1a8   :  { %5221 = vmatpush3.bf16.msra.mxu0 %v5603_v22  ;;  %v5639_v22 = vld [vmem:[#allocation9 + $0x28] sm:$0xff]  }
 0x1a9   :  { %5222 = vmatprep.subr.bf16.mxu0 %v5606_v25  ;;  %v5641_v25 = vld [vmem:[#allocation9 + $0x18] sm:$0xff]  }
 0x1aa   :  { %5243 = vmatpush3.bf16.msra.mxu1 %v5605_v24  ;;  %v5640_v24 = vld [vmem:[#allocation9 + $0x20] sm:$0xff]  }
 0x1ab   :  { %5244 = vmatprep.subr.bf16.mxu1 %v5608_v27  ;;  %v5643_v27 = vld [vmem:[#allocation9 + $0x8] sm:$0xff]  }
 0x1ac   :  { %5223 = vmatpush3.bf16.msra.mxu0 %v5607_v26  ;;  %v5642_v26 = vld [vmem:[#allocation9 + $0x10] sm:$0xff]  }
 0x1ad   :  { %5224 = vmatprep.subr.bf16.mxu0 %v5610_v29 }
 0x1ae   :  { %5245 = vmatpush3.bf16.msra.mxu1 %v5609_v28  ;;  %v5644_v28 = vld [vmem:[#allocation9] sm:$0xff]  }
 0x1af   :  { %5246 = vmatprep.subr.bf16.mxu1 %v5612_v31 }
 0x1b0   :  { %5225 = vmatpush3.bf16.msra.mxu0 %v5611_v30 }
 0x1b1   :  { %5254 = vmatprep.subr.bf16.mxu0 %v5617_v35 }
 0x1b2   :  { %5247 = vmatpush3.bf16.msra.mxu1 %v5616_v34 }
 0x1b3   :  { %960 = vmatmul.mubr.bf16.vlgmr.msra.gmra.mxu0 %v5613_v32  ;;  %5436 = vmatprep.subr.bf16.mxu1 %v6690_v23 }
 0x1b4   :  { %5255 = vmatpush3.bf16.msra.mxu0 %v5621_v38  ;;  %1041 = vmatprep.mubr.bf16.mxu0 %v5638_v48 }
 0x1b5   :  { %1001 = vmatmul.mubr.bf16.vlgmr.msra.gmra.mxu1 %v5618_v36  ;;  %5256 = vmatprep.subr.bf16.mxu0 %v5622_v39 }
 0x1b6   :  { %5437 = vmatpush3.bf16.msra.mxu1 %v5639_v22  ;;  %5448 = vmatprep.mubr.msk.bf16.mxu1 %vm6691_vm1, %v6690_v23  ;;  %v5664_v22 = vld [vmem:[%s7757_s12 + $0x50] sm:$0xff]  }
 0x1b7   :  { %5438 = vmatprep.subr.bf16.mxu1 %v6690_v23 }
 0x1b8   :  { %5257 = vmatpush3.bf16.msra.mxu0 %v5623_v40 }
 0x1b9   :  { %5258 = vmatprep.subr.bf16.mxu0 %v5624_v41 }
 0x1ba   :  { %5439 = vmatpush3.bf16.msra.mxu1 %v5640_v24  ;;  %v5661_v24 = vld [vmem:[%s7758_s27 + $0x30] ss:$8 sps:$4 sm:$0xff]  }
 0x1bb   :  { %5440 = vmatprep.subr.bf16.mxu1 %v6690_v23 }
 0x1bc   :  { %5259 = vmatpush3.bf16.msra.mxu0 %v5625_v42 }
 0x1bd   :  { %5260 = vmatprep.subr.bf16.mxu0 %v5626_v43 }
 0x1be   :  { %5441 = vmatpush3.bf16.msra.mxu1 %v5641_v25  ;;  %v5665_v25 = vld [vmem:[%s7757_s12 + $0x10] sm:$0xff]  }
 0x1bf   :  { %5442 = vmatprep.subr.bf16.mxu1 %v6690_v23 }
 0x1c0   :  { %5261 = vmatpush3.bf16.msra.mxu0 %v5627_v44 }
 0x1c1   :  { %5262 = vmatprep.subr.bf16.mxu0 %v5628_v45  ;;  %v4880_v45 = vld [vmem:[#allocation6] ss:$0 sm:$0xff] }
 0x1c2   :  { %5443 = vmatpush3.bf16.msra.mxu1 %v5642_v26  ;;  %v5668_v26 = vld [vmem:[%s7758_s27 + $0x24] ss:$8 sps:$4 sm:$0xff]  }
 0x1c3   :  { %5444 = vmatprep.subr.bf16.mxu1 %v6690_v23 }
 0x1c4   :  { %5263 = vmatpush3.bf16.msra.mxu0 %v5629_v46 }
 0x1c5   :  { %5264 = vmatprep.subr.bf16.mxu0 %v5630_v47 }
 0x1c6   :  { %5445 = vmatpush3.bf16.msra.mxu1 %v5643_v27  ;;  %v5669_v27 = vld [vmem:[%s7757_s12 + $0x48] sm:$0xff]  }
 0x1c7   :  { %5446 = vmatprep.subr.bf16.mxu1 %v6690_v23 }
 0x1c8   :  { %5265 = vmatpush3.bf16.msra.mxu0 %v5631_v49 }
 0x1c9   :  { %5266 = vmatprep.subr.bf16.mxu0 %v5632_v50  ;;  %v4881_v50 = vld [vmem:[#allocation8] ss:$0 sm:$0xff] }
 0x1ca   :  { %5447 = vmatpush3.bf16.msra.mxu1 %v5644_v28  ;;  %v5666_v28 = vld [vmem:[%s7758_s27 + $0x20] ss:$8 sps:$4 sm:$0xff]  }
 0x1cc   :  { %5267 = vmatpush3.bf16.msra.mxu0 %v5633_v51 }
 0x1cd   :  { %5268 = vmatprep.subr.bf16.mxu0 %v5634_v52 }
 0x1d0   :  { %5269 = vmatpush3.bf16.msra.mxu0 %v5635_v53 }
 0x1d3   :  { %1042 = vmatmul.mubr.bf16.vlgmr.msra.gmra.mxu0 %v5636_v54 }
 0x273   :  { %v5226_v55 = vpop.f32.mrf.mxu0 }
 0x275   :  { %v5227_v56 = vpop.f32.mrf.mxu0  ;;  %v5248_v57 = vpop.f32.mrf.mxu1 }
 0x276   :  { %v5228_v60 = vadd.f32 %v5227_v56, %v5226_v55 }
 0x277   :  { %v5229_v58 = vpop.f32.mrf.mxu0  ;;  %v5249_v59 = vpop.f32.mrf.mxu1 }
 0x278   :  { %v962_v0 = vadd.f32 %v5228_v60, %v4825_v61  ;;  %v5250_v1 = vadd.f32 %v5249_v59, %v5248_v57 }
 0x279   :  { %v5230_v62 = vpop.f32.mrf.mxu0  ;;  %v5251_v63 = vpop.f32.mrf.mxu1 }
 0x27a   :  { %v5231_v2 = vadd.f32 %v5230_v62, %v5229_v58  ;;  %v1003_v6 = vadd.f32 %v5250_v1, %v962_v0  ;;  %v4882_v58 = vld [vmem:[#allocation11] ss:$0 sm:$0xff] }
 0x27b   :  { %v5252_v3 = vpop.f32.mrf.mxu1 }
 0x27c   :  { %v965_v7 = vadd.f32 %v5231_v2, %v4825_v61  ;;  %v5253_v8 = vadd.f32 %v5252_v3, %v5251_v63 }
 0x27e   :  { %v1006_v13 = vadd.f32 %v5253_v8, %v965_v7  ;;  %v5645_v7 = vld [vmem:[%s7757_s12 + $0x78] sm:$0xff]  }
 0x27f   :  { %v5646_v8 = vld [vmem:[%s7757_s12 + $0x38] sm:$0xff]   ;;  %5283 = vmatprep.subr.bf16.mxu0 %v5645_v7 }
 0x280   :  { %5284 = vmatpush3.bf16.msra.mxu0 %v5646_v8 }
 0x293   :  { %v5270_v4 = vpop.f32.mrf.mxu0 }
 0x295   :  { %v5271_v5 = vpop.f32.mrf.mxu0 }
 0x296   :  { %v5272_v9 = vadd.f32 %v5271_v5, %v5270_v4 }
 0x297   :  { %v5273_v10 = vpop.f32.mrf.mxu0 }
 0x298   :  { %v1044_v11 = vadd.f32 %v5272_v9, %v1003_v6  ;;  %v5647_v9 = vld [vmem:[%s7757_s12 + $0x70] sm:$0xff]  }
 0x299   :  { %v5274_v12 = vpop.f32.mrf.mxu0  ;;  %5285 = vmatprep.subr.bf16.mxu0 %v5647_v9 }
 0x29a   :  { %v5275_v14 = vadd.f32 %v5274_v12, %v5273_v10  ;;  %v1051_v15 = vsel %vm1050_vm0, %v1044_v11, 0.0  ;;  %v1060_v16 = vmul.f32 %v1044_v11, %v1044_v11  ;;  %v5648_v10 = vld [vmem:[%s7757_s12 + $0x30] sm:$0xff]   ;;  %v5650_v12 = vld [vmem:[%s7757_s12 + $0x28] sm:$0xff]  }
 0x29b   :  { %1052 = vadd.xlane.f32.xlu0 %v1051_v15  ;;  %5286 = vmatpush3.bf16.msra.mxu0 %v5648_v10  ;;  %v5651_v15 = vld [vmem:[%s7758_s27 + $0x50] ss:$8 sps:$4 sm:$0xff]  }
 0x29c   :  { %v1047_v17 = vadd.f32 %v5275_v14, %v1006_v13  ;;  %v1062_v18 = vsel %vm1050_vm0, %v1060_v16, 0.0  ;;  %v5653_v13 = vld [vmem:[%s7758_s27 + $0x54] ss:$8 sps:$4 sm:$0xff]   ;;  %v5654_v14 = vld [vmem:[%s7757_s12 + $0x60] sm:$0xff]  }
 0x29d   :  { %1063 = vadd.xlane.f32.xlu1 %v1062_v18  ;;  %v5655_v16 = vld [vmem:[%s7757_s12 + $0x20] sm:$0xff]   ;;  %1344 = vmatprep.subr.bf16.mxu1 %v5653_v13  ;;  %v5659_v18 = vld [vmem:[%s7757_s12 + $0x58] sm:$0xff]  }
 0x29e   :  { %v1054_v19 = vsel %vm1050_vm0, %v1047_v17, 0.0  ;;  %v1061_v20 = vmul.f32 %v1047_v17, %v1047_v17 }
 0x29f   :  { %1055 = vadd.xlane.f32.xlu0 %v1054_v19  ;;  %v5656_v19 = vld [vmem:[%s7758_s27 + $0x40] ss:$8 sps:$4 sm:$0xff]  }
 0x2a0   :  { %v1065_v21 = vsel %vm1050_vm0, %v1061_v20, 0.0  ;;  %v5660_v20 = vld [vmem:[%s7757_s12 + $0x18] sm:$0xff]  }
 0x2a1   :  { %1066 = vadd.xlane.f32.xlu1 %v1065_v21  ;;  %v5663_v21 = vld [vmem:[%s7758_s27 + $0x34] ss:$8 sps:$4 sm:$0xff]  }
 0x324   :  { %v1053_v29 = vpop.xlane.xlu0 %1052 }
 0x325   :  { %v1058_v30 = vmul.f32 0.010416667, %v1053_v29  ;;  %v5670_v29 = vld [vmem:[%s7757_s12 + $0x8] sm:$0xff]  }
 0x326   :  { %v1064_v31 = vpop.xlane.xlu1 %1063 }
 0x327   :  { %v1070_v32 = vmul.f32 %v1058_v30, %v1058_v30  ;;  %v1068_v33 = vmul.f32 0.010416667, %v1064_v31  ;;  %v1074_v43 = vsub.f32 %v1044_v11, %v1058_v30  ;;  %v5649_v11 = vld [vmem:[%s7757_s12 + $0x68] sm:$0xff]   ;;  %v5673_v30 = vld [vmem:[%s7758_s27 + $0x14] ss:$8 sps:$4 sm:$0xff]   ;;  %v5674_v31 = vld [vmem:[%s7757_s12 + $0x40] sm:$0xff]  }
 0x328   :  { %v1056_v34 = vpop.xlane.xlu0 %1055  ;;  %5287 = vmatprep.subr.bf16.mxu0 %v5649_v11 }
 0x329   :  { %v1072_v35 = vsub.f32 %v1068_v33, %v1070_v32  ;;  %v1059_v36 = vmul.f32 0.010416667, %v1056_v34  ;;  %5288 = vmatpush3.bf16.msra.mxu0 %v5650_v12  ;;  %v5671_v32 = vld [vmem:[%s7758_s27 + $0x10] ss:$8 sps:$4 sm:$0xff]   ;;  %v5675_v33 = vld [vmem:[%s7757_s12] sm:$0xff]  }
 0x32a   :  { %v1067_v37 = vpop.xlane.xlu1 %1066  ;;  %5289 = vmatprep.subr.bf16.mxu0 %v5654_v14  ;;  %v5678_v34 = vld [vmem:[%s7758_s27 + $0x4] ss:$8 sps:$4 sm:$0xff]   ;;  %v4890_v12 = vld [vmem:[#allocation12] ss:$0 sm:$0xff] }
 0x32b   :  { %v1076_v38 = vadd.f32 1e-05, %v1072_v35  ;;  %v1071_v39 = vmul.f32 %v1059_v36, %v1059_v36  ;;  %v1069_v40 = vmul.f32 0.010416667, %v1067_v37  ;;  %v1075_v47 = vsub.f32 %v1047_v17, %v1059_v36  ;;  %v5658_v17 = vld [vmem:[%s7758_s27 + $0x44] ss:$8 sps:$4 sm:$0xff]  }
 0x32c   :  { %v5679_v35 = vld [vmem:[%s7759_s4] ss:$24 sps:$4 sm:$0xff]   ;;  %v5681_v36 = vld [vmem:[%s7759_s4 + $0x4] ss:$24 sps:$4 sm:$0xff]  }
 0x32d   :  { %6020 = vrsqrt.f32 %v1076_v38  ;;  %v1073_v41 = vsub.f32 %v1069_v40, %v1071_v39  ;;  %5290 = vmatpush3.bf16.msra.mxu0 %v5655_v16  ;;  %v5676_v37 = vld [vmem:[%s7758_s27] ss:$8 sps:$4 sm:$0xff]   ;;  %v5682_v38 = vld [vmem:[%s7757_s12 + $0x178] sm:$0xff]   ;;  %1914 = vmatprep.mubr.bf16.mxu0 %v5681_v36 }
 0x32e   :  { %5291 = vmatprep.subr.bf16.mxu0 %v5659_v18  ;;  %v5683_v39 = vld [vmem:[%s7757_s12 + $0x138] sm:$0xff]   ;;  %v5708_v36 = vld [vmem:[%s7757_s12 + $0xc8] sm:$0xff]  }
 0x32f   :  { %v1077_v42 = vadd.f32 1e-05, %v1073_v41  ;;  %v5684_v40 = vld [vmem:[%s7757_s12 + $0xf8] sm:$0xff]   ;;  %v5685_v41 = vld [vmem:[%s7757_s12 + $0x170] sm:$0xff]  }
 0x331   :  { %6022 = vrsqrt.f32 %v1077_v42  ;;  %5292 = vmatpush3.bf16.msra.mxu0 %v5660_v20  ;;  %v6692_v42 = vmov 0  }
 0x332   :  { %5293 = vmatprep.subr.bf16.mxu0 %v5664_v22  ;;  %5580 = vset.pattern.permute.xlu0 %v6692_v42 }
 0x333   :  { %5581 = vset.pattern.permute.xlu1 %v6692_v42 }
 0x335   :  { %5294 = vmatpush3.bf16.msra.mxu0 %v5665_v25  ;;  %v5719_v25 = vld [vmem:[%s7759_s4 + $0xc] ss:$24 sps:$4 sm:$0xff]  }
 0x336   :  { %5295 = vmatprep.subr.bf16.mxu0 %v5669_v27  ;;  %v5688_v27 = vld [vmem:[%s7757_s12 + $0xf0] sm:$0xff]  }
 0x339   :  { %5296 = vmatpush3.bf16.msra.mxu0 %v5670_v29  ;;  %v5694_v29 = vld [vmem:[%s7757_s12 + $0xa8] sm:$0xff]  }
 0x33a   :  { %v6021_v44 = vpop.eup %6020  ;;  %5297 = vmatprep.subr.bf16.mxu0 %v5674_v31  ;;  %v5698_v31 = vld [vmem:[%s7757_s12 + $0xa0] sm:$0xff]  }
 0x33b   :  { %v1080_v46 = vmul.f32 %v6021_v44, %v1074_v43  ;;  %v5687_v43 = vld [vmem:[%s7757_s12 + $0x130] sm:$0xff]   ;;  %v5689_v44 = vld [vmem:[%s7757_s12 + $0x168] sm:$0xff]  }
 0x33d   :  { %v1089_v48 = vmul.f32 %v4880_v45, %v1080_v46  ;;  %5298 = vmatpush3.bf16.msra.mxu0 %v5675_v33  ;;  %v5693_v46 = vld [vmem:[%s7757_s12 + $0x160] sm:$0xff]   ;;  %v5702_v33 = vld [vmem:[%s7757_s12 + $0x98] sm:$0xff]  }
 0x33e   :  { %v6023_v49 = vpop.eup %6022  ;;  %5327 = vmatprep.subr.bf16.mxu0 %v5682_v38  ;;  %v5715_v38 = vld [vmem:[%s7757_s12 + $0xc0] sm:$0xff]  }
 0x33f   :  { %v1081_v51 = vmul.f32 %v6023_v49, %v1075_v47  ;;  %v1098_v53 = vadd.f32 %v4881_v50, %v1089_v48  ;;  %v5695_v47 = vld [vmem:[%s7757_s12 + $0x120] sm:$0xff]   ;;  %v5697_v48 = vld [vmem:[%s7757_s12 + $0x158] sm:$0xff]  }
 0x340   :  { %1915 = vmatmul.mubr.bf16.vlgmr.msra.gmra.mxu0 %v5679_v35  ;;  %v5699_v49 = vld [vmem:[%s7757_s12 + $0x118] sm:$0xff]   ;;  %v5706_v35 = vld [vmem:[%s7757_s12 + $0x90] sm:$0xff]  }
 0x341   :  { %v1090_v52 = vmul.f32 %v4880_v45, %v1081_v51  ;;  %v1100_v55 = vmax.f32 %v1098_v53, 0.0  ;;  %5328 = vmatpush3.bf16.msra.mxu0 %v5683_v39  ;;  %v5691_v45 = vld [vmem:[%s7757_s12 + $0x128] sm:$0xff]   ;;  %v5703_v51 = vld [vmem:[%s7757_s12 + $0x110] sm:$0xff]   ;;  %v5716_v39 = vld [vmem:[%s7757_s12 + $0x80] sm:$0xff]  }
 0x342   :  { %5329 = vmatprep.subr.bf16.mxu0 %v5685_v41  ;;  %v5707_v53 = vld [vmem:[%s7757_s12 + $0x108] sm:$0xff]  }
 0x343   :  { %v1099_v54 = vadd.f32 %v4881_v50, %v1090_v52  ;;  %v5701_v50 = vld [vmem:[%s7757_s12 + $0x150] sm:$0xff]   ;;  %v5705_v52 = vld [vmem:[%s7757_s12 + $0x148] sm:$0xff]  }
 0x345   :  { %v1101_v56 = vmax.f32 %v1099_v54, 0.0  ;;  %5330 = vmatpush3.bf16.msra.mxu0 %v5687_v43  ;;  %v5709_v54 = vld [vmem:[%s7757_s12 + $0x140] sm:$0xff]  }
 0x346   :  { %5331 = vmatprep.subr.bf16.mxu0 %v5689_v44 }
 0x347   :  { %v1102_v57 = vpack.c.bf16 %v1101_v56, %v1100_v55  ;;  %v5711_v55 = vld [vmem:[%s7757_s12 + $0x100] sm:$0xff]   ;;  %v5712_v56 = vld [vmem:[%s7759_s4 + $0x10] ss:$24 sps:$4 sm:$0xff]  }
 0x349   :  { %5449 = vmatmul.mubr.msk.bf16.vlgmr.msra.gmra.mxu1 %vm1050_vm0, %v1102_v57  ;;  %5332 = vmatpush3.bf16.msra.mxu0 %v5691_v45  ;;  %v5714_v57 = vld [vmem:[%s7759_s4 + $0x14] ss:$24 sps:$4 sm:$0xff]  }
 0x34a   :  { %1345 = vmatpush1.bf16.msra.mxu1 %v5651_v15  ;;  %1372 = vmatprep.mubr.bf16.mxu1 %v6692_v42 }
 0x34b   :  { %1346 = vmatprep.subr.bf16.mxu1 %v5658_v17  ;;  %5333 = vmatprep.subr.bf16.mxu0 %v5693_v46  ;;  %v4891_v17 = vld [vmem:[#allocation14] ss:$0 sm:$0xff] }
 0x34c   :  { %1996 = vmatprep.mubr.bf16.mxu0 %v5714_v57 }
 0x34d   :  { %5334 = vmatpush3.bf16.msra.mxu0 %v5695_v47 }
 0x34e   :  { %1347 = vmatpush1.bf16.msra.mxu1 %v5656_v19  ;;  %5335 = vmatprep.subr.bf16.mxu0 %v5697_v48 }
 0x34f   :  { %1348 = vmatprep.subr.bf16.mxu1 %v5663_v21 }
 0x351   :  { %5336 = vmatpush3.bf16.msra.mxu0 %v5699_v49 }
 0x352   :  { %1349 = vmatpush1.bf16.msra.mxu1 %v5661_v24  ;;  %5337 = vmatprep.subr.bf16.mxu0 %v5701_v50 }
 0x353   :  { %1350 = vmatprep.subr.bf16.mxu1 %v5668_v26 }
 0x355   :  { %5338 = vmatpush3.bf16.msra.mxu0 %v5703_v51 }
 0x356   :  { %1351 = vmatpush1.bf16.msra.mxu1 %v5666_v28  ;;  %5339 = vmatprep.subr.bf16.mxu0 %v5705_v52  ;;  %v5692_v28 = vld [vmem:[%s7757_s12 + $0xe8] sm:$0xff]   ;;  %v4905_v52 = vld [vmem:[#allocation20] ss:$0 sm:$0xff] }
 0x357   :  { %1352 = vmatprep.subr.bf16.mxu1 %v5673_v30  ;;  %v5696_v30 = vld [vmem:[%s7757_s12 + $0xe0] sm:$0xff]  }
 0x359   :  { %5340 = vmatpush3.bf16.msra.mxu0 %v5707_v53 }
 0x35a   :  { %1353 = vmatpush1.bf16.msra.mxu1 %v5671_v32  ;;  %5341 = vmatprep.subr.bf16.mxu0 %v5709_v54  ;;  %v5700_v32 = vld [vmem:[%s7757_s12 + $0xd8] sm:$0xff]  }
 0x35b   :  { %1354 = vmatprep.subr.bf16.mxu1 %v5678_v34  ;;  %v5704_v34 = vld [vmem:[%s7757_s12 + $0xd0] sm:$0xff]  }
 0x35d   :  { %5342 = vmatpush3.bf16.msra.mxu0 %v5711_v55 }
 0x35e   :  { %1355 = vmatpush1.bf16.msra.mxu1 %v5676_v37  ;;  %v5710_v37 = vld [vmem:[%s7757_s12 + $0x88] sm:$0xff]  }
 0x35f   :  { %5305 = vmatprep.subr.bf16.mxu1 %v5684_v40  ;;  %v5717_v40 = vld [vmem:[%s7759_s4 + $0x8] ss:$24 sps:$4 sm:$0xff]  }
 0x360   :  { %1997 = vmatmul.mubr.bf16.vlgmr.msra.gmra.mxu0 %v5712_v56 }
 0x361   :  { %2325 = vmatprep.mubr.bf16.mxu0 %v6692_v42 }
 0x400   :  { %v5299_v41 = vpop.f32.mrf.mxu0 }
 0x402   :  { %v5300_v42 = vpop.f32.mrf.mxu0 }
 0x403   :  { %v5301_v51 = vadd.f32 %v5300_v42, %v5299_v41 }
 0x404   :  { %v5302_v44 = vpop.f32.mrf.mxu0 }
 0x405   :  { %v1917_v56 = vadd.f32 %v5301_v51, %v4905_v52 }
 0x406   :  { %v5303_v46 = vpop.f32.mrf.mxu0 }
 0x407   :  { %v5304_v57 = vadd.f32 %v5303_v46, %v5302_v44 }
 0x409   :  { %v1195_v59 = vpop.f32.mrf.mxu1 }
 0x40a   :  { %v7040_v60 = vadd.f32 %v4882_v58, %v1195_v59 }
 0x40b   :  { %v5450_v61 = vpop.f32.mrf.mxu1 }
 0x40c   :  { %v1202_v62 = vsel %vm1050_vm0, %v7040_v60, 0.0  ;;  %v1210_v63 = vmul.f32 %v7040_v60, %v7040_v60 }
 0x40d   :  { %1203 = vadd.xlane.f32.xlu0 %v1202_v62  ;;  %v1198_v0 = vpop.f32.mrf.mxu1 }
 0x40e   :  { %v7046_v1 = vadd.f32 %v4882_v58, %v1198_v0  ;;  %v1212_v3 = vsel %vm1050_vm0, %v1210_v63, 0.0 }
 0x40f   :  { %v5451_v2 = vpop.f32.mrf.mxu1 }
 0x410   :  { %v1205_v4 = vsel %vm1050_vm0, %v7046_v1, 0.0  ;;  %v1211_v5 = vmul.f32 %v7046_v1, %v7046_v1 }
 0x411   :  { %1213 = vadd.xlane.f32.xlu0 %v1212_v3  ;;  %1206 = vadd.xlane.f32.xlu1 %v1205_v4 }
 0x412   :  { %v1215_v6 = vsel %vm1050_vm0, %v1211_v5, 0.0 }
 0x415   :  { %1216 = vadd.xlane.f32.xlu1 %v1215_v6 }
 0x420   :  { %v5343_v48 = vpop.f32.mrf.mxu0 }
 0x422   :  { %v5344_v50 = vpop.f32.mrf.mxu0 }
 0x424   :  { %v5346_v54 = vpop.f32.mrf.mxu0 }
 0x496   :  { %v1204_v58 = vpop.xlane.xlu0 %1203 }
 0x497   :  { %v1208_v59 = vmul.f32 0.010416667, %v1204_v58 }
 0x499   :  { %v1220_v63 = vmul.f32 %v1208_v59, %v1208_v59  ;;  %v1224_v10 = vsub.f32 %v7040_v60, %v1208_v59  ;;  %v5686_v60 = vld [vmem:[%s7757_s12 + $0xb8] sm:$0xff]  }
 0x49a   :  { %v1214_v61 = vpop.xlane.xlu0 %1213  ;;  %v1207_v62 = vpop.xlane.xlu1 %1206 }
 0x49b   :  { %v1218_v0 = vmul.f32 0.010416667, %v1214_v61  ;;  %v1209_v2 = vmul.f32 0.010416667, %v1207_v62  ;;  %v5345_v61 = vadd.f32 %v5344_v50, %v5343_v48 }
 0x49d   :  { %v1222_v3 = vsub.f32 %v1218_v0, %v1220_v63  ;;  %v1221_v6 = vmul.f32 %v1209_v2, %v1209_v2  ;;  %v1225_v14 = vsub.f32 %v7046_v1, %v1209_v2  ;;  %v5690_v1 = vld [vmem:[%s7757_s12 + $0xb0] sm:$0xff]   ;;  %v5347_v63 = vpop.f32.mrf.mxu0  ;;  %v1920_v2 = vadd.f32 %v5304_v57, %v4905_v52  ;;  %v4962_v52 = vld [vmem:[#allocation26] ss:$0 sm:$0xff] }
 0x49e   :  { %v1217_v4 = vpop.xlane.xlu1 %1216 }
 0x49f   :  { %v1226_v5 = vadd.f32 1e-05, %v1222_v3  ;;  %v1219_v7 = vmul.f32 0.010416667, %v1217_v4 }
 0x4a1   :  { %6024 = vrsqrt.f32 %v1226_v5  ;;  %v1223_v8 = vsub.f32 %v1219_v7, %v1221_v6  ;;  %v5348_v5 = vadd.f32 %v5347_v63, %v5346_v54 }
 0x4a3   :  { %v1227_v9 = vadd.f32 1e-05, %v1223_v8 }
 0x4a5   :  { %6026 = vrsqrt.f32 %v1227_v9 }
 0x4ae   :  { %v6025_v11 = vpop.eup %6024 }
 0x4af   :  { %v1230_v13 = vmul.f32 %v6025_v11, %v1224_v10 }
 0x4b1   :  { %v1239_v15 = vmul.f32 %v4890_v12, %v1230_v13 }
 0x4b2   :  { %v6027_v16 = vpop.eup %6026 }
 0x4b3   :  { %v1231_v18 = vmul.f32 %v6027_v16, %v1225_v14  ;;  %v1248_v20 = vadd.f32 %v4891_v17, %v1239_v15  ;;  %v5720_v14 = vld [vmem:[#allocation24 + $0x28] sm:$0xff]   ;;  %v5721_v15 = vld [vmem:[#allocation24 + $0x20] sm:$0xff]   ;;  %v5722_v16 = vld [vmem:[#allocation24 + $0x18] sm:$0xff]  }
 0x4b5   :  { %v1240_v19 = vmul.f32 %v4890_v12, %v1231_v18  ;;  %v1250_v22 = vmax.f32 %v1248_v20, 0.0  ;;  %v5724_v18 = vld [vmem:[#allocation24 + $0x8] sm:$0xff]  }
 0x4b7   :  { %v1249_v21 = vadd.f32 %v4891_v17, %v1240_v19  ;;  %v5723_v17 = vld [vmem:[#allocation24 + $0x10] sm:$0xff]   ;;  %v5725_v19 = vld [vmem:[#allocation24] sm:$0xff]  }
 0x4b9   :  { %v1251_v24 = vmax.f32 %v1249_v21, 0.0 }
 0x4bb   :  { %v1252_v26 = vpack.c.bf16 %v1251_v24, %v1250_v22 }
 0x4bd   :  { %4904 = vmatmul.mubr.msk.bf16.vlgmr.msra.gmra.mxu1 %vm1050_vm0, %v1252_v26 }
 0x4be   :  { %5306 = vmatpush3.bf16.msra.mxu1 %v5686_v60  ;;  %1955 = vmatprep.mubr.bf16.mxu1 %v5719_v25 }
 0x4bf   :  { %5307 = vmatprep.subr.bf16.mxu1 %v5688_v27 }
 0x4c2   :  { %5308 = vmatpush3.bf16.msra.mxu1 %v5690_v1 }
 0x4c3   :  { %5309 = vmatprep.subr.bf16.mxu1 %v5692_v28 }
 0x4c6   :  { %5310 = vmatpush3.bf16.msra.mxu1 %v5694_v29 }
 0x4c7   :  { %5311 = vmatprep.subr.bf16.mxu1 %v5696_v30 }
 0x4ca   :  { %5312 = vmatpush3.bf16.msra.mxu1 %v5698_v31 }
 0x4cb   :  { %5313 = vmatprep.subr.bf16.mxu1 %v5700_v32 }
 0x4ce   :  { %5314 = vmatpush3.bf16.msra.mxu1 %v5702_v33 }
 0x4cf   :  { %5315 = vmatprep.subr.bf16.mxu1 %v5704_v34 }
 0x4d2   :  { %5316 = vmatpush3.bf16.msra.mxu1 %v5706_v35  ;;  %v4960_v35 = vld [vmem:[#allocation21] ss:$0 sm:$0xff] }
 0x4d3   :  { %5317 = vmatprep.subr.bf16.mxu1 %v5708_v36 }
 0x4d6   :  { %5318 = vmatpush3.bf16.msra.mxu1 %v5710_v37 }
 0x4d7   :  { %5319 = vmatprep.subr.bf16.mxu1 %v5715_v38 }
 0x4da   :  { %5320 = vmatpush3.bf16.msra.mxu1 %v5716_v39 }
 0x4db   :  { %5452 = vmatprep.subr.bf16.mxu1 %v6690_v23 }
 0x4dd   :  { %1956 = vmatmul.mubr.bf16.vlgmr.msra.gmra.mxu1 %v5717_v40  ;;  %v4961_v40 = vld [vmem:[#allocation23] ss:$0 sm:$0xff] }
 0x4de   :  { %5464 = vmatprep.mubr.msk.bf16.mxu1 %vm6691_vm1, %v6690_v23  ;;  %5453 = vmatpush3.bf16.msra.mxu1 %v5720_v14  ;;  %v5741_v14 = vld [vmem:[%s7760_s15] ss:$8 sps:$4 sm:$0xff]  }
 0x4df   :  { %5454 = vmatprep.subr.bf16.mxu1 %v6690_v23 }
 0x4e2   :  { %5455 = vmatpush3.bf16.msra.mxu1 %v5721_v15 }
 0x4e3   :  { %5456 = vmatprep.subr.bf16.mxu1 %v6690_v23 }
 0x4e6   :  { %5457 = vmatpush3.bf16.msra.mxu1 %v5722_v16 }
 0x4e7   :  { %5458 = vmatprep.subr.bf16.mxu1 %v6690_v23 }
 0x4ea   :  { %5459 = vmatpush3.bf16.msra.mxu1 %v5723_v17 }
 0x4eb   :  { %5460 = vmatprep.subr.bf16.mxu1 %v6690_v23 }
 0x4ee   :  { %5461 = vmatpush3.bf16.msra.mxu1 %v5724_v18 }
 0x4ef   :  { %5462 = vmatprep.subr.bf16.mxu1 %v6690_v23 }
 0x4f2   :  { %5463 = vmatpush3.bf16.msra.mxu1 %v5725_v19 }
 0x57d   :  { %v7126_v43 = vpop.f32.mrf.mxu1 }
 0x57f   :  { %v7128_v45 = vpop.f32.mrf.mxu1 }
 0x581   :  { %v7130_v47 = vpop.f32.mrf.mxu1 }
 0x583   :  { %v7132_v49 = vpop.f32.mrf.mxu1 }
 0x59d   :  { %v5321_v53 = vpop.f32.mrf.mxu1 }
 0x59f   :  { %v5322_v55 = vpop.f32.mrf.mxu1 }
 0x5a0   :  { %v5323_v58 = vadd.f32 %v5322_v55, %v5321_v53 }
 0x5a1   :  { %v5324_v59 = vpop.f32.mrf.mxu1 }
 0x5a2   :  { %v1958_v62 = vadd.f32 %v5323_v58, %v1917_v56 }
 0x5a3   :  { %v5325_v0 = vpop.f32.mrf.mxu1 }
 0x5a4   :  { %v1999_v3 = vadd.f32 %v5345_v61, %v1958_v62  ;;  %v5326_v4 = vadd.f32 %v5325_v0, %v5324_v59 }
 0x5a6   :  { %v1961_v6 = vadd.f32 %v5326_v4, %v1920_v2  ;;  %v2005_v7 = vsel %vm1050_vm0, %v1999_v3, 0.0  ;;  %v2013_v8 = vmul.f32 %v1999_v3, %v1999_v3  ;;  %v5726_v4 = vld [vmem:[%s7760_s15 + $0x50] ss:$8 sps:$4 sm:$0xff]  }
 0x5a7   :  { %2006 = vadd.xlane.f32.xlu0 %v2005_v7  ;;  %v5734_v7 = vld [vmem:[%s7760_s15 + $0x34] ss:$8 sps:$4 sm:$0xff]  }
 0x5a8   :  { %v2002_v9 = vadd.f32 %v5348_v5, %v1961_v6  ;;  %v2015_v11 = vsel %vm1050_vm0, %v2013_v8, 0.0  ;;  %v5731_v5 = vld [vmem:[%s7760_s15 + $0x44] ss:$8 sps:$4 sm:$0xff]   ;;  %v5729_v6 = vld [vmem:[%s7760_s15 + $0x40] ss:$8 sps:$4 sm:$0xff]  }
 0x5a9   :  { %v5732_v8 = vld [vmem:[%s7760_s15 + $0x30] ss:$8 sps:$4 sm:$0xff]  }
 0x5aa   :  { %v2008_v10 = vsel %vm1050_vm0, %v2002_v9, 0.0  ;;  %v2014_v12 = vmul.f32 %v2002_v9, %v2002_v9 }
 0x5ab   :  { %2009 = vadd.xlane.f32.xlu1 %v2008_v10  ;;  %2016 = vadd.xlane.f32.xlu0 %v2015_v11  ;;  %v5735_v10 = vld [vmem:[%s7760_s15 + $0x20] ss:$8 sps:$4 sm:$0xff]   ;;  %v5738_v11 = vld [vmem:[%s7760_s15 + $0x10] ss:$8 sps:$4 sm:$0xff]  }
 0x5ac   :  { %v2018_v13 = vsel %vm1050_vm0, %v2014_v12, 0.0  ;;  %v5740_v12 = vld [vmem:[%s7760_s15 + $0x14] ss:$8 sps:$4 sm:$0xff]  }
 0x5af   :  { %2019 = vadd.xlane.f32.xlu1 %v2018_v13  ;;  %v5743_v13 = vld [vmem:[%s7760_s15 + $0x4] ss:$8 sps:$4 sm:$0xff]  }
 0x630   :  { %v2007_v20 = vpop.xlane.xlu0 %2006 }
 0x631   :  { %v2011_v21 = vmul.f32 0.010416667, %v2007_v20 }
 0x633   :  { %v2023_v60 = vmul.f32 %v2011_v21, %v2011_v21  ;;  %v2027_v33 = vsub.f32 %v1999_v3, %v2011_v21  ;;  %v5728_v3 = vld [vmem:[%s7760_s15 + $0x54] ss:$8 sps:$4 sm:$0xff]  }
 0x634   :  { %v2010_v22 = vpop.xlane.xlu1 %2009  ;;  %v2017_v24 = vpop.xlane.xlu0 %2016  ;;  %2297 = vmatprep.subr.bf16.mxu0 %v5728_v3 }
 0x635   :  { %v2012_v25 = vmul.f32 0.010416667, %v2010_v22  ;;  %v2021_v26 = vmul.f32 0.010416667, %v2017_v24  ;;  %2298 = vmatpush1.bf16.msra.mxu0 %v5726_v4 }
 0x636   :  { %2299 = vmatprep.subr.bf16.mxu0 %v5731_v5  ;;  %v1265_v5 = vld [vmem:[#allocation15] sm:$0x3] }
 0x637   :  { %v2025_v27 = vsub.f32 %v2021_v26, %v2023_v60  ;;  %v2024_v28 = vmul.f32 %v2012_v25, %v2012_v25  ;;  %v2028_v37 = vsub.f32 %v2002_v9, %v2012_v25  ;;  %v5737_v9 = vld [vmem:[%s7760_s15 + $0x24] ss:$8 sps:$4 sm:$0xff]  }
 0x638   :  { %v2020_v1 = vpop.xlane.xlu1 %2019 }
 0x639   :  { %v2029_v29 = vadd.f32 1e-05, %v2025_v27  ;;  %v2022_v30 = vmul.f32 0.010416667, %v2020_v1  ;;  %2300 = vmatpush1.bf16.msra.mxu0 %v5729_v6 }
 0x63a   :  { %2301 = vmatprep.subr.bf16.mxu0 %v5734_v7 }
 0x63b   :  { %6028 = vrsqrt.f32 %v2029_v29  ;;  %v2026_v31 = vsub.f32 %v2022_v30, %v2024_v28  ;;  %v4970_v30 = vld [vmem:[#allocation27] ss:$0 sm:$0xff] }
 0x63d   :  { %v2030_v32 = vadd.f32 1e-05, %v2026_v31  ;;  %2302 = vmatpush1.bf16.msra.mxu0 %v5732_v8 }
 0x63e   :  { %2303 = vmatprep.subr.bf16.mxu0 %v5737_v9 }
 0x63f   :  { %6030 = vrsqrt.f32 %v2030_v32 }
 0x641   :  { %2304 = vmatpush1.bf16.msra.mxu0 %v5735_v10 }
 0x642   :  { %2305 = vmatprep.subr.bf16.mxu0 %v5740_v12 }
 0x645   :  { %2306 = vmatpush1.bf16.msra.mxu0 %v5738_v11 }
 0x646   :  { %2307 = vmatprep.subr.bf16.mxu0 %v5743_v13 }
 0x648   :  { %v6029_v34 = vpop.eup %6028 }
 0x649   :  { %v2033_v36 = vmul.f32 %v6029_v34, %v2027_v33  ;;  %2308 = vmatpush1.bf16.msra.mxu0 %v5741_v14 }
 0x64b   :  { %v2042_v38 = vmul.f32 %v4960_v35, %v2033_v36 }
 0x64c   :  { %v6031_v39 = vpop.eup %6030 }
 0x64d   :  { %v2034_v41 = vmul.f32 %v6031_v39, %v2028_v37  ;;  %v2051_v44 = vadd.f32 %v4961_v40, %v2042_v38 }
 0x64f   :  { %v2043_v42 = vmul.f32 %v4960_v35, %v2034_v41  ;;  %v2053_v48 = vmax.f32 %v2051_v44, 0.0  ;;  %v4971_v35 = vld [vmem:[#allocation29] ss:$0 sm:$0xff]  ;;  %v5744_v44 = vld [vmem:[%s7761_s25 + $0x150] ss:$24 sps:$4 sm:$0xff]  }
 0x651   :  { %v2052_v46 = vadd.f32 %v4961_v40, %v2043_v42 }
 0x653   :  { %v2054_v50 = vmax.f32 %v2052_v46, 0.0  ;;  %v5746_v46 = vld [vmem:[%s7761_s25 + $0x154] ss:$24 sps:$4 sm:$0xff]  }
 0x654   :  { %2923 = vmatprep.subr.bf16.mxu1 %v5746_v46  ;;  %v5768_v46 = vld [vmem:[%s7761_s25 + $0x90] ss:$24 sps:$4 sm:$0xff]  }
 0x655   :  { %v2055_v51 = vpack.c.bf16 %v2054_v50, %v2053_v48  ;;  %v5747_v48 = vld [vmem:[%s7761_s25 + $0x158] ss:$24 sps:$4 sm:$0xff]   ;;  %v5749_v50 = vld [vmem:[%s7761_s25 + $0x15c] ss:$24 sps:$4 sm:$0xff]  }
 0x656   :  { %2966 = vmatprep.subr.bf16.mxu0 %v5749_v50  ;;  %v5776_v50 = vld [vmem:[%s7761_s25 + $0x64] ss:$24 sps:$4 sm:$0xff]  }
 0x657   :  { %5465 = vmatmul.mubr.msk.bf16.vlgmr.msra.gmra.mxu1 %vm1050_vm0, %v2055_v51  ;;  %v5752_v51 = vld [vmem:[%s7761_s25 + $0x124] ss:$24 sps:$4 sm:$0xff]  }
 0x658   :  { %2924 = vmatpush1.bf16.msra.mxu1 %v5744_v44  ;;  %v5773_v44 = vld [vmem:[%s7761_s25 + $0x9c] ss:$24 sps:$4 sm:$0xff]  }
 0x659   :  { %2925 = vmatprep.subr.bf16.mxu1 %v5752_v51  ;;  %v5779_v51 = vld [vmem:[%s7761_s25 + $0x6c] ss:$24 sps:$4 sm:$0xff]  }
 0x717   :  { %v2148_v53 = vpop.f32.mrf.mxu1 }
 0x718   :  { %v2149_v54 = vadd.f32 %v4962_v52, %v2148_v53  ;;  %v5750_v53 = vld [vmem:[%s7761_s25 + $0x120] ss:$24 sps:$4 sm:$0xff]  }
 0x719   :  { %v5466_v55 = vpop.f32.mrf.mxu1  ;;  %2926 = vmatpush1.bf16.msra.mxu1 %v5750_v53  ;;  %v5777_v53 = vld [vmem:[%s7761_s25 + $0x68] ss:$24 sps:$4 sm:$0xff]  }
 0x71a   :  { %v2155_v56 = vsel %vm1050_vm0, %v2149_v54, 0.0  ;;  %v2163_v57 = vmul.f32 %v2149_v54, %v2149_v54  ;;  %v5758_v55 = vld [vmem:[%s7761_s25 + $0xf4] ss:$24 sps:$4 sm:$0xff]  }
 0x71b   :  { %2156 = vadd.xlane.f32.xlu0 %v2155_v56  ;;  %v2151_v58 = vpop.f32.mrf.mxu1  ;;  %v5761_v56 = vld [vmem:[%s7761_s25 + $0xfc] ss:$24 sps:$4 sm:$0xff]   ;;  %2927 = vmatprep.subr.bf16.mxu1 %v5758_v55 }
 0x71c   :  { %v2152_v59 = vadd.f32 %v4962_v52, %v2151_v58  ;;  %v2165_v62 = vsel %vm1050_vm0, %v2163_v57, 0.0  ;;  %v5755_v52 = vld [vmem:[%s7761_s25 + $0x12c] ss:$24 sps:$4 sm:$0xff]   ;;  %v5756_v57 = vld [vmem:[%s7761_s25 + $0xf0] ss:$24 sps:$4 sm:$0xff]  }
 0x71d   :  { %v5467_v61 = vpop.f32.mrf.mxu1  ;;  %v5759_v58 = vld [vmem:[%s7761_s25 + $0xf8] ss:$24 sps:$4 sm:$0xff]   ;;  %2928 = vmatpush1.bf16.msra.mxu1 %v5756_v57  ;;  %v5785_v55 = vld [vmem:[%s7761_s25 + $0x3c] ss:$24 sps:$4 sm:$0xff]  }
 0x71e   :  { %v2158_v63 = vsel %vm1050_vm0, %v2152_v59, 0.0  ;;  %v2164_v0 = vmul.f32 %v2152_v59, %v2152_v59  ;;  %v5783_v57 = vld [vmem:[%s7761_s25 + $0x38] ss:$24 sps:$4 sm:$0xff]  }
 0x71f   :  { %2166 = vadd.xlane.f32.xlu0 %v2165_v62  ;;  %2159 = vadd.xlane.f32.xlu1 %v2158_v63  ;;  %v2218_v63 = vld [vmem:[#allocation30] sm:$0x3] }
 0x720   :  { %v2168_v2 = vsel %vm1050_vm0, %v2164_v0, 0.0 }
 0x723   :  { %2169 = vadd.xlane.f32.xlu1 %v2168_v2 }
 0x7a4   :  { %v2157_v15 = vpop.xlane.xlu0 %2156 }
 0x7a5   :  { %v2161_v16 = vmul.f32 0.010416667, %v2157_v15 }
 0x7a7   :  { %v2173_v19 = vmul.f32 %v2161_v16, %v2161_v16  ;;  %v2177_v28 = vsub.f32 %v2149_v54, %v2161_v16  ;;  %v5753_v54 = vld [vmem:[%s7761_s25 + $0x128] ss:$24 sps:$4 sm:$0xff]  }
 0x7a8   :  { %v2167_v17 = vpop.xlane.xlu0 %2166  ;;  %v2160_v18 = vpop.xlane.xlu1 %2159 }
 0x7a9   :  { %v2171_v20 = vmul.f32 0.010416667, %v2167_v17  ;;  %v2162_v21 = vmul.f32 0.010416667, %v2160_v18 }
 0x7ab   :  { %v2175_v22 = vsub.f32 %v2171_v20, %v2173_v19  ;;  %v2174_v25 = vmul.f32 %v2162_v21, %v2162_v21  ;;  %v2178_v32 = vsub.f32 %v2152_v59, %v2162_v21  ;;  %v1267_v59 = vlaneseq }
 0x7ac   :  { %v2170_v24 = vpop.xlane.xlu1 %2169 }
 0x7ad   :  { %v2179_v60 = vadd.f32 1e-05, %v2175_v22  ;;  %v2172_v26 = vmul.f32 0.010416667, %v2170_v24  ;;  %v7173_v61 = vshrl.u32 %v1267_v59, 7 }
 0x7ae   :  { %v5791_v59 = vld [vmem:[%s7761_s25 + $0xc] ss:$24 sps:$4 sm:$0xff]  }
 0x7af   :  { %6032 = vrsqrt.f32 %v2179_v60  ;;  %v2176_v27 = vsub.f32 %v2172_v26, %v2174_v25  ;;  %v7176_v62 = vsub.s32 1, %v7173_v61  ;;  %v7179_v0 = vsub.s32 0, %v7173_v61 }
 0x7b1   :  { %v2180_v1 = vadd.f32 1e-05, %v2176_v27  ;;  %v2227_v2 = vrot.slane %v2218_v63, %v7176_v62  ;;  %v2223_v3 = vrot.slane %v2218_v63, %v7179_v0  ;;  %v1274_v7 = vrot.slane %v1265_v5, %v7176_v62  ;;  %v5786_v63 = vld [vmem:[%s7761_s25] ss:$24 sps:$4 sm:$0xff]  }
 0x7b2   :  { %v1270_v18 = vrot.slane %v1265_v5, %v7179_v0  ;;  %v5792_v5 = vld [vmem:[%s7761_s25 + $0x210] ss:$24 sps:$4 sm:$0xff]  }
 0x7b3   :  { %6034 = vrsqrt.f32 %v2180_v1  ;;  %v7194_v15 = vadd.f32 %v7128_v45, %v1274_v7  ;;  %v7210_v60 = vadd.f32 %v7132_v49, %v1274_v7  ;;  %v5800_v7 = vld [vmem:[%s7761_s25 + $0x1e4] ss:$24 sps:$4 sm:$0xff]  }
 0x7b4   :  { %v7218_v1 = vadd.f32 %v7126_v43, %v1270_v18 }
 0x7b5   :  { %v1384_v26 = vsel %vm1383_vm2, %v7194_v15, 0.0  ;;  %v1396_v27 = vmul.f32 %v7194_v15, %v7194_v15  ;;  %v1398_v43 = vmul.f32 %v7210_v60, %v7210_v60 }
 0x7bc   :  { %v6033_v29 = vpop.eup %6032 }
 0x7bd   :  { %v2183_v31 = vmul.f32 %v6033_v29, %v2177_v28  ;;  %v1385_v29 = vadd.f32 %v1384_v26, %v7218_v1 }
 0x7bf   :  { %v2192_v33 = vmul.f32 %v4970_v30, %v2183_v31  ;;  %v1399_v31 = vsel %vm1383_vm2, %v1396_v27, 0.0 }
 0x7c0   :  { %v6035_v34 = vpop.eup %6034 }
 0x7c1   :  { %v2184_v36 = vmul.f32 %v6035_v34, %v2178_v32  ;;  %v2201_v38 = vadd.f32 %v4971_v35, %v2192_v33  ;;  %v7229_v32 = vadd.f32 %v7130_v47, %v1270_v18  ;;  %v1395_v33 = vmul.f32 %v7218_v1, %v7218_v1  ;;  %v5807_v18 = vld [vmem:[%s7761_s25 + $0x1b8] ss:$24 sps:$4 sm:$0xff]  }
 0x7c3   :  { %v2193_v37 = vmul.f32 %v4970_v30, %v2184_v36  ;;  %v2203_v40 = vmax.f32 %v2201_v38, 0.0  ;;  %v1388_v30 = vsel %vm1383_vm2, %v7210_v60, 0.0  ;;  %v5764_v36 = vld [vmem:[%s7761_s25 + $0xc4] ss:$24 sps:$4 sm:$0xff]   ;;  %v1403_v38 = vsel %vm1383_vm2, %v1398_v43, 0.0 }
 0x7c4   :  { %v1389_v34 = vadd.f32 %v1388_v30, %v7229_v32  ;;  %v1397_v47 = vmul.f32 %v7229_v32, %v7229_v32  ;;  %2929 = vmatprep.subr.bf16.mxu1 %v5764_v36 }
 0x7c5   :  { %v2202_v39 = vadd.f32 %v4971_v35, %v2193_v37  ;;  %v1400_v35 = vadd.f32 %v1399_v31, %v1395_v33  ;;  %v5767_v37 = vld [vmem:[%s7761_s25 + $0xcc] ss:$24 sps:$4 sm:$0xff]  }
 0x7c7   :  { %v2204_v41 = vmax.f32 %v2202_v39, 0.0  ;;  %v5762_v39 = vld [vmem:[%s7761_s25 + $0xc0] ss:$24 sps:$4 sm:$0xff]  }
 0x7c8   :  { %2930 = vmatpush1.bf16.msra.mxu1 %v5762_v39  ;;  %v504_v39 = vld [vmem:[%s7763_s22] sm:$0xff] }
 0x7c9   :  { %v2205_v42 = vpack.c.bf16 %v2204_v41, %v2203_v40  ;;  %v5765_v40 = vld [vmem:[%s7761_s25 + $0xc8] ss:$24 sps:$4 sm:$0xff]   ;;  %v1404_v41 = vadd.f32 %v1403_v38, %v1397_v47 }
 0x7cb   :  { %4984 = vmatmul.mubr.msk.bf16.vlgmr.msra.gmra.mxu0 %vm1050_vm0, %v2205_v42  ;;  %v5770_v42 = vld [vmem:[%s7761_s25 + $0x94] ss:$24 sps:$4 sm:$0xff]  }
 0x7cc   :  { %2967 = vmatpush1.bf16.msra.mxu0 %v5747_v48  ;;  %v5771_v48 = vld [vmem:[%s7761_s25 + $0x98] ss:$24 sps:$4 sm:$0xff]   ;;  %2931 = vmatprep.subr.bf16.mxu1 %v5770_v42 }
 0x7cd   :  { %2968 = vmatprep.subr.bf16.mxu0 %v5755_v52  ;;  %2932 = vmatpush1.bf16.msra.mxu1 %v5768_v46  ;;  %v5774_v52 = vld [vmem:[%s7761_s25 + $0x60] ss:$24 sps:$4 sm:$0xff]  }
 0x7ce   :  { %2933 = vmatprep.subr.bf16.mxu1 %v5776_v50 }
 0x7d0   :  { %2969 = vmatpush1.bf16.msra.mxu0 %v5753_v54  ;;  %v5782_v54 = vld [vmem:[%s7761_s25 + $0x34] ss:$24 sps:$4 sm:$0xff]  }
 0x7d1   :  { %2970 = vmatprep.subr.bf16.mxu0 %v5761_v56  ;;  %2934 = vmatpush1.bf16.msra.mxu1 %v5774_v52  ;;  %v5780_v56 = vld [vmem:[%s7761_s25 + $0x30] ss:$24 sps:$4 sm:$0xff]  }
 0x7d2   :  { %2935 = vmatprep.subr.bf16.mxu1 %v5782_v54 }
 0x7d4   :  { %2971 = vmatpush1.bf16.msra.mxu0 %v5759_v58  ;;  %v5788_v58 = vld [vmem:[%s7761_s25 + $0x4] ss:$24 sps:$4 sm:$0xff]  }
 0x7d5   :  { %2972 = vmatprep.subr.bf16.mxu0 %v5767_v37  ;;  %2936 = vmatpush1.bf16.msra.mxu1 %v5780_v56 }
 0x7d6   :  { %2937 = vmatprep.subr.bf16.mxu1 %v5788_v58 }
 0x7d8   :  { %2973 = vmatpush1.bf16.msra.mxu0 %v5765_v40  ;;  %v505_v40 = vld [vmem:[%s7763_s22 + $0x8] sm:$0xff] }
 0x7d9   :  { %2974 = vmatprep.subr.bf16.mxu0 %v5773_v44  ;;  %2938 = vmatpush1.bf16.msra.mxu1 %v5786_v63 }
 0x7dc   :  { %2975 = vmatpush1.bf16.msra.mxu0 %v5771_v48 }
 0x7dd   :  { %2976 = vmatprep.subr.bf16.mxu0 %v5779_v51 }
 0x7e0   :  { %2977 = vmatpush1.bf16.msra.mxu0 %v5777_v53 }
 0x7e1   :  { %2978 = vmatprep.subr.bf16.mxu0 %v5785_v55 }
 0x7e4   :  { %2979 = vmatpush1.bf16.msra.mxu0 %v5783_v57  ;;  %v2376_v57 = vld [vmem:[#allocation32] sm:$0x3] }
 0x7e5   :  { %2980 = vmatprep.subr.bf16.mxu0 %v5791_v59  ;;  %v2385_v59 = vrot.slane %v2376_v57, %v7176_v62 }
 0x88b   :  { %v2327_v4 = vpop.f32.mrf.mxu0 }
 0x88c   :  { %v7186_v9 = vadd.f32 %v2327_v4, %v2223_v3  ;;  %v5797_v4 = vld [vmem:[%s7761_s25 + $0x21c] ss:$24 sps:$4 sm:$0xff]  }
 0x88d   :  { %v2329_v6 = vpop.f32.mrf.mxu0 }
 0x88e   :  { %v7184_v8 = vadd.f32 %v2329_v6, %v2227_v2  ;;  %v2346_v20 = vmul.f32 %v7186_v9, %v7186_v9  ;;  %v5795_v6 = vld [vmem:[%s7761_s25 + $0x218] ss:$24 sps:$4 sm:$0xff]  }
 0x88f   :  { %v2331_v10 = vpop.f32.mrf.mxu0 }
 0x890   :  { %v2336_v11 = vsel %vm1383_vm2, %v7184_v8, 0.0  ;;  %v2347_v12 = vmul.f32 %v7184_v8, %v7184_v8  ;;  %v7200_v19 = vadd.f32 %v2331_v10, %v2223_v3  ;;  %v5794_v3 = vld [vmem:[%s7761_s25 + $0x214] ss:$24 sps:$4 sm:$0xff]  }
 0x891   :  { %v2333_v13 = vpop.f32.mrf.mxu0  ;;  %v2337_v14 = vadd.f32 %v2336_v11, %v7186_v9  ;;  %2947 = vmatprep.subr.bf16.mxu1 %v5794_v3  ;;  %v5803_v10 = vld [vmem:[%s7761_s25 + $0x1ec] ss:$24 sps:$4 sm:$0xff]   ;;  %v5798_v11 = vld [vmem:[%s7761_s25 + $0x1e0] ss:$24 sps:$4 sm:$0xff]  }
 0x892   :  { %v7196_v16 = vadd.f32 %v2333_v13, %v2227_v2  ;;  %v2350_v17 = vsel %vm1383_vm2, %v2347_v12, 0.0  ;;  %v2348_v49 = vmul.f32 %v7200_v19, %v7200_v19  ;;  %v5789_v2 = vld [vmem:[%s7761_s25 + $0x8] ss:$24 sps:$4 sm:$0xff]   ;;  %2948 = vmatpush2.bf16.msra.mxu1 %v5792_v5  ;;  %v5806_v13 = vld [vmem:[%s7761_s25 + $0x1b4] ss:$24 sps:$4 sm:$0xff]  }
 0x893   :  { %2338 = vadd.xlane.f32.xlu0 %v2337_v14  ;;  %v2351_v24 = vadd.f32 %v2350_v17, %v2346_v20  ;;  %2981 = vmatpush1.bf16.msra.mxu0 %v5789_v2  ;;  %v5801_v12 = vld [vmem:[%s7761_s25 + $0x1e8] ss:$24 sps:$4 sm:$0xff]   ;;  %v5809_v14 = vld [vmem:[%s7761_s25 + $0x1bc] ss:$24 sps:$4 sm:$0xff]  }
 0x894   :  { %v2340_v21 = vsel %vm1383_vm2, %v7196_v16, 0.0  ;;  %v2349_v22 = vmul.f32 %v7196_v16, %v7196_v16  ;;  %2990 = vmatprep.subr.bf16.mxu0 %v5797_v4  ;;  %2949 = vmatprep.subr.bf16.mxu1 %v5800_v7  ;;  %v5804_v17 = vld [vmem:[%s7761_s25 + $0x1b0] ss:$24 sps:$4 sm:$0xff]   ;;  %v5812_v20 = vld [vmem:[%s7761_s25 + $0x184] ss:$24 sps:$4 sm:$0xff]   ;;  %v2381_v4 = vrot.slane %v2376_v57, %v7179_v0 }
 0x895   :  { %v2341_v45 = vadd.f32 %v2340_v21, %v7200_v19  ;;  %v5815_v21 = vld [vmem:[%s7761_s25 + $0x18c] ss:$24 sps:$4 sm:$0xff]   ;;  %v5831_v57 = vld [vmem:[%s7762_s18 + $0xf0] ss:$24 sps:$4 sm:$0xff]  }
 0x896   :  { %v2354_v25 = vsel %vm1383_vm2, %v2349_v22, 0.0  ;;  %2950 = vmatpush2.bf16.msra.mxu1 %v5798_v11  ;;  %v5810_v22 = vld [vmem:[%s7761_s25 + $0x180] ss:$24 sps:$4 sm:$0xff]  }
 0x897   :  { %2342 = vadd.xlane.f32.xlu1 %v2341_v45  ;;  %2352 = vadd.xlane.f32.xlu0 %v2351_v24  ;;  %v2355_v28 = vadd.f32 %v2354_v25, %v2348_v49  ;;  %v5813_v45 = vld [vmem:[%s7761_s25 + $0x188] ss:$24 sps:$4 sm:$0xff]   ;;  %v5818_v24 = vld [vmem:[%s7761_s25 + $0x164] ss:$24 sps:$4 sm:$0xff]   ;;  %v5821_v25 = vld [vmem:[%s7762_s18 + $0x154] ss:$24 sps:$4 sm:$0xff]  }
 0x898   :  { %2991 = vmatpush2.bf16.msra.mxu0 %v5795_v6  ;;  %2951 = vmatprep.subr.bf16.mxu1 %v5806_v13  ;;  %v2392_v3 = vld [vmem:[#allocation33] sm:$0x3] }
 0x899   :  { %2992 = vmatprep.subr.bf16.mxu0 %v5803_v10  ;;  %v2401_v10 = vrot.slane %v2392_v3, %v7176_v62  ;;  %v2397_v11 = vrot.slane %v2392_v3, %v7179_v0  ;;  %v5837_v3 = vld [vmem:[%s7762_s18 + $0xc0] ss:$24 sps:$4 sm:$0xff]  }
 0x89a   :  { %2952 = vmatpush2.bf16.msra.mxu1 %v5804_v17 }
 0x89b   :  { %2356 = vadd.xlane.f32.xlu1 %v2355_v28  ;;  %1386 = vadd.xlane.f32.xlu0 %v1385_v29 }
 0x89c   :  { %2993 = vmatpush2.bf16.msra.mxu0 %v5801_v12  ;;  %2953 = vmatprep.subr.bf16.mxu1 %v5812_v20 }
 0x89d   :  { %2994 = vmatprep.subr.bf16.mxu0 %v5809_v14 }
 0x89e   :  { %2954 = vmatpush2.bf16.msra.mxu1 %v5810_v22 }
 0x89f   :  { %1390 = vadd.xlane.f32.xlu1 %v1389_v34  ;;  %1401 = vadd.xlane.f32.xlu0 %v1400_v35 }
 0x8a0   :  { %2995 = vmatpush2.bf16.msra.mxu0 %v5807_v18  ;;  %3009 = vmatprep.subr.bf16.mxu1 %v5818_v24 }
 0x8a1   :  { %2996 = vmatprep.subr.bf16.mxu0 %v5815_v21 }
 0x8a3   :  { %1405 = vadd.xlane.f32.xlu1 %v1404_v41 }
 0x8a4   :  { %2997 = vmatpush2.bf16.msra.mxu0 %v5813_v45 }
 0x8a5   :  { %3415 = vmatprep.subr.bf16.mxu0 %v5821_v25 }
 0x8b4   :  { %3552 = vperm.xlu1 %5581, %v505_v40  }
 0x8b5   :  { %3547 = vperm.xlu0 %5580, %v504_v39   ;;  %v5819_v39 = vld [vmem:[%s7762_s18 + $0x150] ss:$24 sps:$4 sm:$0xff]  }
 0x91c   :  { %v2339_v26 = vpop.xlane.xlu0 %2338 }
 0x91d   :  { %v2344_v27 = vmul.f32 0.0052083335, %v2339_v26 }
 0x91f   :  { %v2360_v30 = vmul.f32 %v2344_v27, %v2344_v27  ;;  %v2364_v63 = vsub.f32 %v7186_v9, %v2344_v27  ;;  %v2365_v2 = vsub.f32 %v7184_v8, %v2344_v27  ;;  %v7293_v9 = vld [vmem:[#allocation17] sm:$0x3] }
 0x920   :  { %v2343_v49 = vpop.xlane.xlu1 %2342  ;;  %v2353_v28 = vpop.xlane.xlu0 %2352  ;;  %v1434_v22 = vrot.slane %v7293_v9, %v7176_v62 }
 0x921   :  { %v2345_v29 = vmul.f32 0.0052083335, %v2343_v49  ;;  %v2358_v31 = vmul.f32 0.0052083335, %v2353_v28 }
 0x923   :  { %v2362_v43 = vsub.f32 %v2358_v31, %v2360_v30  ;;  %v2361_v36 = vmul.f32 %v2345_v29, %v2345_v29  ;;  %v2366_v12 = vsub.f32 %v7200_v19, %v2345_v29  ;;  %v2367_v13 = vsub.f32 %v7196_v16, %v2345_v29  ;;  %v7299_v16 = vld [vmem:[#allocation18] sm:$0x3] }
 0x924   :  { %v2357_v33 = vpop.xlane.xlu1 %2356  ;;  %v1387_v34 = vpop.xlane.xlu0 %1386 }
 0x925   :  { %v2368_v35 = vadd.f32 1e-05, %v2362_v43  ;;  %v2359_v37 = vmul.f32 0.0052083335, %v2357_v33  ;;  %v7275_v38 = vmul.f32 0.0052083335, %v1387_v34 }
 0x927   :  { %6036 = vrsqrt.f32 %v2368_v35  ;;  %v2363_v47 = vsub.f32 %v2359_v37, %v2361_v36  ;;  %v1409_v48 = vmul.f32 %v7275_v38, %v7275_v38  ;;  %v1414_v45 = vsub.f32 %v7194_v15, %v7275_v38  ;;  %v5816_v37 = vld [vmem:[%s7761_s25 + $0x160] ss:$24 sps:$4 sm:$0xff]  }
 0x928   :  { %v1391_v41 = vpop.xlane.xlu1 %1390  ;;  %v1402_v42 = vpop.xlane.xlu0 %1401  ;;  %v1450_v15 = vrot.slane %v7299_v16, %v7176_v62 }
 0x929   :  { %v2369_v44 = vadd.f32 1e-05, %v2363_v47  ;;  %v7279_v46 = vmul.f32 0.0052083335, %v1391_v41  ;;  %v1407_v50 = vmul.f32 0.0052083335, %v1402_v42 }
 0x92a   :  { %v5824_v47 = vld [vmem:[%s7761_s25 + $0x134] ss:$24 sps:$4 sm:$0xff]   ;;  %v5827_v41 = vld [vmem:[%s7762_s18 + $0x124] ss:$24 sps:$4 sm:$0xff]  }
 0x92b   :  { %6038 = vrsqrt.f32 %v2369_v44  ;;  %v1411_v51 = vsub.f32 %v1407_v50, %v1409_v48  ;;  %v1410_v54 = vmul.f32 %v7279_v46, %v7279_v46  ;;  %v1416_v29 = vsub.f32 %v7210_v60, %v7279_v46  ;;  %v5822_v48 = vld [vmem:[%s7761_s25 + $0x130] ss:$24 sps:$4 sm:$0xff]   ;;  %v5825_v50 = vld [vmem:[%s7762_s18 + $0x120] ss:$24 sps:$4 sm:$0xff]  }
 0x92c   :  { %v1406_v52 = vpop.xlane.xlu1 %1405 }
 0x92d   :  { %v1417_v53 = vadd.f32 1e-05, %v1411_v51  ;;  %v1408_v55 = vmul.f32 0.0052083335, %v1406_v52  ;;  %v5830_v52 = vld [vmem:[%s7761_s25 + $0x104] ss:$24 sps:$4 sm:$0xff]  }
 0x92f   :  { %6040 = vrsqrt.f32 %v1417_v53  ;;  %v1412_v56 = vsub.f32 %v1408_v55, %v1410_v54  ;;  %v5833_v53 = vld [vmem:[%s7762_s18 + $0xf4] ss:$24 sps:$4 sm:$0xff]  }
 0x931   :  { %v1418_v58 = vadd.f32 1e-05, %v1412_v56  ;;  %v5828_v56 = vld [vmem:[%s7761_s25 + $0x100] ss:$24 sps:$4 sm:$0xff]  }
 0x933   :  { %6042 = vrsqrt.f32 %v1418_v58 }
 0x934   :  { %v6037_v5 = vpop.eup %6036 }
 0x935   :  { %v2373_v6 = vmul.f32 %v6037_v5, %v2365_v2  ;;  %v2372_v7 = vmul.f32 %v6037_v5, %v2364_v63  ;;  %v5839_v63 = vld [vmem:[%s7762_s18 + $0xc4] ss:$24 sps:$4 sm:$0xff]   ;;  %v5834_v2 = vld [vmem:[%s7761_s25 + $0xd0] ss:$24 sps:$4 sm:$0xff]   ;;  %v5845_v5 = vld [vmem:[%s7762_s18 + $0x94] ss:$24 sps:$4 sm:$0xff]  }
 0x937   :  { %v2389_v14 = vmul.f32 %v2385_v59, %v2373_v6  ;;  %v2388_v17 = vmul.f32 %v2381_v4, %v2372_v7  ;;  %v5840_v6 = vld [vmem:[%s7761_s25 + $0xa0] ss:$24 sps:$4 sm:$0xff]   ;;  %v5843_v7 = vld [vmem:[%s7762_s18 + $0x90] ss:$24 sps:$4 sm:$0xff]  }
 0x938   :  { %v6039_v8 = vpop.eup %6038 }
 0x939   :  { %v2375_v18 = vmul.f32 %v6039_v8, %v2367_v13  ;;  %v2374_v20 = vmul.f32 %v6039_v8, %v2366_v12  ;;  %v2405_v21 = vadd.f32 %v2401_v10, %v2389_v14  ;;  %v2404_v19 = vadd.f32 %v2397_v11, %v2388_v17  ;;  %v5846_v12 = vld [vmem:[%s7761_s25 + $0x70] ss:$24 sps:$4 sm:$0xff]   ;;  %v5849_v13 = vld [vmem:[%s7762_s18 + $0x60] ss:$24 sps:$4 sm:$0xff]   ;;  %v5854_v14 = vld [vmem:[%s7761_s25 + $0x44] ss:$24 sps:$4 sm:$0xff]  }
 0x93a   :  { %v5857_v17 = vld [vmem:[%s7762_s18 + $0x34] ss:$24 sps:$4 sm:$0xff]   ;;  %v5852_v8 = vld [vmem:[%s7761_s25 + $0x40] ss:$24 sps:$4 sm:$0xff]  }
 0x93b   :  { %v2391_v24 = vmul.f32 %v2385_v59, %v2375_v18  ;;  %v2390_v25 = vmul.f32 %v2381_v4, %v2374_v20  ;;  %v2409_v30 = vmax.f32 %v2405_v21, 0.0  ;;  %v2408_v43 = vmax.f32 %v2404_v19, 0.0  ;;  %v5836_v59 = vld [vmem:[%s7761_s25 + $0xd4] ss:$24 sps:$4 sm:$0xff]   ;;  %v5842_v4 = vld [vmem:[%s7761_s25 + $0xa4] ss:$24 sps:$4 sm:$0xff]  }
 0x93c   :  { %v7301_v26 = vpop.eup %6040  ;;  %v5855_v18 = vld [vmem:[%s7762_s18 + $0x30] ss:$24 sps:$4 sm:$0xff]   ;;  %v5860_v20 = vld [vmem:[%s7761_s25 + $0x14] ss:$24 sps:$4 sm:$0xff]   ;;  %v5863_v21 = vld [vmem:[%s7762_s18 + $0x4] ss:$24 sps:$4 sm:$0xff]   ;;  %v1415_v19 = vsub.f32 %v7229_v32, %v7279_v46  ;;  %v1430_v32 = vrot.slane %v7293_v9, %v7179_v0 }
 0x93d   :  { %v2407_v27 = vadd.f32 %v2401_v10, %v2391_v24  ;;  %v2406_v49 = vadd.f32 %v2397_v11, %v2390_v25  ;;  %v1422_v28 = vmul.f32 %v7301_v26, %v1414_v45  ;;  %v5848_v10 = vld [vmem:[%s7761_s25 + $0x74] ss:$24 sps:$4 sm:$0xff]   ;;  %v5851_v11 = vld [vmem:[%s7762_s18 + $0x64] ss:$24 sps:$4 sm:$0xff]   ;;  %v5861_v45 = vld [vmem:[%s7762_s18] ss:$24 sps:$4 sm:$0xff]  }
 0x93e   :  { %v5866_v24 = vld [vmem:[%s7761_s25 + $0x224] ss:$24 sps:$4 sm:$0xff]   ;;  %v5869_v25 = vld [vmem:[%s7762_s18 + $0x214] ss:$24 sps:$4 sm:$0xff]   ;;  %v5870_v46 = vld [vmem:[%s7761_s25 + $0x1f0] ss:$24 sps:$4 sm:$0xff]  }
 0x93f   :  { %v2411_v31 = vmax.f32 %v2407_v27, 0.0  ;;  %v2410_v33 = vmax.f32 %v2406_v49, 0.0  ;;  %v1438_v34 = vmul.f32 %v1434_v22, %v1422_v28  ;;  %v5864_v27 = vld [vmem:[%s7761_s25 + $0x220] ss:$24 sps:$4 sm:$0xff]   ;;  %v5867_v49 = vld [vmem:[%s7762_s18 + $0x210] ss:$24 sps:$4 sm:$0xff]   ;;  %v1413_v28 = vsub.f32 %v7218_v1, %v7275_v38 }
 0x940   :  { %v7308_v35 = vpop.eup %6042  ;;  %v5878_v1 = vld [vmem:[%s7761_s25 + $0x1c4] ss:$24 sps:$4 sm:$0xff]   ;;  %v5881_v38 = vld [vmem:[%s7762_s18 + $0x1b4] ss:$24 sps:$4 sm:$0xff]   ;;  %v5876_v9 = vld [vmem:[%s7761_s25 + $0x1c0] ss:$24 sps:$4 sm:$0xff]  }
 0x941   :  { %v2487_v36 = vpack.c.bf16 %v2411_v31, %v2409_v30  ;;  %v7312_v40 = vpack.c.bf16 %v2410_v33, %v2408_v43  ;;  %v1424_v60 = vmul.f32 %v7308_v35, %v1416_v29  ;;  %v1454_v44 = vadd.f32 %v1450_v15, %v1438_v34  ;;  %v5872_v29 = vld [vmem:[%s7761_s25 + $0x1f4] ss:$24 sps:$4 sm:$0xff]   ;;  %v5875_v30 = vld [vmem:[%s7762_s18 + $0x1e4] ss:$24 sps:$4 sm:$0xff]   ;;  %v5873_v43 = vld [vmem:[%s7762_s18 + $0x1e0] ss:$24 sps:$4 sm:$0xff]  }
 0x942   :  { %v1421_v31 = vmul.f32 %v7301_v26, %v1413_v28  ;;  %v1446_v26 = vrot.slane %v7299_v16, %v7179_v0  ;;  %v5885_v16 = vld [vmem:[%s7762_s18 + $0x180] ss:$24 sps:$4 sm:$0xff]   ;;  %v5944_v28 = vld [vmem:[%s7762_s18 + $0x1ec] ss:$24 sps:$4 sm:$0xff]  }
 0x943   :  { %5057 = vmatprep.mubr.msk.bf16.mxu1 %vm1383_vm2, %v2487_v36  ;;  %5058 = vmatprep.mubr.msk.bf16.mxu0 %vm1383_vm2, %v2487_v36  ;;  %v1440_v42 = vmul.f32 %v1434_v22, %v1424_v60  ;;  %v1458_v54 = vmax.f32 %v1454_v44, 0.0  ;;  %v5858_v22 = vld [vmem:[%s7761_s25 + $0x10] ss:$24 sps:$4 sm:$0xff]   ;;  %v5893_v44 = vld [vmem:[%s7762_s18 + $0x164] ss:$24 sps:$4 sm:$0xff]  }
 0x944   :  { %2956 = vmatmul.mubr.bf16.vlgmr.msra.gmra.mxu1 %v7312_v40  ;;  %2999 = vmatmul.mubr.bf16.vlgmr.msra.gmra.mxu0 %v7312_v40  ;;  %v1437_v34 = vmul.f32 %v1430_v32, %v1421_v31  ;;  %v5950_v31 = vld [vmem:[%s7762_s18 + $0x1bc] ss:$24 sps:$4 sm:$0xff]  }
 0x945   :  { %3010 = vmatpush1.bf16.msra.mxu1 %v5816_v37  ;;  %3416 = vmatpush1.bf16.msra.mxu0 %v5819_v39  ;;  %v1456_v51 = vadd.f32 %v1450_v15, %v1440_v42  ;;  %v1423_v15 = vmul.f32 %v7308_v35, %v1415_v19  ;;  %v5879_v35 = vld [vmem:[%s7762_s18 + $0x1b0] ss:$24 sps:$4 sm:$0xff]   ;;  %v5887_v37 = vld [vmem:[%s7762_s18 + $0x184] ss:$24 sps:$4 sm:$0xff]  }
 0x946   :  { %5059 = vmatprep.mubr.msk.bf16.mxu1 %vm1383_vm2, %v2487_v36  ;;  %3011 = vmatprep.subr.bf16.mxu1 %v5824_v47  ;;  %v5884_v36 = vld [vmem:[%s7761_s25 + $0x194] ss:$24 sps:$4 sm:$0xff]   ;;  %v1453_v60 = vadd.f32 %v1446_v26, %v1437_v34  ;;  %v5882_v47 = vld [vmem:[%s7761_s25 + $0x190] ss:$24 sps:$4 sm:$0xff]   ;;  %v5941_v19 = vld [vmem:[%s7762_s18 + $0x224] ss:$24 sps:$4 sm:$0xff]  }
 0x947   :  { %3417 = vmatprep.subr.bf16.mxu0 %v5827_v41  ;;  %v1460_v55 = vmax.f32 %v1456_v51, 0.0  ;;  %v1439_v33 = vmul.f32 %v1430_v32, %v1423_v15  ;;  %v5890_v42 = vld [vmem:[%s7762_s18 + $0x15c] ss:$24 sps:$4 sm:$0xff]   ;;  %v5945_v15 = vld [vmem:[%s7762_s18 + $0x1f0] ss:$24 sps:$4 sm:$0xff]  }
 0x948   :  { %v5953_v32 = vld [vmem:[%s7762_s18 + $0x1c4] ss:$24 sps:$4 sm:$0xff]   ;;  %v5957_v34 = vld [vmem:[%s7762_s18 + $0x190] ss:$24 sps:$4 sm:$0xff]  }
 0x949   :  { %3012 = vmatpush1.bf16.msra.mxu1 %v5822_v48  ;;  %3418 = vmatpush1.bf16.msra.mxu0 %v5825_v50  ;;  %v7328_v58 = vpack.c.bf16 %v1460_v55, %v1458_v54  ;;  %v1455_v39 = vadd.f32 %v1446_v26, %v1439_v33  ;;  %v1457_v48 = vmax.f32 %v1453_v60, 0.0  ;;  %v5888_v50 = vld [vmem:[%s7762_s18 + $0x158] ss:$24 sps:$4 sm:$0xff]   ;;  %v5899_v54 = vld [vmem:[%s7762_s18 + $0x134] ss:$24 sps:$4 sm:$0xff]  }
 0x94a   :  { %3013 = vmatprep.subr.bf16.mxu1 %v5830_v52  ;;  %3419 = vmatprep.subr.bf16.mxu0 %v5833_v53  ;;  %v5891_v52 = vld [vmem:[%s7762_s18 + $0x160] ss:$24 sps:$4 sm:$0xff]   ;;  %v5896_v53 = vld [vmem:[%s7762_s18 + $0x12c] ss:$24 sps:$4 sm:$0xff]  }
 0x94b   :  { %5132 = vmatprep.mubr.msk.bf16.mxu0 %vm1383_vm2, %v7328_v58  ;;  %v1459_v41 = vmax.f32 %v1455_v39, 0.0  ;;  %v5894_v55 = vld [vmem:[%s7762_s18 + $0x128] ss:$24 sps:$4 sm:$0xff]  }
 0x94c   :  { %v5954_v33 = vld [vmem:[%s7762_s18 + $0x188] ss:$24 sps:$4 sm:$0xff]  }
 0x94d   :  { %3014 = vmatpush1.bf16.msra.mxu1 %v5828_v56  ;;  %3420 = vmatpush1.bf16.msra.mxu0 %v5831_v57  ;;  %v7381_v51 = vpack.c.bf16 %v1459_v41, %v1457_v48  ;;  %v5897_v56 = vld [vmem:[%s7762_s18 + $0x130] ss:$24 sps:$4 sm:$0xff]   ;;  %v5902_v57 = vld [vmem:[%s7762_s18 + $0xfc] ss:$24 sps:$4 sm:$0xff]  }
 0x94e   :  { %3015 = vmatprep.subr.bf16.mxu1 %v5836_v59  ;;  %3421 = vmatprep.subr.bf16.mxu0 %v5839_v63  ;;  %v5900_v59 = vld [vmem:[%s7762_s18 + $0xf8] ss:$24 sps:$4 sm:$0xff]  }
 0x94f   :  { %v5903_v63 = vld [vmem:[%s7762_s18 + $0x100] ss:$24 sps:$4 sm:$0xff]  }
 0x951   :  { %3016 = vmatpush1.bf16.msra.mxu1 %v5834_v2  ;;  %3422 = vmatpush1.bf16.msra.mxu0 %v5837_v3  ;;  %v5908_v2 = vld [vmem:[%s7762_s18 + $0xcc] ss:$24 sps:$4 sm:$0xff]  }
 0x952   :  { %3017 = vmatprep.subr.bf16.mxu1 %v5842_v4  ;;  %3423 = vmatprep.subr.bf16.mxu0 %v5845_v5  ;;  %v5911_v3 = vld [vmem:[%s7762_s18 + $0xd4] ss:$24 sps:$4 sm:$0xff]   ;;  %v5909_v4 = vld [vmem:[%s7762_s18 + $0xd0] ss:$24 sps:$4 sm:$0xff]  }
 0x953   :  { %v5914_v5 = vld [vmem:[%s7762_s18 + $0x9c] ss:$24 sps:$4 sm:$0xff]  }
 0x955   :  { %3018 = vmatpush1.bf16.msra.mxu1 %v5840_v6  ;;  %3424 = vmatpush1.bf16.msra.mxu0 %v5843_v7  ;;  %v5917_v6 = vld [vmem:[%s7762_s18 + $0xa4] ss:$24 sps:$4 sm:$0xff]   ;;  %v5912_v7 = vld [vmem:[%s7762_s18 + $0x98] ss:$24 sps:$4 sm:$0xff]  }
 0x956   :  { %3019 = vmatprep.subr.bf16.mxu1 %v5848_v10  ;;  %3425 = vmatprep.subr.bf16.mxu0 %v5851_v11  ;;  %v5915_v10 = vld [vmem:[%s7762_s18 + $0xa0] ss:$24 sps:$4 sm:$0xff]   ;;  %v5920_v11 = vld [vmem:[%s7762_s18 + $0x6c] ss:$24 sps:$4 sm:$0xff]  }
 0x959   :  { %3020 = vmatpush1.bf16.msra.mxu1 %v5846_v12  ;;  %3426 = vmatpush1.bf16.msra.mxu0 %v5849_v13  ;;  %v5923_v12 = vld [vmem:[%s7762_s18 + $0x74] ss:$24 sps:$4 sm:$0xff]   ;;  %v5918_v13 = vld [vmem:[%s7762_s18 + $0x68] ss:$24 sps:$4 sm:$0xff]  }
 0x95a   :  { %3021 = vmatprep.subr.bf16.mxu1 %v5854_v14  ;;  %3427 = vmatprep.subr.bf16.mxu0 %v5857_v17  ;;  %v5921_v14 = vld [vmem:[%s7762_s18 + $0x70] ss:$24 sps:$4 sm:$0xff]   ;;  %v5926_v17 = vld [vmem:[%s7762_s18 + $0x3c] ss:$24 sps:$4 sm:$0xff]  }
 0x95d   :  { %3022 = vmatpush1.bf16.msra.mxu1 %v5852_v8  ;;  %3428 = vmatpush1.bf16.msra.mxu0 %v5855_v18  ;;  %v5929_v8 = vld [vmem:[%s7762_s18 + $0x44] ss:$24 sps:$4 sm:$0xff]   ;;  %v5924_v18 = vld [vmem:[%s7762_s18 + $0x38] ss:$24 sps:$4 sm:$0xff]  }
 0x95e   :  { %3023 = vmatprep.subr.bf16.mxu1 %v5860_v20  ;;  %3429 = vmatprep.subr.bf16.mxu0 %v5863_v21  ;;  %v5927_v20 = vld [vmem:[%s7762_s18 + $0x40] ss:$24 sps:$4 sm:$0xff]   ;;  %v5932_v21 = vld [vmem:[%s7762_s18 + $0xc] ss:$24 sps:$4 sm:$0xff]  }
 0x961   :  { %3024 = vmatpush1.bf16.msra.mxu1 %v5858_v22  ;;  %3430 = vmatpush1.bf16.msra.mxu0 %v5861_v45  ;;  %v5935_v22 = vld [vmem:[%s7762_s18 + $0x14] ss:$24 sps:$4 sm:$0xff]   ;;  %v5930_v45 = vld [vmem:[%s7762_s18 + $0x8] ss:$24 sps:$4 sm:$0xff]  }
 0x962   :  { %3033 = vmatprep.subr.bf16.mxu1 %v5866_v24  ;;  %3439 = vmatprep.subr.bf16.mxu0 %v5869_v25  ;;  %v5933_v24 = vld [vmem:[%s7762_s18 + $0x10] ss:$24 sps:$4 sm:$0xff]   ;;  %v5938_v25 = vld [vmem:[%s7762_s18 + $0x21c] ss:$24 sps:$4 sm:$0xff]  }
 0x965   :  { %3034 = vmatpush2.bf16.msra.mxu1 %v5864_v27  ;;  %3440 = vmatpush2.bf16.msra.mxu0 %v5867_v49  ;;  %v5936_v27 = vld [vmem:[%s7762_s18 + $0x218] ss:$24 sps:$4 sm:$0xff]  }
 0x966   :  { %3035 = vmatprep.subr.bf16.mxu1 %v5872_v29  ;;  %3441 = vmatprep.subr.bf16.mxu0 %v5875_v30  ;;  %v5939_v49 = vld [vmem:[%s7762_s18 + $0x220] ss:$24 sps:$4 sm:$0xff]   ;;  %v5947_v29 = vld [vmem:[%s7762_s18 + $0x1f4] ss:$24 sps:$4 sm:$0xff]  }
 0x967   :  { %v5942_v30 = vld [vmem:[%s7762_s18 + $0x1e8] ss:$24 sps:$4 sm:$0xff]  }
 0x969   :  { %3036 = vmatpush2.bf16.msra.mxu1 %v5870_v46  ;;  %3442 = vmatpush2.bf16.msra.mxu0 %v5873_v43  ;;  %v5948_v46 = vld [vmem:[%s7762_s18 + $0x1b8] ss:$24 sps:$4 sm:$0xff]  }
 0x96a   :  { %3037 = vmatprep.subr.bf16.mxu1 %v5878_v1  ;;  %3443 = vmatprep.subr.bf16.mxu0 %v5881_v38  ;;  %v5951_v43 = vld [vmem:[%s7762_s18 + $0x1c0] ss:$24 sps:$4 sm:$0xff]   ;;  %v5956_v1 = vld [vmem:[%s7762_s18 + $0x18c] ss:$24 sps:$4 sm:$0xff]  }
 0x96b   :  { %v5959_v38 = vld [vmem:[%s7762_s18 + $0x194] ss:$24 sps:$4 sm:$0xff]  }
 0x96d   :  { %3038 = vmatpush2.bf16.msra.mxu1 %v5876_v9  ;;  %3444 = vmatpush2.bf16.msra.mxu0 %v5879_v35 }
 0x96e   :  { %3039 = vmatprep.subr.bf16.mxu1 %v5884_v36  ;;  %3445 = vmatprep.subr.bf16.mxu0 %v5887_v37 }
 0x971   :  { %3040 = vmatpush2.bf16.msra.mxu1 %v5882_v47  ;;  %3446 = vmatpush2.bf16.msra.mxu0 %v5885_v16 }
 0x972   :  { %3458 = vmatprep.subr.bf16.mxu1 %v5890_v42  ;;  %3501 = vmatprep.subr.bf16.mxu0 %v5893_v44  ;;  %v3544_v42 = vld [vmem:[%s7764_s21] sm:$0x3f] }
 0x973   :  { %v3563_v48 = vrot.slane %v3544_v42, %v7176_v62 }
 0x974   :  { %3042 = vmatmul.mubr.bf16.vlgmr.msra.gmra.mxu1 %v7312_v40  ;;  %3448 = vmatmul.mubr.bf16.vlgmr.msra.gmra.mxu0 %v7381_v51  ;;  %v5905_v40 = vld [vmem:[%s7762_s18 + $0x104] ss:$24 sps:$4 sm:$0xff]  }
 0x975   :  { %3459 = vmatpush1.bf16.msra.mxu1 %v5888_v50  ;;  %5133 = vmatprep.mubr.msk.bf16.mxu1 %vm1383_vm2, %v7328_v58 }
 0x976   :  { %3502 = vmatpush1.bf16.msra.mxu0 %v5891_v52  ;;  %5134 = vmatprep.mubr.msk.bf16.mxu0 %vm1383_vm2, %v7328_v58  ;;  %v5906_v58 = vld [vmem:[%s7762_s18 + $0xc8] ss:$24 sps:$4 sm:$0xff]   ;;  %v3548_v52 = vpop.permute.xlu0 %3547 }
 0x977   :  { %3460 = vmatprep.subr.bf16.mxu1 %v5896_v53  ;;  %3503 = vmatprep.subr.bf16.mxu0 %v5899_v54 }
 0x979   :  { %3461 = vmatpush1.bf16.msra.mxu1 %v5894_v55  ;;  %v3587_v55 = vmul.f32 %v3563_v48, %v3548_v52 }
 0x97a   :  { %3504 = vmatpush1.bf16.msra.mxu0 %v5897_v56  ;;  %3462 = vmatprep.subr.bf16.mxu1 %v5902_v57  ;;  %v3553_v56 = vpop.permute.xlu1 %3552 }
 0x97b   :  { %3505 = vmatprep.subr.bf16.mxu0 %v5905_v40  ;;  %v7446_v40 = vsub.s32 2, %v7173_v61 }
 0x97d   :  { %3463 = vmatpush1.bf16.msra.mxu1 %v5900_v59  ;;  %v7449_v59 = vsub.s32 4, %v7173_v61 }
 0x97e   :  { %3506 = vmatpush1.bf16.msra.mxu0 %v5903_v63  ;;  %3464 = vmatprep.subr.bf16.mxu1 %v5908_v2  ;;  %v7452_v63 = vsub.s32 3, %v7173_v61  ;;  %v7455_v2 = vsub.s32 5, %v7173_v61 }
 0x97f   :  { %3507 = vmatprep.subr.bf16.mxu0 %v5911_v3 }
 0x980   :  { %v3579_v61 = vrot.slane %v3544_v42, %v7455_v2 }
 0x981   :  { %3465 = vmatpush1.bf16.msra.mxu1 %v5906_v58 }
 0x982   :  { %3508 = vmatpush1.bf16.msra.mxu0 %v5909_v4  ;;  %3466 = vmatprep.subr.bf16.mxu1 %v5914_v5  ;;  %v3610_v4 = vld [vmem:[%s7765_s3] sm:$0x3f] }
 0x983   :  { %3509 = vmatprep.subr.bf16.mxu0 %v5917_v6 }
 0x985   :  { %3467 = vmatpush1.bf16.msra.mxu1 %v5912_v7 }
 0x986   :  { %3510 = vmatpush1.bf16.msra.mxu0 %v5915_v10  ;;  %3468 = vmatprep.subr.bf16.mxu1 %v5920_v11  ;;  %v3619_v10 = vrot.slane %v3610_v4, %v7176_v62 }
 0x987   :  { %3511 = vmatprep.subr.bf16.mxu0 %v5923_v12 }
 0x989   :  { %3469 = vmatpush1.bf16.msra.mxu1 %v5918_v13  ;;  %v3593_v13 = vmul.f32 %v3563_v48, %v3553_v56  ;;  %v3597_v48 = vmul.f32 %v3579_v61, %v3553_v56 }
 0x98a   :  { %3512 = vmatpush1.bf16.msra.mxu0 %v5921_v14  ;;  %3470 = vmatprep.subr.bf16.mxu1 %v5926_v17  ;;  %v3567_v14 = vrot.slane %v3544_v42, %v7446_v40  ;;  %v3575_v17 = vrot.slane %v3544_v42, %v7449_v59 }
 0x98b   :  { %3513 = vmatprep.subr.bf16.mxu0 %v5929_v8  ;;  %v3571_v8 = vrot.slane %v3544_v42, %v7452_v63 }
 0x98d   :  { %3471 = vmatpush1.bf16.msra.mxu1 %v5924_v18 }
 0x98e   :  { %3514 = vmatpush1.bf16.msra.mxu0 %v5927_v20  ;;  %3472 = vmatprep.subr.bf16.mxu1 %v5932_v21  ;;  %v3615_v20 = vrot.slane %v3610_v4, %v7179_v0 }
 0x98f   :  { %3515 = vmatprep.subr.bf16.mxu0 %v5935_v22 }
 0x991   :  { %3473 = vmatpush1.bf16.msra.mxu1 %v5930_v45 }
 0x992   :  { %3516 = vmatpush1.bf16.msra.mxu0 %v5933_v24  ;;  %3482 = vmatprep.subr.bf16.mxu1 %v5938_v25  ;;  %v3588_v25 = vmul.f32 %v3567_v14, %v3548_v52 }
 0x993   :  { %3525 = vmatprep.subr.bf16.mxu0 %v5941_v19  ;;  %v3590_v19 = vmul.f32 %v3575_v17, %v3548_v52 }
 0x995   :  { %3483 = vmatpush2.bf16.msra.mxu1 %v5936_v27  ;;  %v3589_v27 = vmul.f32 %v3571_v8, %v3548_v52 }
 0x996   :  { %3526 = vmatpush2.bf16.msra.mxu0 %v5939_v49  ;;  %3484 = vmatprep.subr.bf16.mxu1 %v5944_v28  ;;  %v3591_v49 = vmul.f32 %v3579_v61, %v3548_v52 }
 0x997   :  { %3527 = vmatprep.subr.bf16.mxu0 %v5947_v29 }
 0x999   :  { %3485 = vmatpush2.bf16.msra.mxu1 %v5942_v30  ;;  %v3623_v30 = vrot.slane %v3610_v4, %v7446_v40 }
 0x99a   :  { %3528 = vmatpush2.bf16.msra.mxu0 %v5945_v15  ;;  %3486 = vmatprep.subr.bf16.mxu1 %v5950_v31  ;;  %v3631_v15 = vrot.slane %v3610_v4, %v7449_v59  ;;  %v3627_v31 = vrot.slane %v3610_v4, %v7452_v63 }
 0x99b   :  { %3529 = vmatprep.subr.bf16.mxu0 %v5953_v32 }
 0x99d   :  { %3487 = vmatpush2.bf16.msra.mxu1 %v5948_v46 }
 0x99e   :  { %3530 = vmatpush2.bf16.msra.mxu0 %v5951_v43  ;;  %3488 = vmatprep.subr.bf16.mxu1 %v5956_v1  ;;  %v3635_v1 = vrot.slane %v3610_v4, %v7455_v2 }
 0x99f   :  { %3531 = vmatprep.subr.bf16.mxu0 %v5959_v38  ;;  %v3594_v38 = vmul.f32 %v3567_v14, %v3553_v56 }
 0x9a1   :  { %3489 = vmatpush2.bf16.msra.mxu1 %v5954_v33 }
 0x9a2   :  { %3532 = vmatpush2.bf16.msra.mxu0 %v5957_v34 }
 0x9a4   :  { %3491 = vmatmul.mubr.bf16.vlgmr.msra.gmra.mxu1 %v7381_v51 }
 0x9a5   :  { %3534 = vmatmul.mubr.bf16.vlgmr.msra.gmra.mxu0 %v7381_v51  ;;  %v3559_v51 = vrot.slane %v3544_v42, %v7179_v0  ;;  %v3595_v42 = vmul.f32 %v3571_v8, %v3553_v56 }
 0x9a7   :  { %v3586_v58 = vmul.f32 %v3559_v51, %v3548_v52  ;;  %v3592_v6 = vmul.f32 %v3559_v51, %v3553_v56 }
 0xa04   :  { %v3000_v26 = vpop.f32.mrf.mxu0  ;;  %v2957_v35 = vpop.f32.mrf.mxu1 }
 0xa06   :  { %v7436_v9 = vpop.f32.mrf.mxu0  ;;  %v2959_v37 = vpop.f32.mrf.mxu1 }
 0xa08   :  { %v7438_v36 = vpop.f32.mrf.mxu0  ;;  %v2961_v47 = vpop.f32.mrf.mxu1 }
 0xa0a   :  { %v7440_v39 = vpop.f32.mrf.mxu0  ;;  %v2963_v41 = vpop.f32.mrf.mxu1 }
 0xa34   :  { %v3449_v60 = vpop.f32.mrf.mxu0  ;;  %v3043_v44 = vpop.f32.mrf.mxu1 }
 0xa35   :  { %v3450_v3 = vadd.f32 %v3449_v60, %v2957_v35  ;;  %v3596_v60 = vmul.f32 %v3575_v17, %v3553_v56 }
 0xa36   :  { %v3451_v16 = vpop.f32.mrf.mxu0  ;;  %v3045_v53 = vpop.f32.mrf.mxu1 }
 0xa37   :  { %v3452_v54 = vadd.f32 %v3451_v16, %v2959_v37  ;;  %v3598_v18 = vadd.f32 %v3586_v58, %v3450_v3 }
 0xa38   :  { %v3453_v50 = vpop.f32.mrf.mxu0  ;;  %v3047_v11 = vpop.f32.mrf.mxu1 }
 0xa39   :  { %v3454_v5 = vadd.f32 %v3453_v50, %v2961_v47  ;;  %v3599_v7 = vadd.f32 %v3587_v55, %v3452_v54  ;;  %v7466_v28 = vadd.f32 %v3615_v20, %v3598_v18 }
 0xa3a   :  { %v3455_v57 = vpop.f32.mrf.mxu0  ;;  %v3049_v45 = vpop.f32.mrf.mxu1 }
 0xa3b   :  { %v3456_v12 = vadd.f32 %v3455_v57, %v2963_v41  ;;  %v3604_v21 = vadd.f32 %v3592_v6, %v3454_v5  ;;  %v7464_v22 = vadd.f32 %v3619_v10, %v3599_v7  ;;  %v3671_v54 = vmul.f32 %v7466_v28, %v7466_v28 }
 0xa3d   :  { %v3605_v24 = vadd.f32 %v3593_v13, %v3456_v12  ;;  %v7471_v32 = vadd.f32 %v3615_v20, %v3604_v21  ;;  %v3672_v33 = vmul.f32 %v7464_v22, %v7464_v22  ;;  %v3654_v52 = vadd.f32 %v7464_v22, %v7466_v28 }
 0xa3f   :  { %v7476_v34 = vadd.f32 %v3619_v10, %v3605_v24  ;;  %v3683_v5 = vadd.f32 %v3672_v33, %v3671_v54  ;;  %v5962_v54 = vld [vmem:[%s7766_s9 + $0xf8] sm:$0xff]  }
 0xa40   :  { %5378 = vmatprep.subr.bf16.mxu0 %v5962_v54  ;;  %v7574_v54 = vld [vmem:[%s7767_s29] sm:$0x3f] }
 0xa41   :  { %v3678_v56 = vmul.f32 %v7476_v34, %v7476_v34  ;;  %v3661_v61 = vadd.f32 %v7476_v34, %v7471_v32 }
 0xa64   :  { %v3492_v29 = vpop.f32.mrf.mxu1 }
 0xa65   :  { %v3493_v46 = vadd.f32 %v3492_v29, %v3000_v26  ;;  %v3535_v43 = vpop.f32.mrf.mxu0 }
 0xa66   :  { %v3536_v35 = vadd.f32 %v3535_v43, %v3043_v44  ;;  %v3494_v37 = vpop.f32.mrf.mxu1  ;;  %v3677_v44 = vmul.f32 %v7471_v32, %v7471_v32 }
 0xa67   :  { %v3600_v47 = vadd.f32 %v3588_v25, %v3493_v46  ;;  %v3495_v16 = vadd.f32 %v3494_v37, %v7436_v9  ;;  %v3537_v41 = vpop.f32.mrf.mxu0 }
 0xa68   :  { %v3602_v50 = vadd.f32 %v3590_v19, %v3536_v35  ;;  %v3538_v26 = vadd.f32 %v3537_v41, %v3045_v53  ;;  %v3496_v51 = vpop.f32.mrf.mxu1  ;;  %v3690_v25 = vadd.f32 %v3678_v56, %v3677_v44  ;;  %v5963_v44 = vld [vmem:[%s7766_s9 + $0xb8] sm:$0xff]   ;;  %v5967_v56 = vld [vmem:[%s7766_s9 + $0xb0] sm:$0xff]  }
 0xa69   :  { %v7485_v55 = vadd.f32 %v3623_v30, %v3600_v47  ;;  %v3601_v57 = vadd.f32 %v3589_v27, %v3495_v16  ;;  %v3497_v9 = vadd.f32 %v3496_v51, %v7438_v36  ;;  %v3539_v3 = vpop.f32.mrf.mxu0  ;;  %v5960_v51 = vld [vmem:[%s7766_s9 + $0x78] sm:$0xff]   ;;  %5379 = vmatpush3.bf16.msra.mxu0 %v5963_v44  ;;  %v7576_v44 = vld [vmem:[#allocation35] sm:$0x3f] }
 0xa6a   :  { %v7490_v53 = vadd.f32 %v3631_v15, %v3602_v50  ;;  %v3540_v58 = vadd.f32 %v3539_v3, %v3047_v11  ;;  %v3498_v4 = vpop.f32.mrf.mxu1  ;;  %v3603_v14 = vadd.f32 %v3591_v49, %v3538_v26  ;;  %5356 = vmatprep.subr.bf16.mxu1 %v5960_v51  ;;  %v5966_v3 = vld [vmem:[%s7766_s9 + $0xf0] sm:$0xff]  }
 0xa6b   :  { %v3673_v6 = vmul.f32 %v7485_v55, %v7485_v55  ;;  %v7494_v7 = vadd.f32 %v3627_v31, %v3601_v57  ;;  %v3606_v10 = vadd.f32 %v3594_v38, %v3497_v9  ;;  %v3499_v12 = vadd.f32 %v3498_v4, %v7440_v39  ;;  %v3541_v13 = vpop.f32.mrf.mxu0  ;;  %v5964_v57 = vld [vmem:[%s7766_s9 + $0x70] sm:$0xff]   ;;  %5380 = vmatprep.subr.bf16.mxu0 %v5966_v3  ;;  %v5969_v4 = vld [vmem:[%s7766_s9 + $0x28] sm:$0xff]  }
 0xa6c   :  { %v3608_v36 = vadd.f32 %v3596_v60, %v3540_v58  ;;  %v3542_v17 = vadd.f32 %v3541_v13, %v3049_v45  ;;  %v3655_v8 = vadd.f32 %v3654_v52, %v7485_v55  ;;  %v7510_v49 = vadd.f32 %v3635_v1, %v3603_v14  ;;  %v5961_v52 = vld [vmem:[%s7766_s9 + $0x38] sm:$0xff]   ;;  %v5965_v9 = vld [vmem:[%s7766_s9 + $0x30] sm:$0xff]   ;;  %v5968_v58 = vld [vmem:[%s7766_s9 + $0x68] sm:$0xff]  }
 0xa6d   :  { %v7500_v11 = vadd.f32 %v3623_v30, %v3606_v10  ;;  %v3607_v18 = vadd.f32 %v3595_v42, %v3499_v12  ;;  %v3674_v20 = vmul.f32 %v7494_v7, %v7494_v7  ;;  %v3684_v27 = vadd.f32 %v3683_v5, %v3673_v6  ;;  %5357 = vmatpush3.bf16.msra.mxu1 %v5961_v52  ;;  %v5970_v5 = vld [vmem:[%s7766_s9 + $0xe8] sm:$0xff]   ;;  %v5972_v10 = vld [vmem:[%s7766_s9 + $0x60] sm:$0xff]  }
 0xa6e   :  { %v3609_v21 = vadd.f32 %v3597_v48, %v3542_v17  ;;  %v3656_v24 = vadd.f32 %v3655_v8, %v7494_v7  ;;  %v7512_v29 = vadd.f32 %v3631_v15, %v3608_v36  ;;  %v3675_v46 = vmul.f32 %v7490_v53, %v7490_v53  ;;  %5358 = vmatprep.subr.bf16.mxu1 %v5964_v57  ;;  %v5971_v6 = vld [vmem:[%s7766_s9 + $0xa8] sm:$0xff]   ;;  %v5974_v12 = vld [vmem:[%s7766_s9 + $0xe0] sm:$0xff]   ;;  %v5976_v36 = vld [vmem:[%s7766_s9 + $0x58] sm:$0xff]  }
 0xa6f   :  { %v3679_v39 = vmul.f32 %v7500_v11, %v7500_v11  ;;  %v7507_v19 = vadd.f32 %v3627_v31, %v3607_v18  ;;  %v3662_v45 = vadd.f32 %v3661_v61, %v7500_v11  ;;  %v3685_v38 = vadd.f32 %v3684_v27, %v3674_v20  ;;  %5381 = vmatpush3.bf16.msra.mxu0 %v5967_v56  ;;  %v5973_v13 = vld [vmem:[%s7766_s9 + $0x20] sm:$0xff]   ;;  %v5978_v17 = vld [vmem:[%s7766_s9 + $0xd8] sm:$0xff]   ;;  %v5980_v18 = vld [vmem:[%s7766_s9 + $0x50] sm:$0xff]  }
 0xa70   :  { %v3657_v30 = vadd.f32 %v3656_v24, %v7490_v53  ;;  %v7521_v37 = vadd.f32 %v3635_v1, %v3609_v21  ;;  %v3676_v16 = vmul.f32 %v7510_v49, %v7510_v49  ;;  %v3681_v41 = vmul.f32 %v7512_v29, %v7512_v29  ;;  %5382 = vmatprep.subr.bf16.mxu0 %v5970_v5  ;;  %v5975_v14 = vld [vmem:[%s7766_s9 + $0xa0] sm:$0xff]   ;;  %v5977_v8 = vld [vmem:[%s7766_s9 + $0x18] sm:$0xff]   ;;  %v5982_v20 = vld [vmem:[%s7766_s9 + $0xd0] sm:$0xff]  }
 0xa71   :  { %v3663_v43 = vadd.f32 %v3662_v45, %v7507_v19  ;;  %v3680_v33 = vmul.f32 %v7507_v19, %v7507_v19  ;;  %v3691_v31 = vadd.f32 %v3690_v25, %v3679_v39  ;;  %v3686_v60 = vadd.f32 %v3685_v38, %v3675_v46  ;;  %5359 = vmatpush3.bf16.msra.mxu1 %v5965_v9  ;;  %v5979_v61 = vld [vmem:[%s7766_s9 + $0x98] sm:$0xff]   ;;  %v5981_v21 = vld [vmem:[%s7766_s9 + $0x10] sm:$0xff]   ;;  %v5984_v25 = vld [vmem:[%s7766_s9 + $0x48] sm:$0xff]  }
 0xa72   :  { %v3658_v35 = vadd.f32 %v3657_v30, %v7510_v49  ;;  %v3682_v50 = vmul.f32 %v7521_v37, %v7521_v37  ;;  %5360 = vmatprep.subr.bf16.mxu1 %v5968_v58  ;;  %v5983_v24 = vld [vmem:[%s7766_s9 + $0x90] sm:$0xff]   ;;  %v5986_v39 = vld [vmem:[%s7766_s9 + $0xc8] sm:$0xff]   ;;  %v5988_v30 = vld [vmem:[%s7766_s9 + $0x40] sm:$0xff]   ;;  %v3740_v57 = vrot.slane %v7574_v54, %v7176_v62  ;;  %v3748_v9 = vrot.slane %v7574_v54, %v7452_v63 }
 0xa73   :  { %v3664_v15 = vadd.f32 %v3663_v43, %v7512_v29  ;;  %v3692_v47 = vadd.f32 %v3691_v31, %v3680_v33  ;;  %v3687_v48 = vadd.f32 %v3686_v60, %v3676_v16  ;;  %5383 = vmatpush3.bf16.msra.mxu0 %v5971_v6  ;;  %v5985_v45 = vld [vmem:[%s7766_s9 + $0x8] sm:$0xff]   ;;  %v5990_v46 = vld [vmem:[%s7766_s9 + $0xc0] sm:$0xff]   ;;  %v5992_v33 = vld [vmem:[%s7766_s9 + $0x178] sm:$0xff]   ;;  %v3736_v3 = vrot.slane %v7574_v54, %v7179_v0 }
 0xa74   :  { %3659 = vadd.xlane.f32.xlu1 %v3658_v35  ;;  %5384 = vmatprep.subr.bf16.mxu0 %v5974_v12  ;;  %v5987_v27 = vld [vmem:[%s7766_s9 + $0x88] sm:$0xff]   ;;  %v5989_v43 = vld [vmem:[%s7766_s9] sm:$0xff]   ;;  %v3792_v12 = vrot.slane %v7576_v44, %v7452_v63  ;;  %v3780_v63 = vrot.slane %v7576_v44, %v7179_v0 }
 0xa75   :  { %v3665_v42 = vadd.f32 %v3664_v15, %v7521_v37  ;;  %v3693_v1 = vadd.f32 %v3692_v47, %v3681_v41  ;;  %5361 = vmatpush3.bf16.msra.mxu1 %v5969_v4  ;;  %v5991_v38 = vld [vmem:[%s7766_s9 + $0x80] sm:$0xff]  }
 0xa76   :  { %5362 = vmatprep.subr.bf16.mxu1 %v5972_v10  ;;  %v3784_v10 = vrot.slane %v7576_v44, %v7176_v62 }
 0xa77   :  { %3666 = vadd.xlane.f32.xlu0 %v3665_v42  ;;  %v3694_v26 = vadd.f32 %v3693_v1, %v3682_v50  ;;  %5385 = vmatpush3.bf16.msra.mxu0 %v5975_v14 }
 0xa78   :  { %3688 = vadd.xlane.f32.xlu1 %v3687_v48  ;;  %5386 = vmatprep.subr.bf16.mxu0 %v5978_v17 }
 0xa79   :  { %5363 = vmatpush3.bf16.msra.mxu1 %v5973_v13 }
 0xa7a   :  { %5364 = vmatprep.subr.bf16.mxu1 %v5976_v36  ;;  %v3788_v36 = vrot.slane %v7576_v44, %v7446_v40 }
 0xa7b   :  { %5387 = vmatpush3.bf16.msra.mxu0 %v5979_v61 }
 0xa7c   :  { %3695 = vadd.xlane.f32.xlu1 %v3694_v26  ;;  %5388 = vmatprep.subr.bf16.mxu0 %v5982_v20 }
 0xa7d   :  { %5365 = vmatpush3.bf16.msra.mxu1 %v5977_v8 }
 0xa7e   :  { %5366 = vmatprep.subr.bf16.mxu1 %v5980_v18 }
 0xa7f   :  { %5389 = vmatpush3.bf16.msra.mxu0 %v5983_v24 }
 0xa80   :  { %5390 = vmatprep.subr.bf16.mxu0 %v5986_v39 }
 0xa81   :  { %5367 = vmatpush3.bf16.msra.mxu1 %v5981_v21 }
 0xa82   :  { %5368 = vmatprep.subr.bf16.mxu1 %v5984_v25 }
 0xa83   :  { %5391 = vmatpush3.bf16.msra.mxu0 %v5987_v27 }
 0xa84   :  { %5392 = vmatprep.subr.bf16.mxu0 %v5990_v46 }
 0xa85   :  { %5369 = vmatpush3.bf16.msra.mxu1 %v5985_v45 }
 0xa86   :  { %5370 = vmatprep.subr.bf16.mxu1 %v5988_v30 }
 0xa87   :  { %5393 = vmatpush3.bf16.msra.mxu0 %v5991_v38 }
 0xa88   :  { %5468 = vmatprep.subr.bf16.mxu0 %v6690_v23 }
 0xa89   :  { %5371 = vmatpush3.bf16.msra.mxu1 %v5989_v43 }
 0xa8a   :  { %5400 = vmatprep.subr.bf16.mxu1 %v5992_v33 }
 0xafd   :  { %v3660_v31 = vpop.xlane.xlu1 %3659 }
 0xafe   :  { %v7565_v35 = vmul.f32 0.0013020834, %v3660_v31 }
 0xb00   :  { %v3667_v15 = vpop.xlane.xlu0 %3666  ;;  %v3699_v47 = vmul.f32 %v7565_v35, %v7565_v35  ;;  %v3704_v56 = vsub.f32 %v7464_v22, %v7565_v35  ;;  %v3706_v58 = vsub.f32 %v7494_v7, %v7565_v35  ;;  %v3703_v4 = vsub.f32 %v7466_v28, %v7565_v35 }
 0xb01   :  { %v3689_v60 = vpop.xlane.xlu1 %3688  ;;  %v7569_v41 = vmul.f32 0.0013020834, %v3667_v15  ;;  %v3705_v5 = vsub.f32 %v7485_v55, %v7565_v35  ;;  %v3744_v22 = vrot.slane %v7574_v54, %v7446_v40  ;;  %v3708_v7 = vsub.f32 %v7510_v49, %v7565_v35 }
 0xb02   :  { %v3697_v16 = vmul.f32 0.0013020834, %v3689_v60  ;;  %v3756_v49 = vrot.slane %v7574_v54, %v7455_v2 }
 0xb03   :  { %v3700_v26 = vmul.f32 %v7569_v41, %v7569_v41  ;;  %v3710_v62 = vsub.f32 %v7476_v34, %v7569_v41  ;;  %v3712_v8 = vsub.f32 %v7507_v19, %v7569_v41  ;;  %v3709_v34 = vsub.f32 %v7471_v32, %v7569_v41 }
 0xb04   :  { %v3701_v42 = vsub.f32 %v3697_v16, %v3699_v47  ;;  %v3711_v0 = vsub.f32 %v7500_v11, %v7569_v41  ;;  %v3800_v19 = vrot.slane %v7576_v44, %v7455_v2  ;;  %v3714_v43 = vsub.f32 %v7521_v37, %v7569_v41 }
 0xb05   :  { %v3696_v48 = vpop.xlane.xlu1 %3695 }
 0xb06   :  { %v3715_v1 = vadd.f32 1e-05, %v3701_v42  ;;  %v3698_v50 = vmul.f32 0.0013020834, %v3696_v48 }
 0xb08   :  { %6044 = vrsqrt.f32 %v3715_v1  ;;  %v3702_v51 = vsub.f32 %v3698_v50, %v3700_v26 }
 0xb0a   :  { %v3716_v52 = vadd.f32 1e-05, %v3702_v51 }
 0xb0c   :  { %6046 = vrsqrt.f32 %v3716_v52 }
 0xb15   :  { %v7592_v6 = vpop.eup %6044 }
 0xb16   :  { %v3720_v13 = vmul.f32 %v7592_v6, %v3704_v56  ;;  %v3722_v28 = vmul.f32 %v7592_v6, %v3706_v58  ;;  %v3719_v55 = vmul.f32 %v7592_v6, %v3703_v4  ;;  %v3721_v14 = vmul.f32 %v7592_v6, %v3705_v5  ;;  %v5993_v4 = vld [vmem:[%s7766_s9 + $0x138] sm:$0xff]  }
 0xb17   :  { %v3724_v18 = vmul.f32 %v7592_v6, %v3708_v7 }
 0xb18   :  { %v3764_v17 = vmul.f32 %v3740_v57, %v3720_v13  ;;  %v3766_v61 = vmul.f32 %v3748_v9, %v3722_v28  ;;  %v3763_v21 = vmul.f32 %v3736_v3, %v3719_v55  ;;  %v3765_v40 = vmul.f32 %v3744_v22, %v3721_v14  ;;  %v5995_v55 = vld [vmem:[%s7766_s9 + $0x130] sm:$0xff]   ;;  %v5996_v14 = vld [vmem:[%s7766_s9 + $0x168] sm:$0xff]  }
 0xb19   :  { %v7617_v20 = vpop.eup %6046  ;;  %v3768_v11 = vmul.f32 %v3756_v49, %v3724_v18  ;;  %v3707_v18 = vsub.f32 %v7490_v53, %v7565_v35  ;;  %v6006_v53 = vld [vmem:[%s7766_s9 + $0x140] sm:$0xff]  }
 0xb1a   :  { %v3726_v24 = vmul.f32 %v7617_v20, %v3710_v62  ;;  %v3728_v25 = vmul.f32 %v7617_v20, %v3712_v8  ;;  %v3808_v39 = vadd.f32 %v3784_v10, %v3764_v17  ;;  %v3810_v45 = vadd.f32 %v3792_v12, %v3766_v61  ;;  %v5997_v62 = vld [vmem:[%s7766_s9 + $0x128] sm:$0xff]   ;;  %v6001_v8 = vld [vmem:[%s7766_s9 + $0x118] sm:$0xff]   ;;  %v6002_v61 = vld [vmem:[%s7766_s9 + $0x150] sm:$0xff]  }
 0xb1b   :  { %v3725_v27 = vmul.f32 %v7617_v20, %v3709_v34  ;;  %v3727_v30 = vmul.f32 %v7617_v20, %v3711_v0  ;;  %v3807_v33 = vadd.f32 %v3780_v63, %v3763_v21  ;;  %v3809_v15 = vadd.f32 %v3788_v36, %v3765_v40  ;;  %v6003_v40 = vld [vmem:[%s7766_s9 + $0x110] sm:$0xff]  }
 0xb1c   :  { %v3770_v46 = vmul.f32 %v3740_v57, %v3726_v24  ;;  %v3772_v32 = vmul.f32 %v3748_v9, %v3728_v25  ;;  %v3730_v2 = vmul.f32 %v7617_v20, %v3714_v43  ;;  %v3820_v16 = vmax.f32 %v3808_v39, 0.0 }
 0xb1d   :  { %v3769_v38 = vmul.f32 %v3736_v3, %v3725_v27  ;;  %v3771_v31 = vmul.f32 %v3744_v22, %v3727_v30  ;;  %v3822_v42 = vmax.f32 %v3810_v45, 0.0  ;;  %v3812_v52 = vadd.f32 %v3800_v19, %v3768_v11  ;;  %v5994_v22 = vld [vmem:[%s7766_s9 + $0x170] sm:$0xff]  }
 0xb1e   :  { %v3814_v60 = vadd.f32 %v3784_v10, %v3770_v46  ;;  %v3816_v47 = vadd.f32 %v3792_v12, %v3772_v32  ;;  %v3774_v51 = vmul.f32 %v3756_v49, %v3730_v2  ;;  %v3819_v37 = vmax.f32 %v3807_v33, 0.0  ;;  %v6000_v49 = vld [vmem:[%s7766_s9 + $0x158] sm:$0xff]   ;;  %v5135_v32 = vld [vmem:[#allocation36] ss:$0 sm:$0xff] }
 0xb1f   :  { %v3813_v48 = vadd.f32 %v3780_v63, %v3769_v38  ;;  %v3815_v1 = vadd.f32 %v3788_v36, %v3771_v31  ;;  %v3821_v9 = vmax.f32 %v3809_v15, 0.0  ;;  %v3824_v7 = vmax.f32 %v3812_v52, 0.0  ;;  %v5998_v63 = vld [vmem:[%s7766_s9 + $0x160] sm:$0xff]  }
 0xb20   :  { %v3826_v50 = vmax.f32 %v3814_v60, 0.0  ;;  %v3828_v26 = vmax.f32 %v3816_v47, 0.0  ;;  %v3818_v5 = vadd.f32 %v3800_v19, %v3774_v51  ;;  %v5999_v36 = vld [vmem:[%s7766_s9 + $0x120] sm:$0xff]   ;;  %v3713_v17 = vsub.f32 %v7512_v29, %v7569_v41  ;;  %v6004_v29 = vld [vmem:[%s7766_s9 + $0x148] sm:$0xff]  }
 0xb21   :  { %v3825_v57 = vmax.f32 %v3813_v48, 0.0  ;;  %v3827_v3 = vmax.f32 %v3815_v1, 0.0  ;;  %v3723_v21 = vmul.f32 %v7592_v6, %v3707_v18  ;;  %v3752_v0 = vrot.slane %v7574_v54, %v7449_v59  ;;  %v6005_v19 = vld [vmem:[%s7766_s9 + $0x108] sm:$0xff]   ;;  %v6007_v6 = vld [vmem:[%s7766_s9 + $0x100] sm:$0xff]  }
 0xb22   :  { %v3832_v56 = vpack.c.bf16 %v3826_v50, %v3820_v16  ;;  %v3834_v58 = vpack.c.bf16 %v3828_v26, %v3822_v42  ;;  %v3830_v13 = vmax.f32 %v3818_v5, 0.0  ;;  %v3729_v34 = vmul.f32 %v7617_v20, %v3713_v17 }
 0xb23   :  { %v3831_v10 = vpack.c.bf16 %v3825_v57, %v3819_v37  ;;  %v3833_v12 = vpack.c.bf16 %v3827_v3, %v3821_v9  ;;  %v3767_v24 = vmul.f32 %v3752_v0, %v3723_v21  ;;  %v3796_v25 = vrot.slane %v7576_v44, %v7449_v59 }
 0xb24   :  { %4260 = vmatprep.mubr.bf16.mxu1 %v3832_v56  ;;  %4301 = vmatprep.mubr.bf16.mxu0 %v3834_v58  ;;  %v3836_v28 = vpack.c.bf16 %v3830_v13, %v3824_v7  ;;  %v3773_v41 = vmul.f32 %v3752_v0, %v3729_v34  ;;  %v6011_v7 = vld [vmem:[%s7768_s20 + $0x10] sm:$0xff]   ;;  %v6012_v13 = vld [vmem:[%s7768_s20 + $0x8] sm:$0xff]  }
 0xb25   :  { %4261 = vmatmul.mubr.bf16.vlgmr.msra.gmra.mxu1 %v3831_v10  ;;  %4302 = vmatmul.mubr.bf16.vlgmr.msra.gmra.mxu0 %v3833_v12  ;;  %v3811_v20 = vadd.f32 %v3796_v25, %v3767_v24  ;;  %v6008_v10 = vld [vmem:[%s7768_s20 + $0x28] sm:$0xff]   ;;  %v6009_v12 = vld [vmem:[%s7768_s20 + $0x20] sm:$0xff]  }
 0xb26   :  { %5401 = vmatpush3.bf16.msra.mxu1 %v5993_v4  ;;  %5480 = vmatprep.mubr.msk.bf16.mxu0 %vm6691_vm1, %v6690_v23  ;;  %v3817_v35 = vadd.f32 %v3796_v25, %v3773_v41  ;;  %v5184_v25 = vld [vmem:[#allocation38] ss:$0 sm:$0xff] }
 0xb27   :  { %5402 = vmatprep.subr.bf16.mxu1 %v5994_v22  ;;  %4342 = vmatprep.mubr.bf16.mxu1 %v3836_v28  ;;  %v3823_v54 = vmax.f32 %v3811_v20, 0.0  ;;  %v6010_v22 = vld [vmem:[%s7768_s20 + $0x18] sm:$0xff]   ;;  %v6013_v28 = vld [vmem:[%s7768_s20] sm:$0xff]   ;;  %v5185_v20 = vld [vmem:[#allocation39] ss:$0 sm:$0xff] }
 0xb28   :  { %v3829_v39 = vmax.f32 %v3817_v35, 0.0  ;;  %5469 = vmatpush3.bf16.msra.mxu0 %v6008_v10 }
 0xb29   :  { %5470 = vmatprep.subr.bf16.mxu0 %v6690_v23 }
 0xb2a   :  { %5403 = vmatpush3.bf16.msra.mxu1 %v5995_v55  ;;  %v3835_v45 = vpack.c.bf16 %v3829_v39, %v3823_v54 }
 0xb2b   :  { %5404 = vmatprep.subr.bf16.mxu1 %v5996_v14 }
 0xb2c   :  { %5471 = vmatpush3.bf16.msra.mxu0 %v6009_v12 }
 0xb2d   :  { %5472 = vmatprep.subr.bf16.mxu0 %v6690_v23 }
 0xb2e   :  { %5405 = vmatpush3.bf16.msra.mxu1 %v5997_v62 }
 0xb2f   :  { %5406 = vmatprep.subr.bf16.mxu1 %v5998_v63 }
 0xb30   :  { %5473 = vmatpush3.bf16.msra.mxu0 %v6010_v22 }
 0xb31   :  { %5474 = vmatprep.subr.bf16.mxu0 %v6690_v23 }
 0xb32   :  { %5407 = vmatpush3.bf16.msra.mxu1 %v5999_v36 }
 0xb33   :  { %5408 = vmatprep.subr.bf16.mxu1 %v6000_v49 }
 0xb34   :  { %5475 = vmatpush3.bf16.msra.mxu0 %v6011_v7 }
 0xb35   :  { %5476 = vmatprep.subr.bf16.mxu0 %v6690_v23 }
 0xb36   :  { %5409 = vmatpush3.bf16.msra.mxu1 %v6001_v8 }
 0xb37   :  { %5410 = vmatprep.subr.bf16.mxu1 %v6002_v61 }
 0xb38   :  { %5477 = vmatpush3.bf16.msra.mxu0 %v6012_v13 }
 0xb39   :  { %5478 = vmatprep.subr.bf16.mxu0 %v6690_v23 }
 0xb3a   :  { %5411 = vmatpush3.bf16.msra.mxu1 %v6003_v40 }
 0xb3b   :  { %5412 = vmatprep.subr.bf16.mxu1 %v6004_v29 }
 0xb3c   :  { %5479 = vmatpush3.bf16.msra.mxu0 %v6013_v28 }
 0xb3e   :  { %5413 = vmatpush3.bf16.msra.mxu1 %v6005_v19 }
 0xb3f   :  { %5414 = vmatprep.subr.bf16.mxu1 %v6006_v53 }
 0xb42   :  { %5415 = vmatpush3.bf16.msra.mxu1 %v6007_v6 }
 0xb43   :  { %5484 = vmatprep.subr.bf16.mxu1 %v6690_v23 }
 0xb45   :  { %4343 = vmatmul.mubr.bf16.vlgmr.msra.gmra.mxu1 %v3835_v45 }
 0xb46   :  { %5496 = vmatprep.mubr.msk.bf16.mxu1 %vm6691_vm1, %v6690_v23 }
 0xbe5   :  { %v5372_v59 = vpop.f32.mrf.mxu1  ;;  %v5394_v27 = vpop.f32.mrf.mxu0 }
 0xbe7   :  { %v5373_v44 = vpop.f32.mrf.mxu1  ;;  %v5395_v43 = vpop.f32.mrf.mxu0 }
 0xbe8   :  { %v5374_v46 = vadd.f32 %v5373_v44, %v5372_v59  ;;  %v5396_v15 = vadd.f32 %v5395_v43, %v5394_v27 }
 0xbe9   :  { %v5375_v30 = vpop.f32.mrf.mxu1  ;;  %v5397_v33 = vpop.f32.mrf.mxu0 }
 0xbea   :  { %v4263_v38 = vadd.f32 %v5374_v46, %v5135_v32 }
 0xbeb   :  { %v5376_v11 = vpop.f32.mrf.mxu1  ;;  %v5398_v42 = vpop.f32.mrf.mxu0 }
 0xbec   :  { %v5377_v60 = vadd.f32 %v5376_v11, %v5375_v30  ;;  %v4304_v2 = vadd.f32 %v5396_v15, %v4263_v38  ;;  %v5399_v51 = vadd.f32 %v5398_v42, %v5397_v33  ;;  %v5186_v30 = vld [vmem:[%s7769_s23] ss:$0 sm:$0xff] }
 0xbed   :  { %v6014_v42 = vld [vmem:[#allocation41 + $0x28] sm:$0xff]  }
 0xbee   :  { %v4266_v1 = vadd.f32 %v5377_v60, %v5135_v32  ;;  %5485 = vmatpush3.bf16.msra.mxu1 %v6014_v42  ;;  %v5204_v42 = vld [vmem:[%s7773_s14] ss:$0 sm:$0xff] }
 0xbef   :  { %5486 = vmatprep.subr.bf16.mxu1 %v6690_v23 }
 0xbf0   :  { %v4307_v9 = vadd.f32 %v5399_v51, %v4266_v1  ;;  %v6016_v1 = vld [vmem:[#allocation41 + $0x18] sm:$0xff]   ;;  %v6019_v51 = vld [vmem:[#allocation41] sm:$0xff]  }
 0xc05   :  { %v5416_v31 = vpop.f32.mrf.mxu1 }
 0xc07   :  { %v5417_v47 = vpop.f32.mrf.mxu1 }
 0xc08   :  { %v5418_v16 = vadd.f32 %v5417_v47, %v5416_v31 }
 0xc09   :  { %v5419_v48 = vpop.f32.mrf.mxu1 }
 0xc0a   :  { %v4345_v50 = vadd.f32 %v5418_v16, %v4304_v2 }
 0xc0b   :  { %v5420_v26 = vpop.f32.mrf.mxu1 }
 0xc0c   :  { %v5421_v52 = vadd.f32 %v5420_v26, %v5419_v48  ;;  %v4351_v37 = vsel %vm1050_vm0, %v4345_v50, 0.0  ;;  %v4359_v57 = vmul.f32 %v4345_v50, %v4345_v50  ;;  %v6015_v48 = vld [vmem:[#allocation41 + $0x20] sm:$0xff]   ;;  %v6018_v26 = vld [vmem:[#allocation41 + $0x8] sm:$0xff]  }
 0xc0d   :  { %4352 = vadd.xlane.f32.xlu1 %v4351_v37  ;;  %5487 = vmatpush3.bf16.msra.mxu1 %v6015_v48 }
 0xc0e   :  { %v4348_v3 = vadd.f32 %v5421_v52, %v4307_v9  ;;  %v4361_v56 = vsel %vm1050_vm0, %v4359_v57, 0.0  ;;  %5488 = vmatprep.subr.bf16.mxu1 %v6690_v23 }
 0xc10   :  { %v4354_v58 = vsel %vm1050_vm0, %v4348_v3, 0.0  ;;  %v4360_v4 = vmul.f32 %v4348_v3, %v4348_v3 }
 0xc11   :  { %4362 = vadd.xlane.f32.xlu1 %v4361_v56  ;;  %5489 = vmatpush3.bf16.msra.mxu1 %v6016_v1  ;;  %v5205_v1 = vld [vmem:[%s6924_s8] ss:$0 sm:$0xff] }
 0xc12   :  { %v4364_v5 = vsel %vm1050_vm0, %v4360_v4, 0.0  ;;  %5490 = vmatprep.subr.bf16.mxu1 %v6690_v23 }
 0xc15   :  { %4355 = vadd.xlane.f32.xlu1 %v4354_v58 }
 0xc19   :  { %4365 = vadd.xlane.f32.xlu1 %v4364_v5 }
 0xc96   :  { %v4353_v55 = vpop.xlane.xlu1 %4352 }
 0xc97   :  { %v4357_v14 = vmul.f32 0.010416667, %v4353_v55  ;;  %v5194_v55 = vld [vmem:[%s7770_s0] ss:$0 sm:$0xff] }
 0xc99   :  { %v4369_v63 = vmul.f32 %v4357_v14, %v4357_v14  ;;  %v4373_v41 = vsub.f32 %v4345_v50, %v4357_v14  ;;  %v6017_v50 = vld [vmem:[#allocation41 + $0x10] sm:$0xff]  }
 0xc9a   :  { %v4363_v62 = vpop.xlane.xlu1 %4362  ;;  %5491 = vmatpush3.bf16.msra.mxu1 %v6017_v50 }
 0xc9b   :  { %v4367_v36 = vmul.f32 0.010416667, %v4363_v62  ;;  %5492 = vmatprep.subr.bf16.mxu1 %v6690_v23 }
 0xc9d   :  { %v4371_v49 = vsub.f32 %v4367_v36, %v4369_v63 }
 0xc9e   :  { %v4356_v17 = vpop.xlane.xlu1 %4355  ;;  %5493 = vmatpush3.bf16.msra.mxu1 %v6018_v26 }
 0xc9f   :  { %v4375_v8 = vadd.f32 1e-05, %v4371_v49  ;;  %v4358_v61 = vmul.f32 0.010416667, %v4356_v17  ;;  %5494 = vmatprep.subr.bf16.mxu1 %v6690_v23  ;;  %v5195_v49 = vld [vmem:[%s7771_s26] ss:$0 sm:$0xff] }
 0xca1   :  { %6048 = vrsqrt.f32 %v4375_v8  ;;  %v4370_v34 = vmul.f32 %v4358_v61, %v4358_v61  ;;  %v4374_v19 = vsub.f32 %v4348_v3, %v4358_v61 }
 0xca2   :  { %v4366_v18 = vpop.xlane.xlu1 %4365  ;;  %5495 = vmatpush3.bf16.msra.mxu1 %v6019_v51 }
 0xca3   :  { %v4368_v21 = vmul.f32 0.010416667, %v4366_v18 }
 0xca5   :  { %v4372_v0 = vsub.f32 %v4368_v21, %v4370_v34 }
 0xca7   :  { %v4376_v40 = vadd.f32 1e-05, %v4372_v0 }
 0xca9   :  { %6050 = vrsqrt.f32 %v4376_v40  ;;  %v5196_v40 = vld [vmem:[%s7772_s19] ss:$0 sm:$0xff] }
 0xcae   :  { %v6049_v29 = vpop.eup %6048 }
 0xcaf   :  { %v4379_v24 = vmul.f32 %v6049_v29, %v4373_v41 }
 0xcb1   :  { %v4388_v53 = vmul.f32 %v5184_v25, %v4379_v24 }
 0xcb3   :  { %v4397_v54 = vadd.f32 %v5185_v20, %v4388_v53 }
 0xcb5   :  { %v4399_v59 = vmax.f32 %v4397_v54, 0.0 }
 0xcb6   :  { %v6051_v35 = vpop.eup %6050 }
 0xcb7   :  { %v4380_v6 = vmul.f32 %v6051_v35, %v4374_v19 }
 0xcb9   :  { %v4389_v39 = vmul.f32 %v5184_v25, %v4380_v6 }
 0xcbb   :  { %v4398_v45 = vadd.f32 %v5185_v20, %v4389_v39 }
 0xcbd   :  { %v4400_v44 = vmax.f32 %v4398_v45, 0.0 }
 0xcbf   :  { %v4401_v27 = vpack.c.bf16 %v4400_v44, %v4399_v59 }
 0xcc1   :  { %5481 = vmatmul.mubr.msk.bf16.vlgmr.msra.gmra.mxu0 %vm1050_vm0, %v4401_v27 }
 0xd81   :  { %v4494_v46 = vpop.f32.mrf.mxu0 }
 0xd82   :  { %v4495_v32 = vadd.f32 %v5186_v30, %v4494_v46 }
 0xd83   :  { %v5482_v43 = vpop.f32.mrf.mxu0 }
 0xd84   :  { %v4501_v11 = vsel %vm1050_vm0, %v4495_v32, 0.0  ;;  %v4509_v38 = vmul.f32 %v4495_v32, %v4495_v32 }
 0xd85   :  { %4502 = vadd.xlane.f32.xlu0 %v4501_v11  ;;  %v4497_v33 = vpop.f32.mrf.mxu0 }
 0xd86   :  { %v4498_v31 = vadd.f32 %v5186_v30, %v4497_v33  ;;  %v4511_v60 = vsel %vm1050_vm0, %v4509_v38, 0.0 }
 0xd87   :  { %v5483_v15 = vpop.f32.mrf.mxu0 }
 0xd88   :  { %v4504_v47 = vsel %vm1050_vm0, %v4498_v31, 0.0  ;;  %v4510_v2 = vmul.f32 %v4498_v31, %v4498_v31 }
 0xd89   :  { %4512 = vadd.xlane.f32.xlu0 %v4511_v60  ;;  %4505 = vadd.xlane.f32.xlu1 %v4504_v47 }
 0xd8a   :  { %v4514_v16 = vsel %vm1050_vm0, %v4510_v2, 0.0 }
 0xd8d   :  { %4515 = vadd.xlane.f32.xlu1 %v4514_v16 }
 0xe0e   :  { %v4503_v52 = vpop.xlane.xlu0 %4502 }
 0xe0f   :  { %v4507_v37 = vmul.f32 0.010416667, %v4503_v52 }
 0xe11   :  { %v4519_v3 = vmul.f32 %v4507_v37, %v4507_v37  ;;  %v4523_v23 = vsub.f32 %v4495_v32, %v4507_v37 }
 0xe12   :  { %v4513_v57 = vpop.xlane.xlu0 %4512  ;;  %v4506_v9 = vpop.xlane.xlu1 %4505 }
 0xe13   :  { %v4517_v56 = vmul.f32 0.010416667, %v4513_v57  ;;  %v4508_v58 = vmul.f32 0.010416667, %v4506_v9  ;;  %v5206_v57 = vld [vmem:[%s6929_s13] ss:$0 sm:$0xff] }
 0xe14   :  { %s6693_s13 = smov [#allocation42]  }
 0xe15   :  { %v4521_v4 = vsub.f32 %v4517_v56, %v4519_v3  ;;  %v4520_v12 = vmul.f32 %v4508_v58, %v4508_v58  ;;  %v4524_v62 = vsub.f32 %v4498_v31, %v4508_v58  ;;  %s4754_s8 = sshll.u32 %s6693_s13, 4  ;;  %s4755_s8 = int_to_ptr.vmem [resolvable:$true] %s4754_s8 }
 0xe16   :  { %v4516_v5 = vpop.xlane.xlu1 %4515  ;;  %s6568_s24 = scalar_lea.vmem %s4755_s8, 256  ;;  %p6573_p0 = scmp.lt.s32.totalorder %s4755_s8, %s4755_s8 }
 0xe17   :  { %v4525_v10 = vadd.f32 1e-05, %v4521_v4  ;;  %v4518_v22 = vmul.f32 0.010416667, %v4516_v5  ;;  %p6569_p13 = scmp.ne.s32.totalorder %s4755_s8, %s6568_s24  ;;  %p6574_p1 = scmp.lt.s32.totalorder %s6568_s24, %s6568_s24 }
 0xe19   :  { %6052 = vrsqrt.f32 %v4525_v10  ;;  %v4522_v7 = vsub.f32 %v4518_v22, %v4520_v12  ;;  %v5207_v22 = vld [vmem:[#allocation2] ss:$0 sm:$0xff]  ;;  %p6575_p2 = por %p6574_p1, %p6573_p0 }
 0xe1b   :  { %v4526_v13 = vadd.f32 1e-05, %v4522_v7  ;;  %p6576_p3 = pnand %p6575_p2, %p6569_p13 }
 0xe1d   :  { %6054 = vrsqrt.f32 %v4526_v13 }
 0xe26   :  { %v6053_v28 = vpop.eup %6052 }
 0xe27   :  { %v4529_v14 = vmul.f32 %v6053_v28, %v4523_v23 }
 0xe29   :  { %v4538_v63 = vmul.f32 %v5194_v55, %v4529_v14 }
 0xe2a   :  { %v6055_v36 = vpop.eup %6054 }
 0xe2b   :  { %v4530_v17 = vmul.f32 %v6055_v36, %v4524_v62  ;;  %v4547_v61 = vadd.f32 %v5195_v49, %v4538_v63 }
 0xe2d   :  { %v4539_v8 = vmul.f32 %v5194_v55, %v4530_v17  ;;  %v4549_v34 = vmax.f32 %v4547_v61, 0.0 }
 0xe2f   :  { %v4548_v18 = vadd.f32 %v5195_v49, %v4539_v8 }
 0xe31   :  { %v4550_v21 = vmax.f32 %v4548_v18, 0.0 }
 0xe33   :  { %v4551_v0 = vpack.c.bf16 %v4550_v21, %v4549_v34 }
 0xe35   :  { %5497 = vmatmul.mubr.msk.bf16.vlgmr.msra.gmra.mxu1 %vm1050_vm0, %v4551_v0 }
 0xef5   :  { %v4644_v29 = vpop.f32.mrf.mxu1 }
 0xef6   :  { %v4645_v41 = vadd.f32 %v5196_v40, %v4644_v29 }
 0xef7   :  { %v5498_v24 = vpop.f32.mrf.mxu1 }
 0xef8   :  { %v4651_v25 = vsel %vm1050_vm0, %v4645_v41, 0.0  ;;  %v4659_v19 = vmul.f32 %v4645_v41, %v4645_v41 }
 0xef9   :  { %4652 = vadd.xlane.f32.xlu0 %v4651_v25  ;;  %v4647_v53 = vpop.f32.mrf.mxu1 }
 0xefa   :  { %v4648_v35 = vadd.f32 %v5196_v40, %v4647_v53  ;;  %v4661_v6 = vsel %vm1050_vm0, %v4659_v19, 0.0 }
 0xefb   :  { %v5499_v20 = vpop.f32.mrf.mxu1 }
 0xefc   :  { %v4654_v39 = vsel %vm1050_vm0, %v4648_v35, 0.0  ;;  %v4660_v54 = vmul.f32 %v4648_v35, %v4648_v35 }
 0xefd   :  { %4662 = vadd.xlane.f32.xlu0 %v4661_v6  ;;  %4655 = vadd.xlane.f32.xlu1 %v4654_v39 }
 0xefe   :  { %v4664_v45 = vsel %vm1050_vm0, %v4660_v54, 0.0 }
 0xf01   :  { %4665 = vadd.xlane.f32.xlu1 %v4664_v45 }
 0xf82   :  { %v4653_v59 = vpop.xlane.xlu0 %4652 }
 0xf83   :  { %v4657_v44 = vmul.f32 0.010416667, %v4653_v59 }
 0xf85   :  { %v4669_v46 = vmul.f32 %v4657_v44, %v4657_v44  ;;  %v4673_v2 = vsub.f32 %v4645_v41, %v4657_v44 }
 0xf86   :  { %v4663_v27 = vpop.xlane.xlu0 %4662  ;;  %v4656_v30 = vpop.xlane.xlu1 %4655 }
 0xf87   :  { %v4667_v32 = vmul.f32 0.010416667, %v4663_v27  ;;  %v4658_v43 = vmul.f32 0.010416667, %v4656_v30 }
 0xf89   :  { %v4671_v11 = vsub.f32 %v4667_v32, %v4669_v46  ;;  %v4670_v31 = vmul.f32 %v4658_v43, %v4658_v43  ;;  %v4674_v50 = vsub.f32 %v4648_v35, %v4658_v43 }
 0xf8a   :  { %v4666_v38 = vpop.xlane.xlu1 %4665 }
 0xf8b   :  { %v4675_v33 = vadd.f32 1e-05, %v4671_v11  ;;  %v4668_v15 = vmul.f32 0.010416667, %v4666_v38 }
 0xf8d   :  { %6056 = vrsqrt.f32 %v4675_v33  ;;  %v4672_v60 = vsub.f32 %v4668_v15, %v4670_v31 }
 0xf8f   :  { %v4676_v47 = vadd.f32 1e-05, %v4672_v60 }
 0xf91   :  { %6058 = vrsqrt.f32 %v4676_v47 }
 0xf9a   :  { %v6057_v16 = vpop.eup %6056 }
 0xf9b   :  { %v4679_v48 = vmul.f32 %v6057_v16, %v4673_v2 }
 0xf9d   :  { %v4688_v26 = vmul.f32 %v5204_v42, %v4679_v48 }
 0xf9e   :  { %v6059_v51 = vpop.eup %6058 }
 0xf9f   :  { %v4697_v52 = vadd.f32 %v5205_v1, %v4688_v26  ;;  %v4680_v37 = vmul.f32 %v6059_v51, %v4674_v50 }
 0xfa1   :  { %v4699_v9 = vmax.f32 %v4697_v52, 0.0  ;;  %v4689_v3 = vmul.f32 %v5204_v42, %v4680_v37 }
 0xfa3   :  { %v4708_v56 = vmul.f32 %v5206_v57, %v4699_v9  ;;  %v4698_v58 = vadd.f32 %v5205_v1, %v4689_v3 }
 0xfa5   :  { %v4710_v4 = vsel %vm1050_vm0, %v4708_v56, 0.0  ;;  %v4700_v5 = vmax.f32 %v4698_v58, 0.0 }
 0xfa6   :  { %4711 = vadd.xlane.f32.xlu0 %v4710_v4 }
 0xfa7   :  { %v4709_v10 = vmul.f32 %v5206_v57, %v4700_v5 }
 0xfa9   :  { %v4713_v12 = vsel %vm1050_vm0, %v4709_v10, 0.0 }
 0xfaa   :  { %4714 = vadd.xlane.f32.xlu1 %v4713_v12 }
0x102f   :  { %v4712_v7 = vpop.xlane.xlu0 %4711 }
0x1030   :  { %v4723_v13 = vadd.f32 %v5207_v22, %v4712_v7 }
0x1032   :  { %v5208_v23 = vmul.f32 -1.442695, %v4723_v13 }
0x1033   :  { %v4715_v28 = vpop.xlane.xlu1 %4714 }
0x1034   :  { %6060 = vpow2.f32 %v5208_v23  ;;  %v4724_v55 = vadd.f32 %v5207_v22, %v4715_v28 }
0x1036   :  { %v5209_v14 = vmul.f32 -1.442695, %v4724_v55 }
0x1038   :  { %6062 = vpow2.f32 %v5209_v14 }
0x1041   :  { %v6061_v62 = vpop.eup %6060 }
0x1042   :  { %v4731_v63 = vadd.f32 1.0, %v6061_v62 }
0x1044   :  { %6064 = vrcp.f32 %v4731_v63 }
0x1045   :  { %v6063_v36 = vpop.eup %6062 }
0x1046   :  { %v4732_v49 = vadd.f32 1.0, %v6063_v36 }
0x1048   :  { %6066 = vrcp.f32 %v4732_v49 }
0x1051   :  { %v6065_v17 = vpop.eup %6064 }
0x1052   :  { %4739 = vperm.xlu0 %5580, %v6065_v17  }
0x1055   :  { %v6067_v8 = vpop.eup %6066 }
0x1056   :  { %4744 = vperm.xlu1 %5581, %v6067_v8  }
0x10cd   :  { %v4740_v61 = vpop.permute.xlu0 %4739 }
0x10ce   :  { %4747 = vst [vmem:[#allocation42] sm:$0xff] %v4740_v61 }
0x10d1   :  { %v4745_v18 = vpop.permute.xlu1 %4744 }
0x10d2   :  { %4748 = vst [vmem:[#allocation42 + $0x8] sm:$0xff] %v4745_v18 }
0x10d3   :  { %6579 = shalt.err (!%p6576_p3)
}
0x10d4   :  { %s6694_s28 = smov 128   ;;  %s6695_s5 = smov 8  }
0x10d5   :  { %4760 = dma.vmem_to_hbm [thread:$0]  %s4755_s8, 256, %s6937_s17, [#allocation5], %s6694_s28, %s6694_s28, %s6695_s5  }
0x10d6   :  { %6614 = dma.done.wait [#allocation5], 256  }
0x10d7   :  { %6615 = vsyncadd [#allocation5], 4294967040 }
0x10d8   :  { %4764 = vsyncpa [#allocation4], 1 }
0x10d9   :  { %4765 = vsyncpa [#allocation7], 1 }
0x10da   :  { %4766 = vsyncpa [#allocation10], 1 }
0x10db   :  { %4767 = vsyncpa [#allocation13], 1 }
0x10dc   :  { %4768 = vsyncpa [#allocation16], 1 }
0x10dd   :  { %4769 = vsyncpa [#allocation19], 1 }
0x10de   :  { %4770 = vsyncpa [#allocation22], 1 }
0x10df   :  { %4771 = vsyncpa [#allocation25], 1 }
0x10e0   :  { %4772 = vsyncpa [#allocation28], 1 }
0x10e1   :  { %4773 = vsyncpa [#allocation31], 1 }
0x10e2   :  { %4774 = vsyncpa [#allocation34], 1 }
0x10e3   :  { %4775 = vsyncpa [#allocation37], 1 }
0x10e4   :  { %4776 = vsyncpa [#allocation40], 1 }
0x10e5   :  { %4777 = vsyncpa [#allocation5], 1 }

</bundles_post_ra>
